<compile_context>
chip_gen: v7x
topology: tpu7x:2x2x1
jax: 0.10.0
libtpu: 0.0.40
codegen_flags: <defaults>
</compile_context>

<pallas_src>
import jax
import jax.numpy as jnp
from jax.experimental import pallas as pl
from jax.experimental.pallas import tpu as pltpu

KS = 3      # conv kernel size
HALO = 8    # sublane-tile-aligned low-side halo offset used for the H axis


def spatial_attention_kernel(x_ref, shift_ref, w_ref, b_ref, out_ref, pad_ref):
    # x_ref    : (C, D, H, W)                 VMEM, one batch element
    # shift_ref: (2, W, W)                    VMEM, one-hot lane-shift matrices
    #                                         [0] = shift by -1 (kw=0), [1] = +1 (kw=2)
    # w_ref    : (54,)                        SMEM, conv weight flattened (ci, kd, kh, kw)
    # b_ref    : (1,)                         SMEM, conv bias
    # out_ref  : (C, D, H, W)                 VMEM
    # pad_ref  : (2, D+2, HALO+H+1, W)        VMEM scratch, zero halo around D / H
    C, D, H, W = x_ref.shape

    # ---- channel mean / max pooling (fori_loop keeps live ranges bounded) ----
    ch0 = x_ref[0].astype(jnp.float32)                       # (D, H, W)

    def pool_body(c, carry):
        s, m = carry
        xc = x_ref[c].astype(jnp.float32)
        return s + xc, jnp.maximum(m, xc)

    s, m = jax.lax.fori_loop(1, C, pool_body, (ch0, ch0), unroll=True)
    avg = s * (1.0 / C)

    # ---- stash pooled maps in the halo scratch ----
    # Only the halo rows/planes that are actually read by the tap slices are
    # zeroed each step (cheap, and safe even if the N grid axis is sharded
    # across TensorCores). The interior is stored at H-offset 8 (sublane tile
    # aligned when H % 8 == 0; masked-but-correct otherwise).
    zplane = jnp.zeros((1, H + 2, W), jnp.float32)
    zrow = jnp.zeros((D, 1, W), jnp.float32)
    for ci in range(2):
        pad_ref[ci, 0:1, HALO - 1:HALO + H + 1, :] = zplane          # front D halo
        pad_ref[ci, D + 1:D + 2, HALO - 1:HALO + H + 1, :] = zplane  # back D halo
        pad_ref[ci, 1:1 + D, HALO - 1:HALO, :] = zrow                # low H halo row
        pad_ref[ci, 1:1 + D, HALO + H:HALO + H + 1, :] = zrow        # high H halo row
    pad_ref[0, 1:1 + D, HALO:HALO + H, :] = avg
    pad_ref[1, 1:1 + D, HALO:HALO + H, :] = m

    # ---- conv 2->1, 3x3x3, pad 1 ----
    # Pre-accumulate the 54 taps into three per-kw slabs with scalar FMAs on
    # the VPU; the W-shift is then two matmuls against fixed one-hot shift
    # matrices (the kw=1 tap is the identity and needs no matmul).
    s_m1 = jnp.zeros((D, H, W), jnp.float32)   # kw = 0  (reads input at w-1)
    s_00 = jnp.zeros((D, H, W), jnp.float32)   # kw = 1  (identity)
    s_p1 = jnp.zeros((D, H, W), jnp.float32)   # kw = 2  (reads input at w+1)
    for ci in range(2):
        for kd in range(KS):
            plane = pad_ref[ci, kd:kd + D, :, :]             # (D, HALO+H+1, W)
            for kh in range(KS):
                # zero-padded shift by (kh-1) along H == sublane-offset value slice
                slab = plane[:, HALO - 1 + kh:HALO - 1 + kh + H, :]   # (D, H, W)
                t = ((ci * KS + kd) * KS + kh) * KS
                s_m1 = s_m1 + w_ref[t + 0] * slab
                s_00 = s_00 + w_ref[t + 1] * slab
                s_p1 = s_p1 + w_ref[t + 2] * slab

    # f32 matmuls against exact one-hot matrices (kept f32 so the demo's tight
    # numeric check holds; bf16 operands are a valid v6e/v7x speedup if the
    # pre-sigmoid precision loss is acceptable).
    acc = (s_00.reshape(D * H, W)
           + jnp.dot(s_m1.reshape(D * H, W), shift_ref[0],
                     preferred_element_type=jnp.float32)
           + jnp.dot(s_p1.reshape(D * H, W), shift_ref[1],
                     preferred_element_type=jnp.float32))
    attn = jax.nn.sigmoid(acc + b_ref[0]).reshape(D, H, W)

    # ---- apply the attention map per channel (bounded live state, lane-dense stores)
    for c in range(C):
        out_ref[c] = (x_ref[c].astype(jnp.float32) * attn).astype(out_ref.dtype)


def spatial_attention_forward(x, conv_w, conv_b):
    """x: (N, C, D, H, W); conv_w: (1, 2, 3, 3, 3); conv_b: (1,)."""
    N, C, D, H, W = x.shape
    w_flat = conv_w.reshape(-1).astype(jnp.float32)   # (54,), order (ci, kd, kh, kw)
    b = conv_b.reshape(1).astype(jnp.float32)

    # One-hot lane-shift matrices, built once per pallas_call (constant index_map):
    #   shift[0][j, w] = 1  iff j = w - 1   (conv tap kw=0, input column w-1)
    #   shift[1][j, w] = 1  iff j = w + 1   (conv tap kw=2, input column w+1)
    # Their zero edge columns implement the W zero-padding of the conv.
    shift = jnp.stack([jnp.eye(W, k=1, dtype=jnp.float32),
                       jnp.eye(W, k=-1, dtype=jnp.float32)])          # (2, W, W)

    return pl.pallas_call(
        spatial_attention_kernel,
        out_shape=jax.ShapeDtypeStruct((N, C, D, H, W), x.dtype),
        grid=(N,),
        in_specs=[
            pl.BlockSpec((None, C, D, H, W), lambda n: (n, 0, 0, 0, 0)),
            pl.BlockSpec((2, W, W), lambda n: (0, 0, 0)),             # shift matrices
            pl.BlockSpec(memory_space=pltpu.MemorySpace.SMEM),        # conv weights
            pl.BlockSpec(memory_space=pltpu.MemorySpace.SMEM),        # conv bias
        ],
        out_specs=pl.BlockSpec((None, C, D, H, W), lambda n: (n, 0, 0, 0, 0)),
        scratch_shapes=[pltpu.VMEM((2, D + 2, HALO + H + 1, W), jnp.float32)],
        compiler_params=pltpu.CompilerParams(
            dimension_semantics=("parallel",),
            vmem_limit_bytes=32 * 1024 * 1024),
    )(x, shift, w_flat, b)


def spatial_attention_reference(x, conv_w, conv_b):
    """Plain-JAX reference (same math) for verification."""
    N, C, D, H, W = x.shape
    avg = jnp.mean(x, axis=1, keepdims=True)
    mx = jnp.max(x, axis=1, keepdims=True)
    maps = jnp.concatenate([avg, mx], axis=1)                       # (N, 2, D, H, W)
    mp = jnp.pad(maps, ((0, 0), (0, 0), (1, 1), (1, 1), (1, 1)))
    conv = jnp.zeros((N, D, H, W), jnp.float32) + conv_b[0]
    for ci in range(2):
        for kd in range(KS):
            for kh in range(KS):
                for kw in range(KS):
                    conv = conv + (mp[:, ci, kd:kd + D, kh:kh + H, kw:kw + W]
                                   * conv_w[0, ci, kd, kh, kw])
    attn = jax.nn.sigmoid(conv)[:, None]
    return attn * x


if __name__ == "__main__":
    key = jax.random.PRNGKey(0)
    kx, kw_, kb = jax.random.split(key, 3)

    # Small demo shapes, NCDHW, with a lane-dense W (= 128) and H % 8 == 0.
    N, C, D, H, W = 2, 4, 4, 8, 128

    # Quantize demo data to coarse dyadic grids so all partial sums (and the
    # one-hot f32 matmuls) are exact regardless of MXU pass-splitting, keeping
    # the correctness check tight and precision-agnostic.
    x = jax.random.normal(kx, (N, C, D, H, W), jnp.float32)
    x = jnp.round(x * 4.0) / 4.0
    conv_w = jax.random.normal(kw_, (1, 2, KS, KS, KS), jnp.float32) * 0.2
    conv_w = jnp.round(conv_w * 64.0) / 64.0
    conv_b = jnp.asarray([0.125], jnp.float32)

    out = spatial_attention_forward(x, conv_w, conv_b)
    out = jax.block_until_ready(out)

    ref = jax.block_until_ready(spatial_attention_reference(x, conv_w, conv_b))
    assert out.shape == (N, C, D, H, W)
    assert jnp.allclose(out, ref, atol=1e-4, rtol=1e-4), (
        float(jnp.max(jnp.abs(out - ref))))

    print("KERNEL_OK")
</pallas_src>

<mosaic_0001>
module attributes {stable_mosaic.version = 11 : i64} {
  func.func @spatial_attention_kernel(%arg0: i32, %arg1: memref<1x4x4x8x128xf32, #tpu.memory_space<vmem>>, %arg2: memref<2x128x128xf32, #tpu.memory_space<vmem>>, %arg3: memref<54xf32, #tpu.memory_space<smem>>, %arg4: memref<1xf32, #tpu.memory_space<smem>>, %arg5: memref<1x4x4x8x128xf32, #tpu.memory_space<vmem>>, %arg6: memref<2x6x17x128xf32, #tpu.memory_space<vmem>>) attributes {dimension_semantics = [#tpu.dimension_semantics<parallel>], iteration_bounds = array<i64: 2>, scalar_prefetch = 0 : i64, scratch_operands = 1 : i64, tpu.core_type = #tpu.core_type<tc>, window_params = [{transform_indices = @transform_0, window_bounds = array<i64: 1, 4, 4, 8, 128>}, {pipeline_mode = #tpu.pipeline_mode<synchronous>, transform_indices = @transform_1, window_bounds = array<i64: 2, 128, 128>}, {transform_indices = @transform_2, window_bounds = array<i64: 54>}, {transform_indices = @transform_3, window_bounds = array<i64: 1>}, {transform_indices = @transform_4, window_bounds = array<i64: 1, 4, 4, 8, 128>}]} {
    %c0 = arith.constant 0 : index
    %c0_0 = arith.constant 0 : index
    %c0_1 = arith.constant 0 : index
    %c0_2 = arith.constant 0 : index
    %c0_3 = arith.constant 0 : index
    %0 = vector.load %arg1[%c0, %c0_0, %c0_1, %c0_2, %c0_3] : memref<1x4x4x8x128xf32, #tpu.memory_space<vmem>>, vector<1x1x4x8x128xf32>
    %1 = vector.shape_cast %0 : vector<1x1x4x8x128xf32> to vector<4x8x128xf32>
    %c1_i32 = arith.constant 1 : i32
    %c0_4 = arith.constant 0 : index
    %2 = arith.index_cast %c1_i32 : i32 to index
    %c0_5 = arith.constant 0 : index
    %c0_6 = arith.constant 0 : index
    %c0_7 = arith.constant 0 : index
    %3 = vector.load %arg1[%c0_4, %2, %c0_5, %c0_6, %c0_7] : memref<1x4x4x8x128xf32, #tpu.memory_space<vmem>>, vector<1x1x4x8x128xf32>
    %4 = vector.shape_cast %3 : vector<1x1x4x8x128xf32> to vector<4x8x128xf32>
    %5 = arith.addf %1, %4 : vector<4x8x128xf32>
    %6 = arith.maximumf %1, %4 : vector<4x8x128xf32>
    %c2_i32 = arith.constant 2 : i32
    %c0_8 = arith.constant 0 : index
    %7 = arith.index_cast %c2_i32 : i32 to index
    %c0_9 = arith.constant 0 : index
    %c0_10 = arith.constant 0 : index
    %c0_11 = arith.constant 0 : index
    %8 = vector.load %arg1[%c0_8, %7, %c0_9, %c0_10, %c0_11] : memref<1x4x4x8x128xf32, #tpu.memory_space<vmem>>, vector<1x1x4x8x128xf32>
    %9 = vector.shape_cast %8 : vector<1x1x4x8x128xf32> to vector<4x8x128xf32>
    %10 = arith.addf %5, %9 : vector<4x8x128xf32>
    %11 = arith.maximumf %6, %9 : vector<4x8x128xf32>
    %c3_i32 = arith.constant 3 : i32
    %c0_12 = arith.constant 0 : index
    %12 = arith.index_cast %c3_i32 : i32 to index
    %c0_13 = arith.constant 0 : index
    %c0_14 = arith.constant 0 : index
    %c0_15 = arith.constant 0 : index
    %13 = vector.load %arg1[%c0_12, %12, %c0_13, %c0_14, %c0_15] : memref<1x4x4x8x128xf32, #tpu.memory_space<vmem>>, vector<1x1x4x8x128xf32>
    %14 = vector.shape_cast %13 : vector<1x1x4x8x128xf32> to vector<4x8x128xf32>
    %15 = arith.addf %10, %14 : vector<4x8x128xf32>
    %16 = arith.maximumf %11, %14 : vector<4x8x128xf32>
    %c3_i32_16 = arith.constant 3 : i32
    %cst = arith.constant 2.500000e-01 : f32
    %17 = vector.broadcast %cst : f32 to vector<4x8x128xf32>
    %18 = arith.mulf %15, %17 : vector<4x8x128xf32>
    %cst_17 = arith.constant 0.000000e+00 : f32
    %19 = vector.broadcast %cst_17 : f32 to vector<1x10x128xf32>
    %cst_18 = arith.constant 0.000000e+00 : f32
    %20 = vector.broadcast %cst_18 : f32 to vector<4x1x128xf32>
    %c0_19 = arith.constant 0 : index
    %c0_20 = arith.constant 0 : index
    %c7 = arith.constant 7 : index
    %c0_21 = arith.constant 0 : index
    %21 = vector.load %arg6[%c0_19, %c0_20, %c7, %c0_21] : memref<2x6x17x128xf32, #tpu.memory_space<vmem>>, vector<1x1x10x128xf32>
    %22 = vector.shape_cast %21 : vector<1x1x10x128xf32> to vector<1x10x128xf32>
    %23 = vector.shape_cast %19 : vector<1x10x128xf32> to vector<1x1x10x128xf32>
    tpu.vector_store %arg6[%c0_19, %c0_20, %c7, %c0_21], %23 {strides = array<i32>} : memref<2x6x17x128xf32, #tpu.memory_space<vmem>>, vector<1x1x10x128xf32>,
    %c0_22 = arith.constant 0 : index
    %c5 = arith.constant 5 : index
    %c7_23 = arith.constant 7 : index
    %c0_24 = arith.constant 0 : index
    %24 = vector.load %arg6[%c0_22, %c5, %c7_23, %c0_24] : memref<2x6x17x128xf32, #tpu.memory_space<vmem>>, vector<1x1x10x128xf32>
    %25 = vector.shape_cast %24 : vector<1x1x10x128xf32> to vector<1x10x128xf32>
    %26 = vector.shape_cast %19 : vector<1x10x128xf32> to vector<1x1x10x128xf32>
    tpu.vector_store %arg6[%c0_22, %c5, %c7_23, %c0_24], %26 {strides = array<i32>} : memref<2x6x17x128xf32, #tpu.memory_space<vmem>>, vector<1x1x10x128xf32>,
    %c0_25 = arith.constant 0 : index
    %c1 = arith.constant 1 : index
    %c7_26 = arith.constant 7 : index
    %c0_27 = arith.constant 0 : index
    %27 = vector.load %arg6[%c0_25, %c1, %c7_26, %c0_27] : memref<2x6x17x128xf32, #tpu.memory_space<vmem>>, vector<1x4x1x128xf32>
    %28 = vector.shape_cast %27 : vector<1x4x1x128xf32> to vector<4x1x128xf32>
    %29 = vector.shape_cast %20 : vector<4x1x128xf32> to vector<1x4x1x128xf32>
    tpu.vector_store %arg6[%c0_25, %c1, %c7_26, %c0_27], %29 {strides = array<i32>} : memref<2x6x17x128xf32, #tpu.memory_space<vmem>>, vector<1x4x1x128xf32>,
    %c0_28 = arith.constant 0 : index
    %c1_29 = arith.constant 1 : index
    %c16 = arith.constant 16 : index
    %c0_30 = arith.constant 0 : index
    %30 = vector.load %arg6[%c0_28, %c1_29, %c16, %c0_30] : memref<2x6x17x128xf32, #tpu.memory_space<vmem>>, vector<1x4x1x128xf32>
    %31 = vector.shape_cast %30 : vector<1x4x1x128xf32> to vector<4x1x128xf32>
    %32 = vector.shape_cast %20 : vector<4x1x128xf32> to vector<1x4x1x128xf32>
    tpu.vector_store %arg6[%c0_28, %c1_29, %c16, %c0_30], %32 {strides = array<i32>} : memref<2x6x17x128xf32, #tpu.memory_space<vmem>>, vector<1x4x1x128xf32>,
    %c1_31 = arith.constant 1 : index
    %c0_32 = arith.constant 0 : index
    %c7_33 = arith.constant 7 : index
    %c0_34 = arith.constant 0 : index
    %33 = vector.load %arg6[%c1_31, %c0_32, %c7_33, %c0_34] : memref<2x6x17x128xf32, #tpu.memory_space<vmem>>, vector<1x1x10x128xf32>
    %34 = vector.shape_cast %33 : vector<1x1x10x128xf32> to vector<1x10x128xf32>
    %35 = vector.shape_cast %19 : vector<1x10x128xf32> to vector<1x1x10x128xf32>
    tpu.vector_store %arg6[%c1_31, %c0_32, %c7_33, %c0_34], %35 {strides = array<i32>} : memref<2x6x17x128xf32, #tpu.memory_space<vmem>>, vector<1x1x10x128xf32>,
    %c1_35 = arith.constant 1 : index
    %c5_36 = arith.constant 5 : index
    %c7_37 = arith.constant 7 : index
    %c0_38 = arith.constant 0 : index
    %36 = vector.load %arg6[%c1_35, %c5_36, %c7_37, %c0_38] : memref<2x6x17x128xf32, #tpu.memory_space<vmem>>, vector<1x1x10x128xf32>
    %37 = vector.shape_cast %36 : vector<1x1x10x128xf32> to vector<1x10x128xf32>
    %38 = vector.shape_cast %19 : vector<1x10x128xf32> to vector<1x1x10x128xf32>
    tpu.vector_store %arg6[%c1_35, %c5_36, %c7_37, %c0_38], %38 {strides = array<i32>} : memref<2x6x17x128xf32, #tpu.memory_space<vmem>>, vector<1x1x10x128xf32>,
    %c1_39 = arith.constant 1 : index
    %c1_40 = arith.constant 1 : index
    %c7_41 = arith.constant 7 : index
    %c0_42 = arith.constant 0 : index
    %39 = vector.load %arg6[%c1_39, %c1_40, %c7_41, %c0_42] : memref<2x6x17x128xf32, #tpu.memory_space<vmem>>, vector<1x4x1x128xf32>
    %40 = vector.shape_cast %39 : vector<1x4x1x128xf32> to vector<4x1x128xf32>
    %41 = vector.shape_cast %20 : vector<4x1x128xf32> to vector<1x4x1x128xf32>
    tpu.vector_store %arg6[%c1_39, %c1_40, %c7_41, %c0_42], %41 {strides = array<i32>} : memref<2x6x17x128xf32, #tpu.memory_space<vmem>>, vector<1x4x1x128xf32>,
    %c1_43 = arith.constant 1 : index
    %c1_44 = arith.constant 1 : index
    %c16_45 = arith.constant 16 : index
    %c0_46 = arith.constant 0 : index
    %42 = vector.load %arg6[%c1_43, %c1_44, %c16_45, %c0_46] : memref<2x6x17x128xf32, #tpu.memory_space<vmem>>, vector<1x4x1x128xf32>
    %43 = vector.shape_cast %42 : vector<1x4x1x128xf32> to vector<4x1x128xf32>
    %44 = vector.shape_cast %20 : vector<4x1x128xf32> to vector<1x4x1x128xf32>
    tpu.vector_store %arg6[%c1_43, %c1_44, %c16_45, %c0_46], %44 {strides = array<i32>} : memref<2x6x17x128xf32, #tpu.memory_space<vmem>>, vector<1x4x1x128xf32>,
    %c0_47 = arith.constant 0 : index
    %c1_48 = arith.constant 1 : index
    %c8 = arith.constant 8 : index
    %c0_49 = arith.constant 0 : index
    %45 = vector.load %arg6[%c0_47, %c1_48, %c8, %c0_49] : memref<2x6x17x128xf32, #tpu.memory_space<vmem>>, vector<1x4x8x128xf32>
    %46 = vector.shape_cast %45 : vector<1x4x8x128xf32> to vector<4x8x128xf32>
    %47 = vector.shape_cast %18 : vector<4x8x128xf32> to vector<1x4x8x128xf32>
    tpu.vector_store %arg6[%c0_47, %c1_48, %c8, %c0_49], %47 {strides = array<i32>} : memref<2x6x17x128xf32, #tpu.memory_space<vmem>>, vector<1x4x8x128xf32>,
    %c1_50 = arith.constant 1 : index
    %c1_51 = arith.constant 1 : index
    %c8_52 = arith.constant 8 : index
    %c0_53 = arith.constant 0 : index
    %48 = vector.load %arg6[%c1_50, %c1_51, %c8_52, %c0_53] : memref<2x6x17x128xf32, #tpu.memory_space<vmem>>, vector<1x4x8x128xf32>
    %49 = vector.shape_cast %48 : vector<1x4x8x128xf32> to vector<4x8x128xf32>
    %50 = vector.shape_cast %16 : vector<4x8x128xf32> to vector<1x4x8x128xf32>
    tpu.vector_store %arg6[%c1_50, %c1_51, %c8_52, %c0_53], %50 {strides = array<i32>} : memref<2x6x17x128xf32, #tpu.memory_space<vmem>>, vector<1x4x8x128xf32>,
    %cst_54 = arith.constant 0.000000e+00 : f32
    %51 = vector.broadcast %cst_54 : f32 to vector<4x8x128xf32>
    %cst_55 = arith.constant 0.000000e+00 : f32
    %52 = vector.broadcast %cst_55 : f32 to vector<4x8x128xf32>
    %cst_56 = arith.constant 0.000000e+00 : f32
    %53 = vector.broadcast %cst_56 : f32 to vector<4x8x128xf32>
    %c0_57 = arith.constant 0 : index
    %c0_58 = arith.constant 0 : index
    %c0_59 = arith.constant 0 : index
    %c0_60 = arith.constant 0 : index
    %54 = vector.load %arg6[%c0_57, %c0_58, %c0_59, %c0_60] : memref<2x6x17x128xf32, #tpu.memory_space<vmem>>, vector<1x4x17x128xf32>
    %55 = vector.shape_cast %54 : vector<1x4x17x128xf32> to vector<4x17x128xf32>
    %56 = vector.extract_strided_slice %55 {offsets = [0, 7, 0], sizes = [4, 8, 128], strides = [1, 1, 1]} : vector<4x17x128xf32> to vector<4x8x128xf32>
    %c0_61 = arith.constant 0 : index
    %57 = memref.load %arg3[%c0_61] : memref<54xf32, #tpu.memory_space<smem>>
    %58 = vector.broadcast %57 : f32 to vector<4x8x128xf32>
    %59 = arith.mulf %58, %56 : vector<4x8x128xf32>
    %60 = arith.addf %51, %59 : vector<4x8x128xf32>
    %c1_62 = arith.constant 1 : index
    %61 = memref.load %arg3[%c1_62] : memref<54xf32, #tpu.memory_space<smem>>
    %62 = vector.broadcast %61 : f32 to vector<4x8x128xf32>
    %63 = arith.mulf %62, %56 : vector<4x8x128xf32>
    %64 = arith.addf %52, %63 : vector<4x8x128xf32>
    %c2 = arith.constant 2 : index
    %65 = memref.load %arg3[%c2] : memref<54xf32, #tpu.memory_space<smem>>
    %66 = vector.broadcast %65 : f32 to vector<4x8x128xf32>
    %67 = arith.mulf %66, %56 : vector<4x8x128xf32>
    %68 = arith.addf %53, %67 : vector<4x8x128xf32>
    %69 = vector.extract_strided_slice %55 {offsets = [0, 8, 0], sizes = [4, 8, 128], strides = [1, 1, 1]} : vector<4x17x128xf32> to vector<4x8x128xf32>
    %c3 = arith.constant 3 : index
    %70 = memref.load %arg3[%c3] : memref<54xf32, #tpu.memory_space<smem>>
    %71 = vector.broadcast %70 : f32 to vector<4x8x128xf32>
    %72 = arith.mulf %71, %69 : vector<4x8x128xf32>
    %73 = arith.addf %60, %72 : vector<4x8x128xf32>
    %c4 = arith.constant 4 : index
    %74 = memref.load %arg3[%c4] : memref<54xf32, #tpu.memory_space<smem>>
    %75 = vector.broadcast %74 : f32 to vector<4x8x128xf32>
    %76 = arith.mulf %75, %69 : vector<4x8x128xf32>
    %77 = arith.addf %64, %76 : vector<4x8x128xf32>
    %c5_63 = arith.constant 5 : index
    %78 = memref.load %arg3[%c5_63] : memref<54xf32, #tpu.memory_space<smem>>
    %79 = vector.broadcast %78 : f32 to vector<4x8x128xf32>
    %80 = arith.mulf %79, %69 : vector<4x8x128xf32>
    %81 = arith.addf %68, %80 : vector<4x8x128xf32>
    %82 = vector.extract_strided_slice %55 {offsets = [0, 9, 0], sizes = [4, 8, 128], strides = [1, 1, 1]} : vector<4x17x128xf32> to vector<4x8x128xf32>
    %c6 = arith.constant 6 : index
    %83 = memref.load %arg3[%c6] : memref<54xf32, #tpu.memory_space<smem>>
    %84 = vector.broadcast %83 : f32 to vector<4x8x128xf32>
    %85 = arith.mulf %84, %82 : vector<4x8x128xf32>
    %86 = arith.addf %73, %85 : vector<4x8x128xf32>
    %c7_64 = arith.constant 7 : index
    %87 = memref.load %arg3[%c7_64] : memref<54xf32, #tpu.memory_space<smem>>
    %88 = vector.broadcast %87 : f32 to vector<4x8x128xf32>
    %89 = arith.mulf %88, %82 : vector<4x8x128xf32>
    %90 = arith.addf %77, %89 : vector<4x8x128xf32>
    %c8_65 = arith.constant 8 : index
    %91 = memref.load %arg3[%c8_65] : memref<54xf32, #tpu.memory_space<smem>>
    %92 = vector.broadcast %91 : f32 to vector<4x8x128xf32>
    %93 = arith.mulf %92, %82 : vector<4x8x128xf32>
    %94 = arith.addf %81, %93 : vector<4x8x128xf32>
    %c0_66 = arith.constant 0 : index
    %c1_67 = arith.constant 1 : index
    %c0_68 = arith.constant 0 : index
    %c0_69 = arith.constant 0 : index
    %95 = vector.load %arg6[%c0_66, %c1_67, %c0_68, %c0_69] : memref<2x6x17x128xf32, #tpu.memory_space<vmem>>, vector<1x4x17x128xf32>
    %96 = vector.shape_cast %95 : vector<1x4x17x128xf32> to vector<4x17x128xf32>
    %97 = vector.extract_strided_slice %96 {offsets = [0, 7, 0], sizes = [4, 8, 128], strides = [1, 1, 1]} : vector<4x17x128xf32> to vector<4x8x128xf32>
    %c9 = arith.constant 9 : index
    %98 = memref.load %arg3[%c9] : memref<54xf32, #tpu.memory_space<smem>>
    %99 = vector.broadcast %98 : f32 to vector<4x8x128xf32>
    %100 = arith.mulf %99, %97 : vector<4x8x128xf32>
    %101 = arith.addf %86, %100 : vector<4x8x128xf32>
    %c10 = arith.constant 10 : index
    %102 = memref.load %arg3[%c10] : memref<54xf32, #tpu.memory_space<smem>>
    %103 = vector.broadcast %102 : f32 to vector<4x8x128xf32>
    %104 = arith.mulf %103, %97 : vector<4x8x128xf32>
    %105 = arith.addf %90, %104 : vector<4x8x128xf32>
    %c11 = arith.constant 11 : index
    %106 = memref.load %arg3[%c11] : memref<54xf32, #tpu.memory_space<smem>>
    %107 = vector.broadcast %106 : f32 to vector<4x8x128xf32>
    %108 = arith.mulf %107, %97 : vector<4x8x128xf32>
    %109 = arith.addf %94, %108 : vector<4x8x128xf32>
    %110 = vector.extract_strided_slice %96 {offsets = [0, 8, 0], sizes = [4, 8, 128], strides = [1, 1, 1]} : vector<4x17x128xf32> to vector<4x8x128xf32>
    %c12 = arith.constant 12 : index
    %111 = memref.load %arg3[%c12] : memref<54xf32, #tpu.memory_space<smem>>
    %112 = vector.broadcast %111 : f32 to vector<4x8x128xf32>
    %113 = arith.mulf %112, %110 : vector<4x8x128xf32>
    %114 = arith.addf %101, %113 : vector<4x8x128xf32>
    %c13 = arith.constant 13 : index
    %115 = memref.load %arg3[%c13] : memref<54xf32, #tpu.memory_space<smem>>
    %116 = vector.broadcast %115 : f32 to vector<4x8x128xf32>
    %117 = arith.mulf %116, %110 : vector<4x8x128xf32>
    %118 = arith.addf %105, %117 : vector<4x8x128xf32>
    %c14 = arith.constant 14 : index
    %119 = memref.load %arg3[%c14] : memref<54xf32, #tpu.memory_space<smem>>
    %120 = vector.broadcast %119 : f32 to vector<4x8x128xf32>
    %121 = arith.mulf %120, %110 : vector<4x8x128xf32>
    %122 = arith.addf %109, %121 : vector<4x8x128xf32>
    %123 = vector.extract_strided_slice %96 {offsets = [0, 9, 0], sizes = [4, 8, 128], strides = [1, 1, 1]} : vector<4x17x128xf32> to vector<4x8x128xf32>
    %c15 = arith.constant 15 : index
    %124 = memref.load %arg3[%c15] : memref<54xf32, #tpu.memory_space<smem>>
    %125 = vector.broadcast %124 : f32 to vector<4x8x128xf32>
    %126 = arith.mulf %125, %123 : vector<4x8x128xf32>
    %127 = arith.addf %114, %126 : vector<4x8x128xf32>
    %c16_70 = arith.constant 16 : index
    %128 = memref.load %arg3[%c16_70] : memref<54xf32, #tpu.memory_space<smem>>
    %129 = vector.broadcast %128 : f32 to vector<4x8x128xf32>
    %130 = arith.mulf %129, %123 : vector<4x8x128xf32>
    %131 = arith.addf %118, %130 : vector<4x8x128xf32>
    %c17 = arith.constant 17 : index
    %132 = memref.load %arg3[%c17] : memref<54xf32, #tpu.memory_space<smem>>
    %133 = vector.broadcast %132 : f32 to vector<4x8x128xf32>
    %134 = arith.mulf %133, %123 : vector<4x8x128xf32>
    %135 = arith.addf %122, %134 : vector<4x8x128xf32>
    %c0_71 = arith.constant 0 : index
    %c2_72 = arith.constant 2 : index
    %c0_73 = arith.constant 0 : index
    %c0_74 = arith.constant 0 : index
    %136 = vector.load %arg6[%c0_71, %c2_72, %c0_73, %c0_74] : memref<2x6x17x128xf32, #tpu.memory_space<vmem>>, vector<1x4x17x128xf32>
    %137 = vector.shape_cast %136 : vector<1x4x17x128xf32> to vector<4x17x128xf32>
    %138 = vector.extract_strided_slice %137 {offsets = [0, 7, 0], sizes = [4, 8, 128], strides = [1, 1, 1]} : vector<4x17x128xf32> to vector<4x8x128xf32>
    %c18 = arith.constant 18 : index
    %139 = memref.load %arg3[%c18] : memref<54xf32, #tpu.memory_space<smem>>
    %140 = vector.broadcast %139 : f32 to vector<4x8x128xf32>
    %141 = arith.mulf %140, %138 : vector<4x8x128xf32>
    %142 = arith.addf %127, %141 : vector<4x8x128xf32>
    %c19 = arith.constant 19 : index
    %143 = memref.load %arg3[%c19] : memref<54xf32, #tpu.memory_space<smem>>
    %144 = vector.broadcast %143 : f32 to vector<4x8x128xf32>
    %145 = arith.mulf %144, %138 : vector<4x8x128xf32>
    %146 = arith.addf %131, %145 : vector<4x8x128xf32>
    %c20 = arith.constant 20 : index
    %147 = memref.load %arg3[%c20] : memref<54xf32, #tpu.memory_space<smem>>
    %148 = vector.broadcast %147 : f32 to vector<4x8x128xf32>
    %149 = arith.mulf %148, %138 : vector<4x8x128xf32>
    %150 = arith.addf %135, %149 : vector<4x8x128xf32>
    %151 = vector.extract_strided_slice %137 {offsets = [0, 8, 0], sizes = [4, 8, 128], strides = [1, 1, 1]} : vector<4x17x128xf32> to vector<4x8x128xf32>
    %c21 = arith.constant 21 : index
    %152 = memref.load %arg3[%c21] : memref<54xf32, #tpu.memory_space<smem>>
    %153 = vector.broadcast %152 : f32 to vector<4x8x128xf32>
    %154 = arith.mulf %153, %151 : vector<4x8x128xf32>
    %155 = arith.addf %142, %154 : vector<4x8x128xf32>
    %c22 = arith.constant 22 : index
    %156 = memref.load %arg3[%c22] : memref<54xf32, #tpu.memory_space<smem>>
    %157 = vector.broadcast %156 : f32 to vector<4x8x128xf32>
    %158 = arith.mulf %157, %151 : vector<4x8x128xf32>
    %159 = arith.addf %146, %158 : vector<4x8x128xf32>
    %c23 = arith.constant 23 : index
    %160 = memref.load %arg3[%c23] : memref<54xf32, #tpu.memory_space<smem>>
    %161 = vector.broadcast %160 : f32 to vector<4x8x128xf32>
    %162 = arith.mulf %161, %151 : vector<4x8x128xf32>
    %163 = arith.addf %150, %162 : vector<4x8x128xf32>
    %164 = vector.extract_strided_slice %137 {offsets = [0, 9, 0], sizes = [4, 8, 128], strides = [1, 1, 1]} : vector<4x17x128xf32> to vector<4x8x128xf32>
    %c24 = arith.constant 24 : index
    %165 = memref.load %arg3[%c24] : memref<54xf32, #tpu.memory_space<smem>>
    %166 = vector.broadcast %165 : f32 to vector<4x8x128xf32>
    %167 = arith.mulf %166, %164 : vector<4x8x128xf32>
    %168 = arith.addf %155, %167 : vector<4x8x128xf32>
    %c25 = arith.constant 25 : index
    %169 = memref.load %arg3[%c25] : memref<54xf32, #tpu.memory_space<smem>>
    %170 = vector.broadcast %169 : f32 to vector<4x8x128xf32>
    %171 = arith.mulf %170, %164 : vector<4x8x128xf32>
    %172 = arith.addf %159, %171 : vector<4x8x128xf32>
    %c26 = arith.constant 26 : index
    %173 = memref.load %arg3[%c26] : memref<54xf32, #tpu.memory_space<smem>>
    %174 = vector.broadcast %173 : f32 to vector<4x8x128xf32>
    %175 = arith.mulf %174, %164 : vector<4x8x128xf32>
    %176 = arith.addf %163, %175 : vector<4x8x128xf32>
    %c1_75 = arith.constant 1 : index
    %c0_76 = arith.constant 0 : index
    %c0_77 = arith.constant 0 : index
    %c0_78 = arith.constant 0 : index
    %177 = vector.load %arg6[%c1_75, %c0_76, %c0_77, %c0_78] : memref<2x6x17x128xf32, #tpu.memory_space<vmem>>, vector<1x4x17x128xf32>
    %178 = vector.shape_cast %177 : vector<1x4x17x128xf32> to vector<4x17x128xf32>
    %179 = vector.extract_strided_slice %178 {offsets = [0, 7, 0], sizes = [4, 8, 128], strides = [1, 1, 1]} : vector<4x17x128xf32> to vector<4x8x128xf32>
    %c27 = arith.constant 27 : index
    %180 = memref.load %arg3[%c27] : memref<54xf32, #tpu.memory_space<smem>>
    %181 = vector.broadcast %180 : f32 to vector<4x8x128xf32>
    %182 = arith.mulf %181, %179 : vector<4x8x128xf32>
    %183 = arith.addf %168, %182 : vector<4x8x128xf32>
    %c28 = arith.constant 28 : index
    %184 = memref.load %arg3[%c28] : memref<54xf32, #tpu.memory_space<smem>>
    %185 = vector.broadcast %184 : f32 to vector<4x8x128xf32>
    %186 = arith.mulf %185, %179 : vector<4x8x128xf32>
    %187 = arith.addf %172, %186 : vector<4x8x128xf32>
    %c29 = arith.constant 29 : index
    %188 = memref.load %arg3[%c29] : memref<54xf32, #tpu.memory_space<smem>>
    %189 = vector.broadcast %188 : f32 to vector<4x8x128xf32>
    %190 = arith.mulf %189, %179 : vector<4x8x128xf32>
    %191 = arith.addf %176, %190 : vector<4x8x128xf32>
    %192 = vector.extract_strided_slice %178 {offsets = [0, 8, 0], sizes = [4, 8, 128], strides = [1, 1, 1]} : vector<4x17x128xf32> to vector<4x8x128xf32>
    %c30 = arith.constant 30 : index
    %193 = memref.load %arg3[%c30] : memref<54xf32, #tpu.memory_space<smem>>
    %194 = vector.broadcast %193 : f32 to vector<4x8x128xf32>
    %195 = arith.mulf %194, %192 : vector<4x8x128xf32>
    %196 = arith.addf %183, %195 : vector<4x8x128xf32>
    %c31 = arith.constant 31 : index
    %197 = memref.load %arg3[%c31] : memref<54xf32, #tpu.memory_space<smem>>
    %198 = vector.broadcast %197 : f32 to vector<4x8x128xf32>
    %199 = arith.mulf %198, %192 : vector<4x8x128xf32>
    %200 = arith.addf %187, %199 : vector<4x8x128xf32>
    %c32 = arith.constant 32 : index
    %201 = memref.load %arg3[%c32] : memref<54xf32, #tpu.memory_space<smem>>
    %202 = vector.broadcast %201 : f32 to vector<4x8x128xf32>
    %203 = arith.mulf %202, %192 : vector<4x8x128xf32>
    %204 = arith.addf %191, %203 : vector<4x8x128xf32>
    %205 = vector.extract_strided_slice %178 {offsets = [0, 9, 0], sizes = [4, 8, 128], strides = [1, 1, 1]} : vector<4x17x128xf32> to vector<4x8x128xf32>
    %c33 = arith.constant 33 : index
    %206 = memref.load %arg3[%c33] : memref<54xf32, #tpu.memory_space<smem>>
    %207 = vector.broadcast %206 : f32 to vector<4x8x128xf32>
    %208 = arith.mulf %207, %205 : vector<4x8x128xf32>
    %209 = arith.addf %196, %208 : vector<4x8x128xf32>
    %c34 = arith.constant 34 : index
    %210 = memref.load %arg3[%c34] : memref<54xf32, #tpu.memory_space<smem>>
    %211 = vector.broadcast %210 : f32 to vector<4x8x128xf32>
    %212 = arith.mulf %211, %205 : vector<4x8x128xf32>
    %213 = arith.addf %200, %212 : vector<4x8x128xf32>
    %c35 = arith.constant 35 : index
    %214 = memref.load %arg3[%c35] : memref<54xf32, #tpu.memory_space<smem>>
    %215 = vector.broadcast %214 : f32 to vector<4x8x128xf32>
    %216 = arith.mulf %215, %205 : vector<4x8x128xf32>
    %217 = arith.addf %204, %216 : vector<4x8x128xf32>
    %c1_79 = arith.constant 1 : index
    %c1_80 = arith.constant 1 : index
    %c0_81 = arith.constant 0 : index
    %c0_82 = arith.constant 0 : index
    %218 = vector.load %arg6[%c1_79, %c1_80, %c0_81, %c0_82] : memref<2x6x17x128xf32, #tpu.memory_space<vmem>>, vector<1x4x17x128xf32>
    %219 = vector.shape_cast %218 : vector<1x4x17x128xf32> to vector<4x17x128xf32>
    %220 = vector.extract_strided_slice %219 {offsets = [0, 7, 0], sizes = [4, 8, 128], strides = [1, 1, 1]} : vector<4x17x128xf32> to vector<4x8x128xf32>
    %c36 = arith.constant 36 : index
    %221 = memref.load %arg3[%c36] : memref<54xf32, #tpu.memory_space<smem>>
    %222 = vector.broadcast %221 : f32 to vector<4x8x128xf32>
    %223 = arith.mulf %222, %220 : vector<4x8x128xf32>
    %224 = arith.addf %209, %223 : vector<4x8x128xf32>
    %c37 = arith.constant 37 : index
    %225 = memref.load %arg3[%c37] : memref<54xf32, #tpu.memory_space<smem>>
    %226 = vector.broadcast %225 : f32 to vector<4x8x128xf32>
    %227 = arith.mulf %226, %220 : vector<4x8x128xf32>
    %228 = arith.addf %213, %227 : vector<4x8x128xf32>
    %c38 = arith.constant 38 : index
    %229 = memref.load %arg3[%c38] : memref<54xf32, #tpu.memory_space<smem>>
    %230 = vector.broadcast %229 : f32 to vector<4x8x128xf32>
    %231 = arith.mulf %230, %220 : vector<4x8x128xf32>
    %232 = arith.addf %217, %231 : vector<4x8x128xf32>
    %233 = vector.extract_strided_slice %219 {offsets = [0, 8, 0], sizes = [4, 8, 128], strides = [1, 1, 1]} : vector<4x17x128xf32> to vector<4x8x128xf32>
    %c39 = arith.constant 39 : index
    %234 = memref.load %arg3[%c39] : memref<54xf32, #tpu.memory_space<smem>>
    %235 = vector.broadcast %234 : f32 to vector<4x8x128xf32>
    %236 = arith.mulf %235, %233 : vector<4x8x128xf32>
    %237 = arith.addf %224, %236 : vector<4x8x128xf32>
    %c40 = arith.constant 40 : index
    %238 = memref.load %arg3[%c40] : memref<54xf32, #tpu.memory_space<smem>>
    %239 = vector.broadcast %238 : f32 to vector<4x8x128xf32>
    %240 = arith.mulf %239, %233 : vector<4x8x128xf32>
    %241 = arith.addf %228, %240 : vector<4x8x128xf32>
    %c41 = arith.constant 41 : index
    %242 = memref.load %arg3[%c41] : memref<54xf32, #tpu.memory_space<smem>>
    %243 = vector.broadcast %242 : f32 to vector<4x8x128xf32>
    %244 = arith.mulf %243, %233 : vector<4x8x128xf32>
    %245 = arith.addf %232, %244 : vector<4x8x128xf32>
    %246 = vector.extract_strided_slice %219 {offsets = [0, 9, 0], sizes = [4, 8, 128], strides = [1, 1, 1]} : vector<4x17x128xf32> to vector<4x8x128xf32>
    %c42 = arith.constant 42 : index
    %247 = memref.load %arg3[%c42] : memref<54xf32, #tpu.memory_space<smem>>
    %248 = vector.broadcast %247 : f32 to vector<4x8x128xf32>
    %249 = arith.mulf %248, %246 : vector<4x8x128xf32>
    %250 = arith.addf %237, %249 : vector<4x8x128xf32>
    %c43 = arith.constant 43 : index
    %251 = memref.load %arg3[%c43] : memref<54xf32, #tpu.memory_space<smem>>
    %252 = vector.broadcast %251 : f32 to vector<4x8x128xf32>
    %253 = arith.mulf %252, %246 : vector<4x8x128xf32>
    %254 = arith.addf %241, %253 : vector<4x8x128xf32>
    %c44 = arith.constant 44 : index
    %255 = memref.load %arg3[%c44] : memref<54xf32, #tpu.memory_space<smem>>
    %256 = vector.broadcast %255 : f32 to vector<4x8x128xf32>
    %257 = arith.mulf %256, %246 : vector<4x8x128xf32>
    %258 = arith.addf %245, %257 : vector<4x8x128xf32>
    %c1_83 = arith.constant 1 : index
    %c2_84 = arith.constant 2 : index
    %c0_85 = arith.constant 0 : index
    %c0_86 = arith.constant 0 : index
    %259 = vector.load %arg6[%c1_83, %c2_84, %c0_85, %c0_86] : memref<2x6x17x128xf32, #tpu.memory_space<vmem>>, vector<1x4x17x128xf32>
    %260 = vector.shape_cast %259 : vector<1x4x17x128xf32> to vector<4x17x128xf32>
    %261 = vector.extract_strided_slice %260 {offsets = [0, 7, 0], sizes = [4, 8, 128], strides = [1, 1, 1]} : vector<4x17x128xf32> to vector<4x8x128xf32>
    %c45 = arith.constant 45 : index
    %262 = memref.load %arg3[%c45] : memref<54xf32, #tpu.memory_space<smem>>
    %263 = vector.broadcast %262 : f32 to vector<4x8x128xf32>
    %264 = arith.mulf %263, %261 : vector<4x8x128xf32>
    %265 = arith.addf %250, %264 : vector<4x8x128xf32>
    %c46 = arith.constant 46 : index
    %266 = memref.load %arg3[%c46] : memref<54xf32, #tpu.memory_space<smem>>
    %267 = vector.broadcast %266 : f32 to vector<4x8x128xf32>
    %268 = arith.mulf %267, %261 : vector<4x8x128xf32>
    %269 = arith.addf %254, %268 : vector<4x8x128xf32>
    %c47 = arith.constant 47 : index
    %270 = memref.load %arg3[%c47] : memref<54xf32, #tpu.memory_space<smem>>
    %271 = vector.broadcast %270 : f32 to vector<4x8x128xf32>
    %272 = arith.mulf %271, %261 : vector<4x8x128xf32>
    %273 = arith.addf %258, %272 : vector<4x8x128xf32>
    %274 = vector.extract_strided_slice %260 {offsets = [0, 8, 0], sizes = [4, 8, 128], strides = [1, 1, 1]} : vector<4x17x128xf32> to vector<4x8x128xf32>
    %c48 = arith.constant 48 : index
    %275 = memref.load %arg3[%c48] : memref<54xf32, #tpu.memory_space<smem>>
    %276 = vector.broadcast %275 : f32 to vector<4x8x128xf32>
    %277 = arith.mulf %276, %274 : vector<4x8x128xf32>
    %278 = arith.addf %265, %277 : vector<4x8x128xf32>
    %c49 = arith.constant 49 : index
    %279 = memref.load %arg3[%c49] : memref<54xf32, #tpu.memory_space<smem>>
    %280 = vector.broadcast %279 : f32 to vector<4x8x128xf32>
    %281 = arith.mulf %280, %274 : vector<4x8x128xf32>
    %282 = arith.addf %269, %281 : vector<4x8x128xf32>
    %c50 = arith.constant 50 : index
    %283 = memref.load %arg3[%c50] : memref<54xf32, #tpu.memory_space<smem>>
    %284 = vector.broadcast %283 : f32 to vector<4x8x128xf32>
    %285 = arith.mulf %284, %274 : vector<4x8x128xf32>
    %286 = arith.addf %273, %285 : vector<4x8x128xf32>
    %287 = vector.extract_strided_slice %260 {offsets = [0, 9, 0], sizes = [4, 8, 128], strides = [1, 1, 1]} : vector<4x17x128xf32> to vector<4x8x128xf32>
    %c51 = arith.constant 51 : index
    %288 = memref.load %arg3[%c51] : memref<54xf32, #tpu.memory_space<smem>>
    %289 = vector.broadcast %288 : f32 to vector<4x8x128xf32>
    %290 = arith.mulf %289, %287 : vector<4x8x128xf32>
    %291 = arith.addf %278, %290 : vector<4x8x128xf32>
    %c52 = arith.constant 52 : index
    %292 = memref.load %arg3[%c52] : memref<54xf32, #tpu.memory_space<smem>>
    %293 = vector.broadcast %292 : f32 to vector<4x8x128xf32>
    %294 = arith.mulf %293, %287 : vector<4x8x128xf32>
    %295 = arith.addf %282, %294 : vector<4x8x128xf32>
    %c53 = arith.constant 53 : index
    %296 = memref.load %arg3[%c53] : memref<54xf32, #tpu.memory_space<smem>>
    %297 = vector.broadcast %296 : f32 to vector<4x8x128xf32>
    %298 = arith.mulf %297, %287 : vector<4x8x128xf32>
    %299 = arith.addf %286, %298 : vector<4x8x128xf32>
    %300 = vector.shape_cast %295 : vector<4x8x128xf32> to vector<32x128xf32>
    %301 = vector.shape_cast %291 : vector<4x8x128xf32> to vector<32x128xf32>
    %c0_87 = arith.constant 0 : index
    %c0_88 = arith.constant 0 : index
    %c0_89 = arith.constant 0 : index
    %302 = vector.load %arg2[%c0_87, %c0_88, %c0_89] : memref<2x128x128xf32, #tpu.memory_space<vmem>>, vector<1x128x128xf32>
    %303 = vector.shape_cast %302 : vector<1x128x128xf32> to vector<128x128xf32>
    %cst_90 = arith.constant dense<0.000000e+00> : vector<32x128xf32>
    %304 = tpu.matmul %301, %303, %cst_90 {dimension_numbers = #tpu.dot_dimension_numbers<[1], [0], [0], [1], [0, 0, 1, 1], [], []>} : vector<32x128xf32>, vector<128x128xf32>, vector<32x128xf32> -> vector<32x128xf32>
    %305 = arith.addf %300, %304 : vector<32x128xf32>
    %306 = vector.shape_cast %299 : vector<4x8x128xf32> to vector<32x128xf32>
    %c1_91 = arith.constant 1 : index
    %c0_92 = arith.constant 0 : index
    %c0_93 = arith.constant 0 : index
    %307 = vector.load %arg2[%c1_91, %c0_92, %c0_93] : memref<2x128x128xf32, #tpu.memory_space<vmem>>, vector<1x128x128xf32>
    %308 = vector.shape_cast %307 : vector<1x128x128xf32> to vector<128x128xf32>
    %cst_94 = arith.constant dense<0.000000e+00> : vector<32x128xf32>
    %309 = tpu.matmul %306, %308, %cst_94 {dimension_numbers = #tpu.dot_dimension_numbers<[1], [0], [0], [1], [0, 0, 1, 1], [], []>} : vector<32x128xf32>, vector<128x128xf32>, vector<32x128xf32> -> vector<32x128xf32>
    %310 = arith.addf %305, %309 : vector<32x128xf32>
    %c0_95 = arith.constant 0 : index
    %311 = memref.load %arg4[%c0_95] : memref<1xf32, #tpu.memory_space<smem>>
    %312 = vector.broadcast %311 : f32 to vector<32x128xf32>
    %313 = arith.addf %310, %312 : vector<32x128xf32>
    %314 = arith.negf %313 : vector<32x128xf32>
    %315 = math.exp %314 : vector<32x128xf32>
    %cst_96 = arith.constant 1.000000e+00 : f32
    %316 = vector.broadcast %cst_96 : f32 to vector<32x128xf32>
    %317 = arith.addf %316, %315 : vector<32x128xf32>
    %318 = arith.divf %316, %317 : vector<32x128xf32>
    %319 = vector.shape_cast %318 : vector<32x128xf32> to vector<4x8x128xf32>
    %c0_97 = arith.constant 0 : index
    %c0_98 = arith.constant 0 : index
    %c0_99 = arith.constant 0 : index
    %c0_100 = arith.constant 0 : index
    %c0_101 = arith.constant 0 : index
    %320 = vector.load %arg1[%c0_97, %c0_98, %c0_99, %c0_100, %c0_101] : memref<1x4x4x8x128xf32, #tpu.memory_space<vmem>>, vector<1x1x4x8x128xf32>
    %321 = vector.shape_cast %320 : vector<1x1x4x8x128xf32> to vector<4x8x128xf32>
    %322 = arith.mulf %321, %319 : vector<4x8x128xf32>
    %c0_102 = arith.constant 0 : index
    %c0_103 = arith.constant 0 : index
    %c0_104 = arith.constant 0 : index
    %c0_105 = arith.constant 0 : index
    %c0_106 = arith.constant 0 : index
    %323 = vector.load %arg5[%c0_102, %c0_103, %c0_104, %c0_105, %c0_106] : memref<1x4x4x8x128xf32, #tpu.memory_space<vmem>>, vector<1x1x4x8x128xf32>
    %324 = vector.shape_cast %323 : vector<1x1x4x8x128xf32> to vector<4x8x128xf32>
    %325 = vector.shape_cast %322 : vector<4x8x128xf32> to vector<1x1x4x8x128xf32>
    tpu.vector_store %arg5[%c0_102, %c0_103, %c0_104, %c0_105, %c0_106], %325 {strides = array<i32>} : memref<1x4x4x8x128xf32, #tpu.memory_space<vmem>>, vector<1x1x4x8x128xf32>,
    %c0_107 = arith.constant 0 : index
    %c1_108 = arith.constant 1 : index
    %c0_109 = arith.constant 0 : index
    %c0_110 = arith.constant 0 : index
    %c0_111 = arith.constant 0 : index
    %326 = vector.load %arg1[%c0_107, %c1_108, %c0_109, %c0_110, %c0_111] : memref<1x4x4x8x128xf32, #tpu.memory_space<vmem>>, vector<1x1x4x8x128xf32>
    %327 = vector.shape_cast %326 : vector<1x1x4x8x128xf32> to vector<4x8x128xf32>
    %328 = arith.mulf %327, %319 : vector<4x8x128xf32>
    %c0_112 = arith.constant 0 : index
    %c1_113 = arith.constant 1 : index
    %c0_114 = arith.constant 0 : index
    %c0_115 = arith.constant 0 : index
    %c0_116 = arith.constant 0 : index
    %329 = vector.load %arg5[%c0_112, %c1_113, %c0_114, %c0_115, %c0_116] : memref<1x4x4x8x128xf32, #tpu.memory_space<vmem>>, vector<1x1x4x8x128xf32>
    %330 = vector.shape_cast %329 : vector<1x1x4x8x128xf32> to vector<4x8x128xf32>
    %331 = vector.shape_cast %328 : vector<4x8x128xf32> to vector<1x1x4x8x128xf32>
    tpu.vector_store %arg5[%c0_112, %c1_113, %c0_114, %c0_115, %c0_116], %331 {strides = array<i32>} : memref<1x4x4x8x128xf32, #tpu.memory_space<vmem>>, vector<1x1x4x8x128xf32>,
    %c0_117 = arith.constant 0 : index
    %c2_118 = arith.constant 2 : index
    %c0_119 = arith.constant 0 : index
    %c0_120 = arith.constant 0 : index
    %c0_121 = arith.constant 0 : index
    %332 = vector.load %arg1[%c0_117, %c2_118, %c0_119, %c0_120, %c0_121] : memref<1x4x4x8x128xf32, #tpu.memory_space<vmem>>, vector<1x1x4x8x128xf32>
    %333 = vector.shape_cast %332 : vector<1x1x4x8x128xf32> to vector<4x8x128xf32>
    %334 = arith.mulf %333, %319 : vector<4x8x128xf32>
    %c0_122 = arith.constant 0 : index
    %c2_123 = arith.constant 2 : index
    %c0_124 = arith.constant 0 : index
    %c0_125 = arith.constant 0 : index
    %c0_126 = arith.constant 0 : index
    %335 = vector.load %arg5[%c0_122, %c2_123, %c0_124, %c0_125, %c0_126] : memref<1x4x4x8x128xf32, #tpu.memory_space<vmem>>, vector<1x1x4x8x128xf32>
    %336 = vector.shape_cast %335 : vector<1x1x4x8x128xf32> to vector<4x8x128xf32>
    %337 = vector.shape_cast %334 : vector<4x8x128xf32> to vector<1x1x4x8x128xf32>
    tpu.vector_store %arg5[%c0_122, %c2_123, %c0_124, %c0_125, %c0_126], %337 {strides = array<i32>} : memref<1x4x4x8x128xf32, #tpu.memory_space<vmem>>, vector<1x1x4x8x128xf32>,
    %c0_127 = arith.constant 0 : index
    %c3_128 = arith.constant 3 : index
    %c0_129 = arith.constant 0 : index
    %c0_130 = arith.constant 0 : index
    %c0_131 = arith.constant 0 : index
    %338 = vector.load %arg1[%c0_127, %c3_128, %c0_129, %c0_130, %c0_131] : memref<1x4x4x8x128xf32, #tpu.memory_space<vmem>>, vector<1x1x4x8x128xf32>
    %339 = vector.shape_cast %338 : vector<1x1x4x8x128xf32> to vector<4x8x128xf32>
    %340 = arith.mulf %339, %319 : vector<4x8x128xf32>
    %c0_132 = arith.constant 0 : index
    %c3_133 = arith.constant 3 : index
    %c0_134 = arith.constant 0 : index
    %c0_135 = arith.constant 0 : index
    %c0_136 = arith.constant 0 : index
    %341 = vector.load %arg5[%c0_132, %c3_133, %c0_134, %c0_135, %c0_136] : memref<1x4x4x8x128xf32, #tpu.memory_space<vmem>>, vector<1x1x4x8x128xf32>
    %342 = vector.shape_cast %341 : vector<1x1x4x8x128xf32> to vector<4x8x128xf32>
    %343 = vector.shape_cast %340 : vector<4x8x128xf32> to vector<1x1x4x8x128xf32>
    tpu.vector_store %arg5[%c0_132, %c3_133, %c0_134, %c0_135, %c0_136], %343 {strides = array<i32>} : memref<1x4x4x8x128xf32, #tpu.memory_space<vmem>>, vector<1x1x4x8x128xf32>,
    return
  }
  func.func @transform_0(%arg0: i32) -> (i32, i32, i32, i32, i32) {
    %c0_i32 = arith.constant 0 : i32
    %c0_i32_0 = arith.constant 0 : i32
    %c0_i32_1 = arith.constant 0 : i32
    %c0_i32_2 = arith.constant 0 : i32
    %c0_i32_3 = arith.constant 0 : i32
    return %arg0, %c0_i32, %c0_i32_0, %c0_i32_1, %c0_i32_2 : i32, i32, i32, i32, i32
  }
  func.func @transform_1(%arg0: i32) -> (i32, i32, i32) {
    %c0_i32 = arith.constant 0 : i32
    %c0_i32_0 = arith.constant 0 : i32
    %c0_i32_1 = arith.constant 0 : i32
    %c0_i32_2 = arith.constant 0 : i32
    return %c0_i32, %c0_i32_0, %c0_i32_1 : i32, i32, i32
  }
  func.func @transform_2(%arg0: i32) -> i32 {
    %c0_i32 = arith.constant 0 : i32
    %c0_i32_0 = arith.constant 0 : i32
    return %c0_i32 : i32
  }
  func.func @transform_3(%arg0: i32) -> i32 {
    %c0_i32 = arith.constant 0 : i32
    %c0_i32_0 = arith.constant 0 : i32
    return %c0_i32 : i32
  }
  func.func @transform_4(%arg0: i32) -> (i32, i32, i32, i32, i32) {
    %c0_i32 = arith.constant 0 : i32
    %c0_i32_0 = arith.constant 0 : i32
    %c0_i32_1 = arith.constant 0 : i32
    %c0_i32_2 = arith.constant 0 : i32
    %c0_i32_3 = arith.constant 0 : i32
    return %arg0, %c0_i32, %c0_i32_0, %c0_i32_1, %c0_i32_2 : i32, i32, i32, i32, i32
  }
}

</mosaic_0001>

<bundles_post_ra>
// kernel: tpu_custom_call.1
= control target key start
LH: loop header
LB: loop body
LE: loop exit
PB: predicated region body
PF: predicated region fallthrough
CT: control target
= control target key end

     0   :  { %s4567_s0 = inlined_call_operand.hbm [shape: f32[2,4,4,8,128], index: 0, kind: input, shape index: {}]   ;;  %s4568_s1 = inlined_call_operand.hbm [shape: f32[2,128,128], index: 1, kind: input, shape index: {}]   ;;  %s4569_s2 = inlined_call_operand.vmem [shape: f32[54], index: 2, kind: input, shape index: {}]   ;;  %s4570_s3 = inlined_call_operand.<no memory space> [shape: f32[1], index: 3, kind: input, shape index: {}]   ;;  %s4571_s4 = inlined_call_operand.hbm [shape: f32[2,4,4,8,128], index: 4, kind: output, shape index: {}]  }
   0x1   :  { %9 = sst [smem:[#allocation3]] %s4570_s3 }
   0x2   :  { %10 = vsyncpa [#allocation5], 0 }
   0x3   :  { %12 = vsyncpa [#allocation5 + $0x1], 0 }
   0x4   :  { %13 = vsyncpa [#allocation9], 0 }
   0x5   :  { %14 = vsyncpa [#allocation7], 0 }
   0x6   :  { %15 = vsyncpa [#allocation6], 0 }
   0x7   :  { %17 = vsyncpa [#allocation6 + $0x1], 0  ;;  %s3126_s17 = smov 0   ;;  %s3128_s18 = smov 0  }
   0x8   :  { %s3130_s19 = smov 0   ;;  %s3132_s20 = smov 0  }
   0x9 LB: > { %s3147_s3 = sadd.s32 4294967295, %s3087_s20   ;;  %s2499_s21 = sadd.s32 4294967294, %s3087_s20   ;;  %s3087_s20 = sphi %s3132_s20, %s4725_s20   ;;  %s3083_s19 = sphi %s3130_s19, %s4724_s19   ;;  %s3079_s18 = sphi %s3128_s18, %s4723_s18   ;;  %s3075_s17 = sphi %s3126_s17, %s4722_s17  }
   0xa   : > { %p43_p0 = scmp.ne.s32.totalorder %s3079_s18, %s3075_s17  ;;  %p4572_p1 = scmp.eq.s32.totalorder %s3147_s3, 0 }
   0xb   : > { %p136_p3 = scmp.eq.s32.totalorder %s2499_s21, 1  ;;  %p2500_p5 = scmp.ge.s32.totalorder %s3087_s20, 1 }
   0xc   : > { %p3156_p4 = por %p4572_p1, %p43_p0  ;;  %p143_p7 = scmp.lt.s32.totalorder %s3087_s20, 3 }
   0xd   : > { %p3161_p6 = por %p136_p3, %p43_p0  ;;  %s3089_s25 = smov [#allocation8]  }
   0xe   : > { %s4636_s22 = scalar_select %p3156_p4, 1, 0 }
   0xf   : > { %s4637_s23 = scalar_select %p3161_p6, 1, 0 }
  0x10   : > { %p3166_p8 = pnand %p2500_p5, %p143_p7  ;;  %s155_s26 = sshll.u32 %s3089_s25, 4  ;;  %s156_s26 = int_to_ptr.vmem [resolvable:$true] %s155_s26 }
  0x11   : > { %s169_s29 = sshll.u32 %s4569_s2, 4  ;;  %s2940_s7 = scalar_lea.hbm %s4568_s1, 4096  ;;  %s3182_s29 = int_to_ptr.vmem [resolvable:$true] %s169_s29 }
  0x12   : > { %s4638_s24 = scalar_select %p3166_p8, 1, 0 }
  0x13   : > { %p2812_p9 = pneg %p3166_p8  ;;  %p2941_p12 = scmp.ne.s32.totalorder %s4568_s1, %s2940_s7 }
  0x14   : > { %p2947_p5 = scmp.lt.u32.totalorder %s2940_s7, %s4568_s1 }
  0x15   : > { %p3178_p11 = pnand %p2812_p9, %p4572_p1 }
  0x17   : > { %p2942_p13 = pneg %p3178_p11 }
  0x19   : > { %p2943_p0 = pnand %p2942_p13, %p2941_p12 }
  0x1b   : > { %p2944_p3 = pneg %p2943_p0 }
  0x1d   : > { %p2949_p7 = pnand %p2947_p5, %p2944_p3 }
  0x1f   : > { %2952 = shalt.err (!%p2949_p7)
}
  0x20   : > { %s2953_s12 = scalar_lea.vmem %s156_s26, 4096  ;;  %p2961_p2 = scmp.lt.s32.totalorder %s156_s26, %s156_s26 }
  0x21   : > { %p2954_p9 = scmp.ne.s32.totalorder %s156_s26, %s2953_s12  ;;  %p2962_p6 = scmp.lt.s32.totalorder %s2953_s12, %s2953_s12 }
  0x23   : > { %p2956_p10 = pnand %p2954_p9, %p2942_p13  ;;  %p2963_p4 = por %p2962_p6, %p2961_p2 }
  0x25   : > { %p2957_p1 = pneg %p2956_p10 }
  0x27   : > { %p2964_p8 = pnand %p2963_p4, %p2957_p1 }
  0x29   : > { %2967 = shalt.err (!%p2964_p8)
}
  0x2a   : > { %s3090_s13 = smov 128   ;;  %s3091_s14 = smov 8  }
  0x2b   : > { %2815 = dma.hbm_to_vmem [thread:$0]  (!%p3178_p11), %s4568_s1, 4096, %s156_s26, [#allocation9], %s3090_s13, %s3090_s13, %s3091_s14  }
  0x2c   : > { %s2968_s21 = scalar_lea.vmem %s3182_s29, 16  ;;  %p2976_p4 = scmp.lt.s32.totalorder %s3182_s29, %s3182_s29 }
  0x2d   : > { %p2969_p10 = scmp.ne.s32.totalorder %s3182_s29, %s2968_s21  ;;  %p2977_p6 = scmp.lt.s32.totalorder %s2968_s21, %s2968_s21 }
  0x2f   : > { %p2971_p1 = pnand %p2969_p10, %p2942_p13  ;;  %p2978_p8 = por %p2977_p6, %p2976_p4 }
  0x31   : > { %p2972_p2 = pneg %p2971_p1 }
  0x33   : > { %p2979_p12 = pnand %p2978_p8, %p2972_p2 }
  0x35   : > { %2982 = shalt.err (!%p2979_p12)
}
  0x36   : > { %s3092_s25 = smov [#allocation10]   ;;  %s3220_s26 = sadd.s32 1, %s3087_s20  }
  0x37   : > { %2818 = dma.vmem_to_smem (!%p3178_p11), %s3182_s29, 16, %s3092_s25, [#allocation7]  }
  0x38   : > { %s30_s27 = sadd.s32 1, %s3083_s19  ;;  %s27_s28 = ssub.s32 %s3087_s20, %s3220_s26 }
  0x39   : > { %p37_p13 = scmp.ne.s32.totalorder %s3083_s19, %s3079_s18  ;;  %p28_p0 = scmp.eq.s32.totalorder %s27_s28, 0 }
  0x3a   : > { %p38_p3 = scmp.eq.s32.totalorder %s3087_s20, 0  ;;  %p4640_p5 = scmp.eq.s32.totalorder %s3147_s3, 1 }
  0x3b   : > { %p2829_p9 = scmp.lt.s32.totalorder %s3087_s20, 2  ;;  %s183_s6 = sand.u32 1, %s3083_s19  }
  0x3c   : > { %p3230_p7 = por %p4640_p5, %p37_p13  ;;  %p39_p10 = por %p38_p3, %p37_p13 }
  0x3d   : > { %s3236_s5 = scalar_select %p28_p0, %s3083_s19, %s30_s27  }
  0x3e   : > { %s2504_s7 = sshll.u32 %s183_s6, 7  ;;  %s2610_s29 = sshll.u32 %s3087_s20, 11 }
  0x3f   : > { %s3243_s10 = scalar_lea.hbm %s4567_s0, %s2610_s29  ;;  %s187_s11 = scalar_lea.vmem [#allocation4], %s2504_s7 }
  0x40   : > { %s194_s12 = sshll.u32 %s187_s11, 4  ;;  %p3247_p11 = pnand %p2829_p9, %p39_p10  ;;  %s3245_s12 = int_to_ptr.vmem [resolvable:$true] %s194_s12 }
  0x41   : > { %s3251_s16 = scalar_lea.sflag [#allocation5], %s183_s6  ;;  %s2983_s21 = scalar_lea.hbm %s3243_s10, 2048 }
  0x42   : > { %p2984_p1 = scmp.ne.s32.totalorder %s3243_s10, %s2983_s21  ;;  %p2985_p2 = pneg %p3247_p11 }
  0x43   : > { %s2988_s28 = scalar_lea.hbm %s4567_s0, 4096  ;;  %p2989_p8 = scmp.lt.u32.totalorder %s3243_s10, %s4567_s0 }
  0x44   : > { %p2986_p4 = pnand %p2985_p2, %p2984_p1  ;;  %p2990_p12 = scmp.lt.u32.totalorder %s2988_s28, %s2983_s21 }
  0x45   : > { %p2992_p0 = scmp.lt.u32.totalorder %s2983_s21, %s3243_s10 }
  0x46   : > { %p2987_p6 = pneg %p2986_p4  ;;  %p2991_p13 = por %p2990_p12, %p2989_p8 }
  0x48   : > { %p2993_p3 = por %p2992_p0, %p2991_p13 }
  0x4a   : > { %p2994_p5 = pnand %p2993_p3, %p2987_p6 }
  0x4c   : > { %2997 = shalt.err (!%p2994_p5)
}
  0x4d   : > { %s2998_s6 = scalar_lea.vmem %s3245_s12, 2048  ;;  %s3093_s8 = smov [#allocation4]  }
  0x4e   : > { %p2999_p9 = scmp.ne.s32.totalorder %s3245_s12, %s2998_s6  ;;  %s3003_s9 = sshll.u32 %s3093_s8, 4  ;;  %s3004_s9 = int_to_ptr.vmem [resolvable:$false] %s3003_s9 }
  0x4f   : > { %s3005_s11 = scalar_lea.vmem %s3004_s9, 4096  ;;  %p3006_p4 = scmp.lt.s32.totalorder %s3245_s12, %s3004_s9 }
  0x50   : > { %p3001_p10 = pnand %p2999_p9, %p2985_p2  ;;  %p3007_p8 = scmp.lt.s32.totalorder %s3005_s11, %s2998_s6 }
  0x52   : > { %p3002_p1 = pneg %p3001_p10  ;;  %p3008_p12 = por %p3007_p8, %p3006_p4 }
  0x54   : > { %p3009_p13 = pnand %p3008_p12, %p3002_p1 }
  0x56   : > { %3012 = shalt.err (!%p3009_p13)
}
  0x57   : > { %2822 = dma.hbm_to_vmem [thread:$0]  (!%p3247_p11), %s3243_s10, 2048, %s3245_s12, %s3251_s16, %s3090_s13, %s3090_s13, %s3091_s14  }
  0x58   : > { %p4643_p2 = scmp.ne.s32.totalorder %s4638_s24, 0 }
  0x5a   : > { %206 = sbr.rel (%p4643_p2) target bundleno = 599 (0x257), region = 36 }
  0x61   : > { %s3285_s21 = sand.u32 1, %s3079_s18   ;;  %p4644_p6 = scmp.ne.s32.totalorder %s4636_s22, 0 }
  0x62   : > { %s2508_s25 = sshll.u32 %s3285_s21, 7  ;;  %s209_s27 = scalar_lea.sflag [#allocation5], %s3285_s21 }
  0x63   : > { %s3291_s15 = scalar_lea.vmem [#allocation4], %s2508_s25 }
  0x64   : > { %3058 = dma.done.wait (%p4644_p6), %s209_s27, 2048  }
  0x65   : > { %3060 = vsyncadd (%p4644_p6), %s209_s27, 4294965248  ;;  %p4645_p11 = scmp.eq.s32.totalorder %s3147_s3, 0 }
  0x67   : > { %3062 = dma.done.wait (%p4645_p11), [#allocation9], 4096   ;;  %p4646_p0 = pmov %p4645_p11 }
  0x69   : > { %3064 = vsyncadd (%p4646_p0), [#allocation9], 4294963200  ;;  %p4647_p3 = pmov %p4646_p0 }
  0x6a   : > { %p4648_p5 = pmov %p4646_p0 }
  0x6b   : > { %3066 = dma.done.wait (%p4647_p3), [#allocation7], 16  }
  0x6c   : > { %3068 = vsyncadd (%p4648_p5), [#allocation7], 4294967280 }
  0x6d   : > { %225 = sfence }
  0x6e   : > { %v2074_v0 = vld [vmem:[#allocation8] sm:$0xff]  ;;  %v2075_v1 = vld [vmem:[#allocation8 + $0x8] sm:$0xff]  ;;  %s3305_s24 = sld [smem:[#allocation10]]  ;;  %v2076_v5 = vld [vmem:[#allocation8 + $0x10] sm:$0xff]  ;;  %v3094_v7 = vmov 0.0   ;;  %s3307_s22 = sld [smem:[#allocation10 + $0x3]] }
  0x6f   : > { %v2204_v2 = vld [vmem:[#allocation8 + $0x80] sm:$0xff]  ;;  %v2728_v3 = vpack.c.bf16 %v2075_v1, %v2074_v0  ;;  %v2205_v4 = vld [vmem:[#allocation8 + $0x88] sm:$0xff]  ;;  %v2077_v6 = vld [vmem:[#allocation8 + $0x18] sm:$0xff]  ;;  %293 = vst [vmem:[#allocation2 + $0x7] sm:$0xff] %v3094_v7  ;;  %s3309_s13 = sld [smem:[#allocation10 + $0x6]]  ;;  %s3311_s14 = sld [smem:[#allocation10 + $0x9]] }
  0x70   : > { %294 = vst [vmem:[#allocation2 + $0xf] sm:$0x3] %v3094_v7  ;;  %299 = vst [vmem:[#allocation2 + $0x1f] sm:$0x1] %v3094_v7  ;;  %v2760_v8 = vpack.c.bf16 %v2205_v4, %v2204_v2  ;;  %v2732_v9 = vpack.c.bf16 %v2077_v6, %v2076_v5  ;;  %v2206_v10 = vld [vmem:[#allocation8 + $0x90] sm:$0xff]  ;;  %v2207_v11 = vld [vmem:[#allocation8 + $0x98] sm:$0xff] }
  0x71   : > { %300 = vst [vmem:[#allocation2 + $0x37] sm:$0x1] %v3094_v7  ;;  %303 = vst [vmem:[#allocation2 + $0x28] sm:$0x1] %v3094_v7  ;;  %v2078_v12 = vld [vmem:[#allocation8 + $0x20] sm:$0xff]  ;;  %2729 = vmatprep.subr.bf16.mxu1 %v2728_v3  ;;  %v2764_v13 = vpack.c.bf16 %v2207_v11, %v2206_v10  ;;  %v2079_v14 = vld [vmem:[#allocation8 + $0x28] sm:$0xff] }
  0x72   : > { %304 = vst [vmem:[#allocation2 + $0x40] sm:$0x1] %v3094_v7  ;;  %308 = vst [vmem:[#allocation2 + $0x97] sm:$0xff] %v3094_v7  ;;  %v2208_v15 = vld [vmem:[#allocation8 + $0xa0] sm:$0xff]  ;;  %v2209_v16 = vld [vmem:[#allocation8 + $0xa8] sm:$0xff]  ;;  %2731 = vmatpush3.bf16.msra.mxu1 %v2728_v3  ;;  %2761 = vmatprep.subr.bf16.mxu0 %v2760_v8  ;;  %s3313_s10 = sld [smem:[#allocation10 + $0xc]]  ;;  %v2736_v20 = vpack.c.bf16 %v2079_v14, %v2078_v12 }
  0x73   : > { %309 = vst [vmem:[#allocation2 + $0x9f] sm:$0x3] %v3094_v7  ;;  %314 = vst [vmem:[#allocation2 + $0xaf] sm:$0x1] %v3094_v7  ;;  %v2080_v17 = vld [vmem:[#allocation8 + $0x30] sm:$0xff]  ;;  %v2081_v18 = vld [vmem:[#allocation8 + $0x38] sm:$0xff]  ;;  %2763 = vmatpush3.bf16.msra.mxu0 %v2760_v8  ;;  %2733 = vmatprep.subr.bf16.mxu1 %v2732_v9  ;;  %v2768_v24 = vpack.c.bf16 %v2209_v16, %v2208_v15 }
  0x74   : > { %315 = vst [vmem:[#allocation2 + $0xc7] sm:$0x1] %v3094_v7  ;;  %318 = vst [vmem:[#allocation2 + $0xb8] sm:$0x1] %v3094_v7  ;;  %v2210_v19 = vld [vmem:[#allocation8 + $0xb0] sm:$0xff]  ;;  %v2211_v21 = vld [vmem:[#allocation8 + $0xb8] sm:$0xff]  ;;  %2765 = vmatprep.subr.bf16.mxu0 %v2764_v13  ;;  %v2740_v31 = vpack.c.bf16 %v2081_v18, %v2080_v17  ;;  %v3328_v41 = vstv %s3305_s24  ;;  %v3331_v42 = vstv %s3307_s22 }
  0x75   : > { %319 = vst [vmem:[#allocation2 + $0xd0] sm:$0x1] %v3094_v7  ;;  %296 = vst [vmem:[#allocation2 + $0x7f] sm:$0xff] %v3094_v7  ;;  %v2082_v22 = vld [vmem:[#allocation8 + $0x40] sm:$0xff]  ;;  %v2083_v23 = vld [vmem:[#allocation8 + $0x48] sm:$0xff]  ;;  %s3315_s12 = sld [smem:[#allocation10 + $0xf]]  ;;  %v3321_v32 = vpack.c.bf16 %v2211_v21, %v2210_v19  ;;  %v3339_v48 = vstv %s3309_s13  ;;  %v3342_v49 = vstv %s3311_s14 }
  0x76   : > { %297 = vst [vmem:[#allocation2 + $0x87] sm:$0x3] %v3094_v7  ;;  %301 = vst [vmem:[#allocation2 + $0x4f] sm:$0x1] %v3094_v7  ;;  %v2212_v25 = vld [vmem:[#allocation8 + $0xc0] sm:$0xff]  ;;  %v2213_v26 = vld [vmem:[#allocation8 + $0xc8] sm:$0xff]  ;;  %2735 = vmatpush3.bf16.msra.mxu1 %v2732_v9  ;;  %v3323_v36 = vpack.c.bf16 %v2083_v23, %v2082_v22 }
  0x77   : > { %302 = vst [vmem:[#allocation2 + $0x67] sm:$0x1] %v3094_v7  ;;  %305 = vst [vmem:[#allocation2 + $0x58] sm:$0x1] %v3094_v7  ;;  %v2084_v27 = vld [vmem:[#allocation8 + $0x50] sm:$0xff]  ;;  %s3317_s16 = sld [smem:[#allocation10 + $0x12]]  ;;  %2767 = vmatpush3.bf16.msra.mxu0 %v2764_v13  ;;  %2737 = vmatprep.subr.bf16.mxu1 %v2736_v20  ;;  %v3325_v37 = vpack.c.bf16 %v2213_v26, %v2212_v25 }
  0x78   : > { %306 = vst [vmem:[#allocation2 + $0x70] sm:$0x1] %v3094_v7  ;;  %311 = vst [vmem:[#allocation2 + $0x10f] sm:$0xff] %v3094_v7  ;;  %v2085_v28 = vld [vmem:[#allocation8 + $0x58] sm:$0xff]  ;;  %v2214_v29 = vld [vmem:[#allocation8 + $0xd0] sm:$0xff]  ;;  %s3319_s28 = sld [smem:[#allocation10 + $0x15]]  ;;  %2769 = vmatprep.subr.bf16.mxu0 %v2768_v24  ;;  %v3354_v56 = vstv %s3313_s10 }
  0x79   : > { %312 = vst [vmem:[#allocation2 + $0x117] sm:$0x3] %v3094_v7  ;;  %316 = vst [vmem:[#allocation2 + $0xdf] sm:$0x1] %v3094_v7  ;;  %v2215_v30 = vld [vmem:[#allocation8 + $0xd8] sm:$0xff]  ;;  %v2086_v33 = vld [vmem:[#allocation8 + $0x60] sm:$0xff]  ;;  %v3333_v43 = vpack.c.bf16 %v2085_v28, %v2084_v27 }
  0x7a   : > { %317 = vst [vmem:[#allocation2 + $0xf7] sm:$0x1] %v3094_v7  ;;  %320 = vst [vmem:[#allocation2 + $0xe8] sm:$0x1] %v3094_v7  ;;  %v2087_v34 = vld [vmem:[#allocation8 + $0x68] sm:$0xff]  ;;  %v2216_v35 = vld [vmem:[#allocation8 + $0xe0] sm:$0xff]  ;;  %v3335_v44 = vpack.c.bf16 %v2215_v30, %v2214_v29  ;;  %2739 = vmatpush3.bf16.msra.mxu1 %v2736_v20 }
  0x7b   : > { %321 = vst [vmem:[#allocation2 + $0x100] sm:$0x1] %v3094_v7  ;;  %v2217_v38 = vld [vmem:[#allocation8 + $0xe8] sm:$0xff]  ;;  %v2088_v39 = vld [vmem:[#allocation8 + $0x70] sm:$0xff]  ;;  %v2089_v40 = vld [vmem:[#allocation8 + $0x78] sm:$0xff]  ;;  %vm492_vm0 = vcmask 1045504   ;;  %v3344_v50 = vpack.c.bf16 %v2087_v34, %v2086_v33  ;;  %2771 = vmatpush3.bf16.msra.mxu0 %v2768_v24  ;;  %2741 = vmatprep.subr.bf16.mxu1 %v2740_v31  ;;  %v3369_v4 = vstv %s3315_s12 }
  0x7c   : > { %v2218_v45 = vld [vmem:[#allocation8 + $0xf0] sm:$0xff]  ;;  %v2219_v46 = vld [vmem:[#allocation8 + $0xf8] sm:$0xff]  ;;  %v246_v47 = vld [vmem:[%s3291_s15] sm:$0xff]  ;;  %4649 = vst [vmem:[#allocation16_spill] sm:$0xff] %v3342_v49  ;;  %v3346_v51 = vpack.c.bf16 %v2217_v38, %v2216_v35  ;;  %v3348_v52 = vpack.c.bf16 %v2089_v40, %v2088_v39  ;;  %s3356_s7 = sld [smem:[#allocation10 + $0x18]]  ;;  %s3377_s29 = sld [smem:[#allocation10 + $0x1b]]  ;;  %2773 = vmatprep.subr.bf16.mxu0 %v3321_v32 }
  0x7d   : > { %v247_v53 = vld [vmem:[%s3291_s15 + $0x8] sm:$0xff]  ;;  %v2512_v54 = vld [vmem:[%s3291_s15 + $0x20] sm:$0xff]  ;;  %v3361_v0 = vpack.c.bf16 %v2219_v46, %v2218_v45  ;;  %v3372_v5 = vstv %s3317_s16  ;;  %v3380_v11 = vld [vmem:[#allocation2 + $0x10] sm:$0x1]  ;;  %s3406_s6 = sld [smem:[#allocation10 + $0x1e]]  ;;  %s3421_s8 = sld [smem:[#allocation10 + $0x21]] }
  0x7e   : > { %v2513_v55 = vld [vmem:[%s3291_s15 + $0x28] sm:$0xff]  ;;  %v255_v57 = vadd.f32 %v2512_v54, %v246_v47  ;;  %v259_v59 = vmax.f32 %v246_v47, %v2512_v54  ;;  %v2516_v61 = vld [vmem:[%s3291_s15 + $0x40] sm:$0xff]  ;;  %4650 = vst [vmem:[#allocation17_spill] sm:$0xff] %v3372_v5  ;;  %v3375_v6 = vstv %s3319_s28  ;;  %2743 = vmatpush3.bf16.msra.mxu1 %v2740_v31  ;;  %v3396_v21 = vld [vmem:[#allocation2 + $0x18] sm:$0xff]  ;;  %v477_v23 = vmul.f32 %v3339_v48, %v3380_v11  ;;  %s3423_s9 = sld [smem:[#allocation10 + $0x24]]  ;;  %s3451_s11 = sld [smem:[#allocation10 + $0x27]] }
  0x7f   : > { %v256_v58 = vadd.f32 %v2513_v55, %v247_v53  ;;  %v260_v60 = vmax.f32 %v247_v53, %v2513_v55  ;;  %v2517_v62 = vld [vmem:[%s3291_s15 + $0x48] sm:$0xff]  ;;  %v2520_v63 = vld [vmem:[%s3291_s15 + $0x60] sm:$0xff]  ;;  %2775 = vmatpush3.bf16.msra.mxu0 %v3321_v32  ;;  %2745 = vmatprep.subr.bf16.mxu1 %v3323_v36  ;;  %v627_v25 = vmul.f32 %v3342_v49, %v3396_v21  ;;  %v3404_v26 = vld [vmem:[#allocation2 + $0x30] sm:$0xff]  ;;  %s3456_s27 = sld [smem:[#allocation10 + $0x2a]]  ;;  %s3458_s24 = sld [smem:[#allocation10 + $0x2d]]  ;;  %vm2033_vm1 = vcmask 1040384  }
  0x80   : > { %v2521_v1 = vld [vmem:[%s3291_s15 + $0x68] sm:$0xff]  ;;  %v3364_v2 = vld [vmem:[#allocation2] sm:$0xff]  ;;  %v268_v7 = vadd.f32 %v2516_v61, %v255_v57  ;;  %v272_v9 = vmax.f32 %v259_v59, %v2516_v61  ;;  %2777 = vmatprep.subr.bf16.mxu0 %v3325_v37  ;;  %v3419_v30 = vmul.f32 %v3372_v5, %v3404_v26  ;;  %v494_v33 = vrot.slane %v477_v23, 2  ;;  %v3439_v46 = vld [vmem:[#allocation2 + $0x90] sm:$0xff]  ;;  %s3481_s22 = sld [smem:[#allocation10 + $0x30]]  ;;  %s3494_s13 = sld [smem:[#allocation10 + $0x33]] }
  0x81   : > { %v3366_v3 = vld [vmem:[#allocation2 + $0x8] sm:$0xff]  ;;  %v269_v8 = vadd.f32 %v2517_v62, %v256_v58  ;;  %v273_v10 = vmax.f32 %v260_v60, %v2517_v62  ;;  %v344_v12 = vmul.f32 %v3328_v41, %v3364_v2  ;;  %v3437_v45 = vld [vmem:[#allocation2 + $0x40] sm:$0x1]  ;;  %4653 = vst [vmem:[#allocation20_spill] sm:$0xff] %v3439_v46  ;;  %v3446_v54 = vld [vmem:[#allocation2 + $0x98] sm:$0xff]  ;;  %s3643_s14 = sld [smem:[#allocation10 + $0x2]] }
  0x82   : > { %v345_v13 = vmul.f32 %v3328_v41, %v3366_v3  ;;  %v398_v14 = vmul.f32 %v3331_v42, %v3366_v3  ;;  %v476_v15 = vmul.f32 %v3339_v48, %v3366_v3  ;;  %v3390_v16 = vld [vmem:[#allocation2 + $0x28] sm:$0x1]  ;;  %v281_v17 = vadd.f32 %v2520_v63, %v268_v7  ;;  %2747 = vmatpush3.bf16.msra.mxu1 %v3323_v36  ;;  %s3645_s10 = sld [smem:[#allocation10 + $0x5]]  ;;  %s3655_s12 = sld [smem:[#allocation10 + $0x8]] }
  0x83   : > { %v282_v18 = vadd.f32 %v2521_v1, %v269_v8  ;;  %v3392_v19 = vmax.f32 %v272_v9, %v2520_v63  ;;  %v3394_v20 = vmax.f32 %v273_v10, %v2521_v1  ;;  %v760_v29 = vmul.f32 %v3369_v4, %v3390_v16  ;;  %4652 = vst [vmem:[#allocation19_spill] sm:$0xff] %v3437_v45  ;;  %v3470_v9 = vld [vmem:[#allocation2 + $0xa0] sm:$0x1]  ;;  %s3657_s16 = sld [smem:[#allocation10 + $0xb]]  ;;  %s3683_s28 = sld [smem:[#allocation10 + $0xe]] }
  0x84   : > { %v406_v22 = vrot.slane %v398_v14, 1  ;;  %v493_v24 = vrot.slane %v476_v15, 2  ;;  %v3409_v27 = vmul.f32 0.25, %v281_v17  ;;  %v3426_v34 = vstv %s3356_s7  ;;  %2779 = vmatpush3.bf16.msra.mxu0 %v3325_v37  ;;  %2749 = vmatprep.subr.bf16.mxu1 %v3333_v43  ;;  %4654 = vst [vmem:[#allocation21_spill] sm:$0xff] %v3446_v54  ;;  %4656 = vst [vmem:[#allocation23_spill] sm:$0xff] %v3470_v9  ;;  %s3685_s7 = sld [smem:[#allocation10 + $0x11]] }
  0x85   : > { %v3411_v28 = vmul.f32 0.25, %v282_v18  ;;  %326 = vst [vmem:[#allocation2 + $0xb0] sm:$0xff] %v3392_v19  ;;  %327 = vst [vmem:[#allocation2 + $0xc8] sm:$0xff] %v3394_v20  ;;  %v776_v40 = vrot.slane %v760_v29, 2  ;;  %v3449_v55 = vstv %s3377_s29  ;;  %2781 = vmatprep.subr.bf16.mxu0 %v3335_v44  ;;  %v1043_v62 = vmul.f32 %v3426_v34, %v3437_v45  ;;  %v3501_v29 = vld [vmem:[#allocation2 + $0xa8] sm:$0xff]  ;;  %s3704_s29 = sld [smem:[#allocation10 + $0x14]] }
  0x86   : > { %v414_v31 = vadd.f32 %v406_v22, %v344_v12  ;;  %v415_v32 = vadd.f32 %v406_v22, %v345_v13  ;;  %4651 = vst [vmem:[#allocation18_spill] sm:$0xff] %v3426_v34  ;;  %322 = vst [vmem:[#allocation2 + $0x20] sm:$0xff] %v3409_v27  ;;  %v628_v35 = vmul.f32 %v3342_v49, %v3409_v27  ;;  %2751 = vmatpush3.bf16.msra.mxu1 %v3333_v43 }
  0x87   : > { %323 = vst [vmem:[#allocation2 + $0x38] sm:$0xff] %v3411_v28  ;;  %v681_v38 = vmul.f32 %v3354_v56, %v3409_v27  ;;  %v759_v39 = vmul.f32 %v3369_v4, %v3409_v27  ;;  %v495_v36 = vsel %vm492_vm0, %v493_v24, %v494_v33  ;;  %v911_v53 = vmul.f32 %v3372_v5, %v3411_v28  ;;  %v3505_v33 = vld [vmem:[#allocation2 + $0xb8] sm:$0x1] }
  0x88   : > { %v513_v47 = vadd.f32 %v493_v24, %v414_v31  ;;  %4655 = vst [vmem:[#allocation22_spill] sm:$0xff] %v3449_v55  ;;  %v514_v57 = vadd.f32 %v495_v36, %v415_v32  ;;  %v964_v37 = vmul.f32 %v3375_v6, %v3411_v28  ;;  %v1042_v61 = vmul.f32 %v3426_v34, %v3411_v28 }
  0x89   : > { %v689_v58 = vrot.slane %v681_v38, 1  ;;  %v775_v59 = vrot.slane %v759_v39, 2  ;;  %v3466_v63 = vmul.f32 %v3449_v55, %v3439_v46  ;;  %v3474_v10 = vmul.f32 %v3449_v55, %v3446_v54  ;;  %2783 = vmatpush3.bf16.msra.mxu0 %v3335_v44  ;;  %2753 = vmatprep.subr.bf16.mxu1 %v3344_v50  ;;  %4660 = vst [vmem:[#allocation27_spill] sm:$0xff] %v3505_v33 }
  0x8a   : > { %v635_v60 = vadd.f32 %v627_v25, %v513_v47  ;;  %v636_v1 = vadd.f32 %v628_v35, %v514_v57  ;;  %v972_v8 = vrot.slane %v964_v37, 1  ;;  %v1058_v13 = vrot.slane %v1042_v61, 2  ;;  %2785 = vmatprep.subr.bf16.mxu0 %v3346_v51  ;;  %2755 = vmatpush3.bf16.msra.mxu1 %v3344_v50  ;;  %v248_v61 = vld [vmem:[%s3291_s15 + $0x10] sm:$0xff] }
  0x8b   : > { %v777_v7 = vsel %vm492_vm0, %v775_v59, %v776_v40  ;;  %v1059_v14 = vrot.slane %v1043_v62, 2  ;;  %v3479_v43 = vstv %s3406_s6  ;;  %v3489_v18 = vstv %s3421_s8  ;;  %2757 = vmatprep.subr.bf16.mxu1 %v3348_v52  ;;  %v2514_v62 = vld [vmem:[%s3291_s15 + $0x30] sm:$0xff]  ;;  %s3717_s6 = sld [smem:[#allocation10 + $0x17]]  ;;  %s3723_s8 = sld [smem:[#allocation10 + $0x1a]] }
  0x8c   : > { %v697_v12 = vadd.f32 %v689_v58, %v635_v60  ;;  %4657 = vst [vmem:[#allocation24_spill] sm:$0xff] %v3479_v43  ;;  %v698_v15 = vadd.f32 %v689_v58, %v636_v1  ;;  %v3486_v17 = vmul.f32 %v3479_v43, %v3446_v54  ;;  %4658 = vst [vmem:[#allocation25_spill] sm:$0xff] %v3489_v18  ;;  %v3492_v22 = vstv %s3423_s9  ;;  %v3537_v60 = vld [vmem:[#allocation2 + $0xc0] sm:$0xff]  ;;  %s3725_s9 = sld [smem:[#allocation10 + $0x1d]] }
  0x8d   : > { %4659 = vst [vmem:[#allocation26_spill] sm:$0xff] %v3492_v22  ;;  %v1060_v23 = vsel %vm492_vm0, %v1058_v13, %v1059_v14  ;;  %v1324_v24 = vmul.f32 %v3489_v18, %v3446_v54  ;;  %v1325_v25 = vmul.f32 %v3489_v18, %v3470_v9  ;;  %v1474_v35 = vmul.f32 %v3492_v22, %v3501_v29 }
  0x8e   : > { %v795_v44 = vadd.f32 %v775_v59, %v697_v12  ;;  %v796_v31 = vadd.f32 %v777_v7, %v698_v15  ;;  %v1254_v32 = vrot.slane %v3486_v17, 1  ;;  %v3511_v38 = vmul.f32 %v3492_v22, %v3392_v19  ;;  %2787 = vmatpush3.bf16.msra.mxu0 %v3346_v51  ;;  %2759 = vmatpush3.bf16.msra.mxu1 %v3348_v52  ;;  %v3543_v12 = vld [vmem:[#allocation2 + $0xd0] sm:$0x1] }
  0x8f   : > { %v1340_v39 = vrot.slane %v1324_v24, 2  ;;  %v1341_v40 = vrot.slane %v1325_v25, 2  ;;  %v3517_v36 = vstv %s3451_s11  ;;  %2789 = vmatprep.subr.bf16.mxu0 %v3361_v0  ;;  %v3525_v58 = vstv %s3456_s27  ;;  %4664 = vst [vmem:[#allocation31_spill] sm:$0xff] %v3543_v12  ;;  %v2518_v24 = vld [vmem:[%s3291_s15 + $0x50] sm:$0xff]  ;;  %s3743_s11 = sld [smem:[#allocation10 + $0x20]]  ;;  %s3745_s27 = sld [smem:[#allocation10 + $0x23]] }
  0x90   : > { %v918_v50 = vadd.f32 %v3419_v30, %v795_v44  ;;  %4661 = vst [vmem:[#allocation28_spill] sm:$0xff] %v3517_v36  ;;  %v919_v47 = vadd.f32 %v911_v53, %v796_v31  ;;  %v3522_v57 = vmul.f32 %v3517_v36, %v3392_v19  ;;  %4662 = vst [vmem:[#allocation29_spill] sm:$0xff] %v3525_v58  ;;  %v3528_v51 = vstv %s3458_s24  ;;  %s3755_s24 = sld [smem:[#allocation10 + $0x26]] }
  0x91   : > { %4663 = vst [vmem:[#allocation30_spill] sm:$0xff] %v3528_v51  ;;  %v1342_v37 = vsel %vm492_vm0, %v1340_v39, %v1341_v40  ;;  %v3533_v30 = vmul.f32 %v3525_v58, %v3392_v19  ;;  %v1607_v53 = vmul.f32 %v3525_v58, %v3505_v33  ;;  %v3547_v14 = vmul.f32 %v3528_v51, %v3537_v60 }
  0x92   : > { %v980_v59 = vadd.f32 %v972_v8, %v918_v50  ;;  %v981_v1 = vadd.f32 %v972_v8, %v919_v47  ;;  %v1536_v7 = vrot.slane %v3522_v57, 1  ;;  %v3551_v15 = vmul.f32 %v3528_v51, %v3394_v20  ;;  %2791 = vmatpush3.bf16.msra.mxu0 %v3361_v0 }
  0x93   : > { %v1622_v44 = vrot.slane %v3533_v30, 2  ;;  %v1623_v52 = vrot.slane %v1607_v53, 2  ;;  %v3556_v8 = vstv %s3481_s22  ;;  %v3564_v50 = vstv %s3494_s13  ;;  %s3757_s22 = sld [smem:[#allocation10 + $0x29]]  ;;  %s3769_s13 = sld [smem:[#allocation10 + $0x2c]] }
  0x94   : > { %v1078_v17 = vadd.f32 %v1058_v13, %v980_v59  ;;  %4665 = vst [vmem:[#allocation32_spill] sm:$0xff] %v3556_v8  ;;  %v1079_v25 = vadd.f32 %v1060_v23, %v981_v1  ;;  %v3561_v31 = vmul.f32 %v3556_v8, %v3394_v20  ;;  %4666 = vst [vmem:[#allocation33_spill] sm:$0xff] %v3564_v50  ;;  %v2522_v59 = vld [vmem:[%s3291_s15 + $0x70] sm:$0xff] }
  0x95   : > { %v257_v40 = vadd.f32 %v2514_v62, %v248_v61  ;;  %v1624_v57 = vsel %vm492_vm0, %v1622_v44, %v1623_v52  ;;  %v3570_v0 = vmul.f32 %v3564_v50, %v3394_v20  ;;  %v1890_v13 = vmul.f32 %v3564_v50, %v3543_v12 }
  0x96   : > { %v1200_v47 = vadd.f32 %v3466_v63, %v1078_v17  ;;  %v1201_v23 = vadd.f32 %v3474_v10, %v1079_v25  ;;  %v1819_v30 = vrot.slane %v3561_v31, 1  ;;  %v261_v53 = vmax.f32 %v248_v61, %v2514_v62  ;;  %v3578_v17 = vld [vmem:[#allocation2 + $0x28] sm:$0x1] }
  0x97   : > { %v270_v1 = vadd.f32 %v2518_v24, %v257_v40  ;;  %v4582_v9 = vrot.slane %v3570_v0, 2  ;;  %v1906_v63 = vrot.slane %v1890_v13, 2  ;;  %v346_v52 = vmul.f32 %v3396_v21, %v3328_v41  ;;  %v3597_v13 = vld [vmem:[#allocation2 + $0x40] sm:$0x1] }
  0x98   : > { %v1262_v33 = vadd.f32 %v1254_v32, %v1200_v47  ;;  %v1263_v54 = vadd.f32 %v1254_v32, %v1201_v23  ;;  %v274_v46 = vmax.f32 %v261_v53, %v2518_v24  ;;  %v347_v12 = vmul.f32 %v3328_v41, %v3409_v27 }
  0x99   : > { %v283_v45 = vadd.f32 %v2522_v59, %v270_v1  ;;  %v1907_v61 = vsel %vm492_vm0, %v4582_v9, %v1906_v63  ;;  %v399_v62 = vmul.f32 %v3331_v42, %v3409_v27  ;;  %v478_v25 = vmul.f32 %v3339_v48, %v3409_v27 }
  0x9a   : > { %v1360_v10 = vadd.f32 %v1340_v39, %v1262_v33  ;;  %v1361_v31 = vadd.f32 %v1342_v37, %v1263_v54  ;;  %v3591_v40 = vmax.f32 %v274_v46, %v2522_v59  ;;  %v479_v24 = vmul.f32 %v3339_v48, %v3578_v17 }
  0x9b   : > { %v3593_v32 = vmul.f32 0.25, %v283_v45  ;;  %v407_v33 = vrot.slane %v399_v62, 1  ;;  %v496_v39 = vrot.slane %v478_v25, 2  ;;  %v629_v23 = vmul.f32 %v3404_v26, %v3342_v49 }
  0x9c   : > { %v1482_v47 = vadd.f32 %v1474_v35, %v1360_v10  ;;  %v1483_v53 = vadd.f32 %v3511_v38, %v1361_v31  ;;  %328 = vst [vmem:[#allocation2 + $0xe0] sm:$0xff] %v3591_v40  ;;  %v497_v46 = vrot.slane %v479_v24, 2  ;;  %v630_v45 = vmul.f32 %v3342_v49, %v3411_v28  ;;  %v3613_v49 = vld [vmem:[#allocation2 + $0x48] sm:$0xff] }
  0x9d   : > { %324 = vst [vmem:[#allocation2 + $0x50] sm:$0xff] %v3593_v32  ;;  %v682_v54 = vmul.f32 %v3354_v56, %v3411_v28  ;;  %v416_v37 = vadd.f32 %v407_v33, %v346_v52  ;;  %v417_v59 = vadd.f32 %v407_v33, %v347_v12  ;;  %v761_v1 = vmul.f32 %v3369_v4, %v3411_v28 }
  0x9e   : > { %v1544_v35 = vadd.f32 %v1536_v7, %v1482_v47  ;;  %v1545_v63 = vadd.f32 %v1536_v7, %v1483_v53  ;;  %v498_v38 = vsel %vm492_vm0, %v496_v39, %v497_v46  ;;  %v762_v62 = vmul.f32 %v3369_v4, %v3597_v13  ;;  %v3615_v47 = vld [vmem:[#allocation2 + $0x58] sm:$0x1] }
  0x9f   : > { %v690_v10 = vrot.slane %v682_v54, 1  ;;  %v515_v31 = vadd.f32 %v496_v39, %v416_v37  ;;  %v516_v24 = vadd.f32 %v498_v38, %v417_v59  ;;  %v778_v9 = vrot.slane %v761_v1, 2 }
  0xa0   : > { %v1642_v25 = vadd.f32 %v1622_v44, %v1544_v35  ;;  %v1643_v12 = vadd.f32 %v1624_v57, %v1545_v63  ;;  %v779_v52 = vrot.slane %v762_v62, 2  ;;  %v912_v7 = vmul.f32 %v3372_v5, %v3613_v49  ;;  %v3630_v62 = vld [vmem:[#allocation2 + $0xb8] sm:$0x1] }
  0xa1   : > { %v913_v33 = vmul.f32 %v3372_v5, %v3593_v32  ;;  %v637_v46 = vadd.f32 %v629_v23, %v515_v31  ;;  %v638_v44 = vadd.f32 %v630_v45, %v516_v24  ;;  %v965_v39 = vmul.f32 %v3375_v6, %v3593_v32 }
  0xa2   : > { %v1765_v53 = vadd.f32 %v3547_v14, %v1642_v25  ;;  %v1766_v54 = vadd.f32 %v3551_v15, %v1643_v12  ;;  %v780_v35 = vsel %vm492_vm0, %v778_v9, %v779_v52  ;;  %v1044_v57 = vmul.f32 %v3426_v34, %v3593_v32 }
  0xa3   : > { %v1045_v37 = vmul.f32 %v3426_v34, %v3615_v47  ;;  %v699_v1 = vadd.f32 %v690_v10, %v637_v46  ;;  %v700_v63 = vadd.f32 %v690_v10, %v638_v44  ;;  %v973_v38 = vrot.slane %v965_v39, 1 }
  0xa4   : > { %v1827_v59 = vadd.f32 %v1819_v30, %v1765_v53  ;;  %v1828_v14 = vadd.f32 %v1819_v30, %v1766_v54  ;;  %v1061_v23 = vrot.slane %v1044_v57, 2  ;;  %v1194_v15 = vmul.f32 %v3501_v29, %v3449_v55  ;;  %v3649_v54 = vld [vmem:[#allocation2 + $0xd0] sm:$0x1] }
  0xa5   : > { %v1062_v45 = vrot.slane %v1045_v37, 2  ;;  %v4667_v25 = vrot.slane %v3570_v0, 2  ;;  %v797_v24 = vadd.f32 %v778_v9, %v699_v1  ;;  %v798_v12 = vadd.f32 %v780_v35, %v700_v63 }
  0xa6   : > { %v1195_v52 = vmul.f32 %v3449_v55, %v3392_v19  ;;  %v1926_v53 = vadd.f32 %v1907_v61, %v1828_v14  ;;  %v1247_v30 = vmul.f32 %v3479_v43, %v3392_v19  ;;  %v1326_v46 = vmul.f32 %v3489_v18, %v3392_v19 }
  0xa7   : > { %v1925_v31 = vadd.f32 %v4667_v25, %v1827_v59  ;;  %v1063_v10 = vsel %vm492_vm0, %v1061_v23, %v1062_v45  ;;  %v920_v44 = vadd.f32 %v912_v7, %v797_v24  ;;  %v921_v9 = vadd.f32 %v913_v33, %v798_v12 }
  0xa8   : > { %v1327_v39 = vmul.f32 %v3489_v18, %v3630_v62  ;;  %v2059_v61 = vrot.slane %v1926_v53, 7  ;;  %v1255_v35 = vrot.slane %v1247_v30, 1  ;;  %v1343_v57 = vrot.slane %v1326_v46, 2  ;;  %v3669_v53 = vld [vmem:[#allocation2 + $0xe8] sm:$0x1] }
  0xa9   : > { %v2058_v0 = vrot.slane %v1925_v31, 7  ;;  %v1476_v37 = vmul.f32 %v3537_v60, %v3492_v22  ;;  %v982_v59 = vadd.f32 %v973_v38, %v920_v44  ;;  %v983_v1 = vadd.f32 %v973_v38, %v921_v9  ;;  %v3666_v38 = vld [vmem:[#allocation2 + $0xd8] sm:$0xff] }
  0xaa   : > { %v1344_v63 = vrot.slane %v1327_v39, 2  ;;  %v1477_v14 = vmul.f32 %v3492_v22, %v3394_v20  ;;  %v1529_v33 = vmul.f32 %v3517_v36, %v3394_v20  ;;  %v1608_v45 = vmul.f32 %v3525_v58, %v3394_v20 }
  0xab   : > { %v2060_v7 = vsel %vm2033_vm1, %v2058_v0, %v2059_v61  ;;  %v1609_v25 = vmul.f32 %v3525_v58, %v3649_v54  ;;  %v1080_v31 = vadd.f32 %v1061_v23, %v982_v59  ;;  %v1081_v24 = vadd.f32 %v1063_v10, %v983_v1 }
  0xac   : > { %2684 = vmatprep.mubr.f32.mxu1 %v2060_v7  ;;  %v1345_v12 = vsel %vm492_vm0, %v1343_v57, %v1344_v63  ;;  %v1759_v30 = vmul.f32 %v3528_v51, %v3666_v38  ;;  %v1537_v46 = vrot.slane %v1529_v33, 1  ;;  %v1625_v0 = vrot.slane %v1608_v45, 2 }
  0xad   : > { %v1626_v44 = vrot.slane %v1609_v25, 2  ;;  %v1760_v9 = vmul.f32 %v3528_v51, %v3591_v40  ;;  %v1202_v39 = vadd.f32 %v1194_v15, %v1080_v31  ;;  %v1203_v61 = vadd.f32 %v1195_v52, %v1081_v24 }
  0xae   : > { %v3677_v23 = vmul.f32 %v3556_v8, %v3591_v40  ;;  %v3681_v10 = vmul.f32 %v3564_v50, %v3591_v40  ;;  %v1892_v15 = vmul.f32 %v3564_v50, %v3669_v53  ;;  %v3691_v52 = vstv %s3643_s14  ;;  %s3775_s14 = sld [smem:[#allocation10 + $0x2f]] }
  0xaf   : > { %v1627_v59 = vsel %vm492_vm0, %v1625_v0, %v1626_v44  ;;  %4668 = vst [vmem:[#allocation34_spill] sm:$0xff] %v3691_v52  ;;  %v3694_v1 = vstv %s3645_s10  ;;  %v1264_v63 = vadd.f32 %v1255_v35, %v1202_v39  ;;  %v1265_v7 = vadd.f32 %v1255_v35, %v1203_v61  ;;  %s3777_s10 = sld [smem:[#allocation10 + $0x32]] }
  0xb0   : > { %4669 = vst [vmem:[#allocation35_spill] sm:$0xff] %v3694_v1  ;;  %v1820_v33 = vrot.slane %v3677_v23, 1  ;;  %v1908_v45 = vrot.slane %v3681_v10, 2  ;;  %v1909_v25 = vrot.slane %v1892_v15, 2  ;;  %v380_v31 = vmul.f32 %v3691_v52, %v3364_v2 }
  0xb1   : > { %v381_v24 = vmul.f32 %v3691_v52, %v3366_v3  ;;  %v450_v44 = vmul.f32 %v3694_v1, %v3366_v3  ;;  %v1362_v50 = vadd.f32 %v1343_v57, %v1264_v63  ;;  %v1363_v51 = vadd.f32 %v1345_v12, %v1265_v7 }
  0xb2   : > { %v3707_v39 = vstv %s3655_s12  ;;  %v3710_v35 = vstv %s3657_s16  ;;  %v1910_v61 = vsel %vm492_vm0, %v1908_v45, %v1909_v25  ;;  %v3728_v58 = vstv %s3683_s28  ;;  %s3790_s12 = sld [smem:[#allocation10 + $0x35]]  ;;  %s2527_s16 = sld [smem:[#allocation10 + $0x4]] }
  0xb3   : > { %4670 = vst [vmem:[#allocation36_spill] sm:$0xff] %v3707_v39  ;;  %4671 = vst [vmem:[#allocation37_spill] sm:$0xff] %v3710_v35  ;;  %v458_v23 = vrot.slane %v450_v44, 1  ;;  %v569_v2 = vmul.f32 %v3707_v39, %v3366_v3  ;;  %v570_v10 = vmul.f32 %v3707_v39, %v3380_v11  ;;  %v1484_v15 = vadd.f32 %v1476_v37, %v1362_v50  ;;  %s2530_s28 = sld [smem:[#allocation10 + $0x7]] }
  0xb4   : > { %v1485_v57 = vadd.f32 %v1477_v14, %v1363_v51  ;;  %v663_v12 = vmul.f32 %v3710_v35, %v3396_v21  ;;  %v664_v63 = vmul.f32 %v3710_v35, %v3409_v27  ;;  %v3731_v51 = vstv %s3685_s7  ;;  %s2524_s7 = sld [smem:[#allocation10 + $0x1]] }
  0xb5   : > { %v466_v7 = vadd.f32 %v458_v23, %v380_v31  ;;  %v467_v25 = vadd.f32 %v458_v23, %v381_v24  ;;  %v585_v44 = vrot.slane %v569_v2, 2  ;;  %v586_v8 = vrot.slane %v570_v10, 2 }
  0xb6   : > { %v1546_v3 = vadd.f32 %v1537_v46, %v1484_v15  ;;  %v1547_v11 = vadd.f32 %v1537_v46, %v1485_v57  ;;  %v733_v14 = vmul.f32 %v3728_v58, %v3409_v27  ;;  %v851_v31 = vmul.f32 %v3731_v51, %v3409_v27 }
  0xb7   : > { %v587_v50 = vsel %vm492_vm0, %v585_v44, %v586_v8  ;;  %v605_v37 = vadd.f32 %v585_v44, %v466_v7  ;;  %v852_v46 = vmul.f32 %v3731_v51, %v3390_v16  ;;  %v3741_v22 = vstv %s3704_s29  ;;  %s2533_s29 = sld [smem:[#allocation10 + $0xa]] }
  0xb8   : > { %v1644_v24 = vadd.f32 %v1625_v0, %v1546_v3  ;;  %v1645_v23 = vadd.f32 %v1627_v59, %v1547_v11  ;;  %v606_v2 = vadd.f32 %v587_v50, %v467_v25  ;;  %v741_v15 = vrot.slane %v733_v14, 1 }
  0xb9   : > { %v671_v10 = vadd.f32 %v663_v12, %v605_v37  ;;  %v867_v57 = vrot.slane %v851_v31, 2  ;;  %v868_v36 = vrot.slane %v852_v46, 2  ;;  %v946_v59 = vmul.f32 %v3741_v22, %v3404_v26 }
  0xba   : > { %v1767_v8 = vadd.f32 %v1759_v30, %v1644_v24  ;;  %v1768_v7 = vadd.f32 %v1760_v9, %v1645_v23  ;;  %v672_v44 = vadd.f32 %v664_v63, %v606_v2  ;;  %v947_v16 = vmul.f32 %v3741_v22, %v3411_v28  ;;  %v4672_v2 = vld [vmem:[#allocation19_spill] sm:$0xff] }
  0xbb   : > { %v749_v0 = vadd.f32 %v741_v15, %v671_v10  ;;  %v3752_v12 = vstv %s3717_s6  ;;  %v869_v30 = vsel %vm492_vm0, %v867_v57, %v868_v36  ;;  %v3762_v50 = vstv %s3723_s8  ;;  %v4673_v10 = vld [vmem:[#allocation20_spill] sm:$0xff]  ;;  %s2536_s6 = sld [smem:[#allocation10 + $0xd]]  ;;  %s2539_s8 = sld [smem:[#allocation10 + $0x10]] }
  0xbc   : > { %v1829_v25 = vadd.f32 %v1820_v33, %v1767_v8  ;;  %v1830_v3 = vadd.f32 %v1820_v33, %v1768_v7  ;;  %v750_v11 = vadd.f32 %v741_v15, %v672_v44  ;;  %v1016_v63 = vmul.f32 %v3752_v12, %v3411_v28 }
  0xbd   : > { %v887_v9 = vadd.f32 %v867_v57, %v749_v0  ;;  %v3765_v37 = vstv %s3725_s9  ;;  %v1134_v33 = vmul.f32 %v3762_v50, %v3411_v28  ;;  %v1135_v46 = vmul.f32 %v3762_v50, %v4672_v2  ;;  %v4674_v0 = vld [vmem:[#allocation21_spill] sm:$0xff]  ;;  %s2542_s9 = sld [smem:[#allocation10 + $0x13]] }
  0xbe   : > { %v1927_v14 = vadd.f32 %v1908_v45, %v1829_v25  ;;  %v1928_v31 = vadd.f32 %v1910_v61, %v1830_v3  ;;  %v888_v24 = vadd.f32 %v869_v30, %v750_v11  ;;  %v1024_v23 = vrot.slane %v1016_v63, 1 }
  0xbf   : > { %v954_v36 = vadd.f32 %v946_v59, %v887_v9  ;;  %v1228_v15 = vmul.f32 %v3765_v37, %v4673_v10  ;;  %v1150_v8 = vrot.slane %v1134_v33, 2  ;;  %v1151_v44 = vrot.slane %v1135_v46, 2 }
  0xc0   : > { %v2061_v45 = vrot.slane %v1927_v14, 7  ;;  %v2062_v61 = vrot.slane %v1928_v31, 7  ;;  %v955_v57 = vadd.f32 %v947_v16, %v888_v24  ;;  %v1229_v59 = vmul.f32 %v3765_v37, %v4674_v0  ;;  %v4677_v31 = vld [vmem:[#allocation23_spill] sm:$0xff] }
  0xc1   : > { %v1032_v7 = vadd.f32 %v1024_v23, %v954_v36  ;;  %v3782_v25 = vstv %s3743_s11  ;;  %v3788_v9 = vstv %s3745_s27  ;;  %v1152_v16 = vsel %vm492_vm0, %v1150_v8, %v1151_v44  ;;  %s2545_s11 = sld [smem:[#allocation10 + $0x16]]  ;;  %s2548_s27 = sld [smem:[#allocation10 + $0x19]] }
  0xc2   : > { %4675 = vst [vmem:[#allocation19_spill] sm:$0xff] %v3782_v25  ;;  %v2063_v3 = vsel %vm2033_vm1, %v2061_v45, %v2062_v61  ;;  %v1033_v11 = vadd.f32 %v1024_v23, %v955_v57  ;;  %v1298_v30 = vmul.f32 %v3782_v25, %v4674_v0  ;;  %4676 = vst [vmem:[#allocation20_spill] sm:$0xff] %v3788_v9  ;;  %v3798_v23 = vstv %s3755_s24  ;;  %s2551_s24 = sld [smem:[#allocation10 + $0x1c]] }
  0xc3   : > { %2685 = vmatmul.mubr.f32.vlgmr.msra.gmra.mrb[0].mxu1 %v2063_v3  ;;  %v1170_v63 = vadd.f32 %v1150_v8, %v1032_v7  ;;  %v1416_v14 = vmul.f32 %v3788_v9, %v4674_v0  ;;  %v1417_v24 = vmul.f32 %v3788_v9, %v4677_v31  ;;  %4678 = vst [vmem:[#allocation21_spill] sm:$0xff] %v3798_v23  ;;  %v3801_v2 = vstv %s3757_s22  ;;  %s2554_s22 = sld [smem:[#allocation10 + $0x1f]] }
  0xc4   : > { %v1171_v33 = vadd.f32 %v1152_v16, %v1033_v11  ;;  %v1306_v36 = vrot.slane %v1298_v30, 1  ;;  %4679 = vst [vmem:[#allocation23_spill] sm:$0xff] %v3801_v2  ;;  %v1510_v61 = vmul.f32 %v3798_v23, %v3501_v29  ;;  %v1511_v8 = vmul.f32 %v3798_v23, %v3392_v19  ;;  %v4681_v11 = vld [vmem:[#allocation27_spill] sm:$0xff] }
  0xc5   : > { %v1236_v46 = vadd.f32 %v1228_v15, %v1170_v63  ;;  %v1432_v10 = vrot.slane %v1416_v14, 2  ;;  %v1433_v45 = vrot.slane %v1417_v24, 2  ;;  %v1580_v7 = vmul.f32 %v3801_v2, %v3392_v19 }
  0xc6   : > { %v1237_v57 = vadd.f32 %v1229_v59, %v1171_v33  ;;  %v3810_v44 = vstv %s3769_s13  ;;  %v3818_v63 = vstv %s3775_s14  ;;  %v3821_v14 = vstv %s3777_s10  ;;  %s2557_s13 = sld [smem:[#allocation10 + $0x22]]  ;;  %s2560_s14 = sld [smem:[#allocation10 + $0x25]] }
  0xc7   : > { %4680 = vst [vmem:[#allocation38_spill] sm:$0xff] %v3810_v44  ;;  %v1314_v0 = vadd.f32 %v1306_v36, %v1236_v46  ;;  %v1434_v3 = vsel %vm492_vm0, %v1432_v10, %v1433_v45  ;;  %v1698_v15 = vmul.f32 %v3810_v44, %v3392_v19  ;;  %v1699_v30 = vmul.f32 %v3810_v44, %v4681_v11  ;;  %s2563_s10 = sld [smem:[#allocation10 + $0x28]] }
  0xc8   : > { %v1315_v16 = vadd.f32 %v1306_v36, %v1237_v57  ;;  %v1588_v59 = vrot.slane %v1580_v7, 1  ;;  %4682 = vst [vmem:[#allocation27_spill] sm:$0xff] %v3818_v63  ;;  %4683 = vst [vmem:[#allocation39_spill] sm:$0xff] %v3821_v14  ;;  %v1793_v46 = vmul.f32 %v3818_v63, %v3537_v60  ;;  %v1794_v45 = vmul.f32 %v3818_v63, %v3394_v20  ;;  %v4685_v7 = vld [vmem:[#allocation31_spill] sm:$0xff] }
  0xc9   : > { %v1452_v31 = vadd.f32 %v1432_v10, %v1314_v0  ;;  %v1714_v24 = vrot.slane %v1698_v15, 2  ;;  %v1715_v33 = vrot.slane %v1699_v30, 2  ;;  %v1863_v55 = vmul.f32 %v3821_v14, %v3394_v20 }
  0xca   : > { %v1453_v18 = vadd.f32 %v1434_v3, %v1315_v16  ;;  %v3830_v11 = vstv %s3790_s12  ;;  %v382_v3 = vmul.f32 %v3396_v21, %v3691_v52  ;;  %v383_v16 = vmul.f32 %v3691_v52, %v3409_v27  ;;  %s2566_s12 = sld [smem:[#allocation10 + $0x2b]] }
  0xcb   : > { %4684 = vst [vmem:[#allocation40_spill] sm:$0xff] %v3830_v11  ;;  %v1518_v36 = vadd.f32 %v1510_v61, %v1452_v31  ;;  %v1716_v57 = vsel %vm492_vm0, %v1714_v24, %v1715_v33  ;;  %v1981_v10 = vmul.f32 %v3830_v11, %v3394_v20  ;;  %v1982_v0 = vmul.f32 %v3830_v11, %v4685_v7 }
  0xcc   : > { %v1519_v15 = vadd.f32 %v1511_v8, %v1453_v18  ;;  %v1871_v30 = vrot.slane %v1863_v55, 1  ;;  %v451_v61 = vmul.f32 %v3694_v1, %v3409_v27  ;;  %v571_v33 = vmul.f32 %v3707_v39, %v3409_v27 }
  0xcd   : > { %v1596_v43 = vadd.f32 %v1588_v59, %v1518_v36  ;;  %v1997_v5 = vrot.slane %v1981_v10, 2  ;;  %v1998_v34 = vrot.slane %v1982_v0, 2  ;;  %v572_v18 = vmul.f32 %v3707_v39, %v3578_v17 }
  0xce   : > { %v1597_v31 = vadd.f32 %v1588_v59, %v1519_v15  ;;  %v665_v55 = vmul.f32 %v3404_v26, %v3710_v35  ;;  %v459_v7 = vrot.slane %v451_v61, 1  ;;  %v666_v36 = vmul.f32 %v3710_v35, %v3411_v28 }
  0xcf   : > { %v1734_v21 = vadd.f32 %v1714_v24, %v1596_v43  ;;  %v1999_v8 = vsel %vm492_vm0, %v1997_v5, %v1998_v34  ;;  %v588_v0 = vrot.slane %v571_v33, 2  ;;  %v589_v1 = vrot.slane %v572_v18, 2 }
  0xd0   : > { %v1735_v10 = vadd.f32 %v1716_v57, %v1597_v31  ;;  %v734_v59 = vmul.f32 %v3728_v58, %v3411_v28  ;;  %v468_v15 = vadd.f32 %v459_v7, %v382_v3  ;;  %v469_v52 = vadd.f32 %v459_v7, %v383_v16 }
  0xd1   : > { %v1801_v27 = vadd.f32 %v1793_v46, %v1734_v21  ;;  %v853_v17 = vmul.f32 %v3731_v51, %v3411_v28  ;;  %v590_v43 = vsel %vm492_vm0, %v588_v0, %v589_v1  ;;  %v854_v24 = vmul.f32 %v3731_v51, %v3597_v13 }
  0xd2   : > { %v1802_v39 = vadd.f32 %v1794_v45, %v1735_v10  ;;  %v742_v34 = vrot.slane %v734_v59, 1  ;;  %v607_v57 = vadd.f32 %v588_v0, %v468_v15  ;;  %v608_v31 = vadd.f32 %v590_v43, %v469_v52 }
  0xd3   : > { %v1879_v61 = vadd.f32 %v1871_v30, %v1801_v27  ;;  %v870_v33 = vrot.slane %v853_v17, 2  ;;  %v871_v35 = vrot.slane %v854_v24, 2  ;;  %v948_v46 = vmul.f32 %v3741_v22, %v3613_v49 }
  0xd4   : > { %v1880_v18 = vadd.f32 %v1871_v30, %v1802_v39  ;;  %v673_v16 = vadd.f32 %v665_v55, %v607_v57  ;;  %v674_v21 = vadd.f32 %v666_v36, %v608_v31  ;;  %v1017_v28 = vmul.f32 %v3752_v12, %v3593_v32 }
  0xd5   : > { %v2017_v3 = vadd.f32 %v1997_v5, %v1879_v61  ;;  %v872_v45 = vsel %vm492_vm0, %v870_v33, %v871_v35  ;;  %v1136_v13 = vmul.f32 %v3762_v50, %v3593_v32  ;;  %v1137_v52 = vmul.f32 %v3762_v50, %v3615_v47 }
  0xd6   : > { %v2018_v1 = vadd.f32 %v1999_v8, %v1880_v18  ;;  %v751_v30 = vadd.f32 %v742_v34, %v673_v16  ;;  %v752_v7 = vadd.f32 %v742_v34, %v674_v21  ;;  %v949_v5 = vmul.f32 %v3741_v22, %v3593_v32  ;;  %v249_v16 = vld [vmem:[%s3291_s15 + $0x18] sm:$0xff] }
  0xd7   : > { %v2187_v39 = vrot.slane %v2017_v3, 7  ;;  %v1153_v36 = vrot.slane %v1136_v13, 2  ;;  %v1154_v10 = vrot.slane %v1137_v52, 2  ;;  %v1025_v8 = vrot.slane %v1017_v28, 1  ;;  %v2515_v21 = vld [vmem:[%s3291_s15 + $0x38] sm:$0xff] }
  0xd8   : > { %v2188_v55 = vrot.slane %v2018_v1, 7  ;;  %v889_v0 = vadd.f32 %v870_v33, %v751_v30  ;;  %v890_v59 = vadd.f32 %v872_v45, %v752_v7  ;;  %v1299_v35 = vmul.f32 %v3782_v25, %v3392_v19  ;;  %v2519_v7 = vld [vmem:[%s3291_s15 + $0x58] sm:$0xff] }
  0xd9   : > { %v1230_v47 = vmul.f32 %v3501_v29, %v3765_v37  ;;  %v1418_v15 = vmul.f32 %v3788_v9, %v3392_v19  ;;  %v1419_v17 = vmul.f32 %v3788_v9, %v3630_v62  ;;  %v1155_v24 = vsel %vm492_vm0, %v1153_v36, %v1154_v10 }
  0xda   : > { %v2189_v27 = vsel %vm2033_vm1, %v2187_v39, %v2188_v55  ;;  %v956_v43 = vadd.f32 %v948_v46, %v889_v0  ;;  %v957_v34 = vadd.f32 %v949_v5, %v890_v59  ;;  %v1231_v61 = vmul.f32 %v3765_v37, %v3392_v19 }
  0xdb   : > { %2722 = vmatprep.mubr.f32.mxu0 %v2189_v27  ;;  %v1307_v57 = vrot.slane %v1299_v35, 1  ;;  %v1435_v31 = vrot.slane %v1418_v15, 2  ;;  %v1436_v33 = vrot.slane %v1419_v17, 2  ;;  %v1581_v29 = vmul.f32 %v3801_v2, %v3394_v20  ;;  %v3910_v35 = vld [vmem:[#allocation2 + $0x38] sm:$0xff] }
  0xdc   : > { %v1034_v18 = vadd.f32 %v1025_v8, %v956_v43  ;;  %v1035_v3 = vadd.f32 %v1025_v8, %v957_v34  ;;  %v3886_v62 = vmul.f32 %v3810_v44, %v3394_v20  ;;  %v1701_v46 = vmul.f32 %v3810_v44, %v3649_v54  ;;  %v2523_v8 = vld [vmem:[%s3291_s15 + $0x78] sm:$0xff] }
  0xdd   : > { %v1437_v19 = vsel %vm492_vm0, %v1435_v31, %v1436_v33  ;;  %v1512_v28 = vmul.f32 %v3537_v60, %v3798_v23  ;;  %v1513_v1 = vmul.f32 %v3798_v23, %v3394_v20  ;;  %v1589_v45 = vrot.slane %v1581_v29, 1 }
  0xde   : > { %v1172_v13 = vadd.f32 %v1153_v36, %v1034_v18  ;;  %v1173_v52 = vadd.f32 %v1155_v24, %v1035_v3  ;;  %v1717_v39 = vrot.slane %v3886_v62, 2  ;;  %v1718_v30 = vrot.slane %v1701_v46, 2 }
  0xdf   : > { %v1795_v54 = vmul.f32 %v3818_v63, %v3666_v38  ;;  %v3903_v5 = vmul.f32 %v3830_v11, %v3591_v40  ;;  %v1984_v55 = vmul.f32 %v3830_v11, %v3669_v53  ;;  %v258_v10 = vadd.f32 %v2515_v21, %v249_v16 }
  0xe0   : > { %v1238_v0 = vadd.f32 %v1230_v47, %v1172_v13  ;;  %v1239_v20 = vadd.f32 %v1231_v61, %v1173_v52  ;;  %v1796_v36 = vmul.f32 %v3818_v63, %v3591_v40  ;;  %v262_v59 = vmax.f32 %v249_v16, %v2515_v21  ;;  %v3916_v61 = vld [vmem:[#allocation2 + $0x40] sm:$0x1] }
  0xe1   : > { %v1719_v27 = vsel %vm492_vm0, %v1717_v39, %v1718_v30  ;;  %v1864_v15 = vmul.f32 %v3821_v14, %v3591_v40  ;;  %v2000_v17 = vrot.slane %v3903_v5, 2  ;;  %v271_v43 = vadd.f32 %v2519_v7, %v258_v10  ;;  %v4686_v30 = vld [vmem:[#allocation16_spill] sm:$0xff] }
  0xe2   : > { %v1316_v34 = vadd.f32 %v1307_v57, %v1238_v0  ;;  %v1317_v53 = vadd.f32 %v1307_v57, %v1239_v20  ;;  %v2001_v24 = vrot.slane %v1984_v55, 2  ;;  %v275_v47 = vmax.f32 %v262_v59, %v2519_v7 }
  0xe3   : > { %v284_v33 = vadd.f32 %v2523_v8, %v271_v43  ;;  %v348_v29 = vmul.f32 %v3404_v26, %v3328_v41  ;;  %v349_v18 = vmul.f32 %v3328_v41, %v3910_v35  ;;  %v400_v3 = vmul.f32 %v3331_v42, %v3910_v35  ;;  %v3932_v26 = vld [vmem:[#allocation2 + $0x58] sm:$0x1] }
  0xe4   : > { %v1454_v62 = vadd.f32 %v1435_v31, %v1316_v34  ;;  %v1455_v46 = vadd.f32 %v1437_v19, %v1317_v53  ;;  %v3924_v16 = vmax.f32 %v275_v47, %v2523_v8  ;;  %v480_v57 = vmul.f32 %v3339_v48, %v3910_v35 }
  0xe5   : > { %v3928_v21 = vmul.f32 0.25, %v284_v33  ;;  %v408_v13 = vrot.slane %v400_v3, 1  ;;  %v481_v52 = vmul.f32 %v3339_v48, %v3916_v61  ;;  %v631_v7 = vmul.f32 %v3613_v49, %v4686_v30 }
  0xe6   : > { %v1520_v55 = vadd.f32 %v1512_v28, %v1454_v62  ;;  %v1521_v10 = vadd.f32 %v1513_v1, %v1455_v46  ;;  %329 = vst [vmem:[#allocation2 + $0xf8] sm:$0xff] %v3924_v16  ;;  %v499_v31 = vrot.slane %v480_v57, 2  ;;  %v632_v19 = vmul.f32 %v4686_v30, %v3593_v32  ;;  %v3947_v57 = vld [vmem:[#allocation2 + $0x70] sm:$0x1] }
  0xe7   : > { %325 = vst [vmem:[#allocation2 + $0x68] sm:$0xff] %v3928_v21  ;;  %v418_v0 = vadd.f32 %v408_v13, %v348_v29  ;;  %v419_v20 = vadd.f32 %v408_v13, %v349_v18  ;;  %v500_v59 = vrot.slane %v481_v52, 2  ;;  %v683_v8 = vmul.f32 %v3354_v56, %v3593_v32 }
  0xe8   : > { %v1598_v43 = vadd.f32 %v1589_v45, %v1520_v55  ;;  %v1599_v34 = vadd.f32 %v1589_v45, %v1521_v10  ;;  %v763_v28 = vmul.f32 %v3369_v4, %v3593_v32  ;;  %v764_v1 = vmul.f32 %v3369_v4, %v3932_v26 }
  0xe9   : > { %v1872_v53 = vrot.slane %v1864_v15, 1  ;;  %v501_v47 = vsel %vm492_vm0, %v499_v31, %v500_v59  ;;  %v517_v33 = vadd.f32 %v499_v31, %v418_v0  ;;  %v691_v3 = vrot.slane %v683_v8, 1  ;;  %v3954_v31 = vld [vmem:[#allocation2 + $0x60] sm:$0xff]  ;;  %v4688_v8 = vld [vmem:[#allocation17_spill] sm:$0xff] }
  0xea   : > { %v1736_v62 = vadd.f32 %v1717_v39, %v1598_v43  ;;  %v1737_v29 = vadd.f32 %v1719_v27, %v1599_v34  ;;  %v518_v18 = vadd.f32 %v501_v47, %v419_v20  ;;  %v781_v46 = vrot.slane %v763_v28, 2  ;;  %v4687_v39 = vld [vmem:[#allocation18_spill] sm:$0xff] }
  0xeb   : > { %v2002_v45 = vsel %vm492_vm0, %v2000_v17, %v2001_v24  ;;  %v639_v13 = vadd.f32 %v631_v7, %v517_v33  ;;  %v782_v52 = vrot.slane %v764_v1, 2  ;;  %v966_v55 = vmul.f32 %v3375_v6, %v3928_v21  ;;  %v3963_v7 = vld [vmem:[#allocation2 + $0xc8] sm:$0xff]  ;;  %v3967_v28 = vld [vmem:[#allocation2 + $0xd0] sm:$0x1] }
  0xec   : > { %v1803_v15 = vadd.f32 %v1795_v54, %v1736_v62  ;;  %v1804_v10 = vadd.f32 %v1796_v36, %v1737_v29  ;;  %v640_v59 = vadd.f32 %v632_v19, %v518_v18  ;;  %v1046_v27 = vmul.f32 %v4687_v39, %v3928_v21  ;;  %4689 = vst [vmem:[#allocation31_spill] sm:$0xff] %v3967_v28 }
  0xed   : > { %v701_v0 = vadd.f32 %v691_v3, %v639_v13  ;;  %v783_v20 = vsel %vm492_vm0, %v781_v46, %v782_v52  ;;  %v914_v43 = vmul.f32 %v4688_v8, %v3954_v31  ;;  %v1047_v24 = vmul.f32 %v4687_v39, %v3947_v57  ;;  %v4690_v52 = vld [vmem:[#allocation24_spill] sm:$0xff] }
  0xee   : > { %v1881_v34 = vadd.f32 %v1872_v53, %v1803_v15  ;;  %v1882_v54 = vadd.f32 %v1872_v53, %v1804_v10  ;;  %v702_v36 = vadd.f32 %v691_v3, %v640_v59  ;;  %v915_v19 = vmul.f32 %v4688_v8, %v3928_v21  ;;  %v4691_v53 = vld [vmem:[#allocation22_spill] sm:$0xff]  ;;  %v4692_v10 = vld [vmem:[#allocation25_spill] sm:$0xff] }
  0xef   : > { %v799_v1 = vadd.f32 %v781_v46, %v701_v0  ;;  %v974_v47 = vrot.slane %v966_v55, 1  ;;  %v1064_v33 = vrot.slane %v1046_v27, 2  ;;  %v1065_v62 = vrot.slane %v1047_v24, 2 }
  0xf0   : > { %v2019_v29 = vadd.f32 %v2000_v17, %v1881_v34  ;;  %v2020_v18 = vadd.f32 %v2002_v45, %v1882_v54  ;;  %v800_v13 = vadd.f32 %v783_v20, %v702_v36  ;;  %v1248_v14 = vmul.f32 %v4690_v52, %v3963_v7  ;;  %v3981_v17 = vld [vmem:[#allocation2 + $0xe8] sm:$0x1]  ;;  %v4694_v36 = vld [vmem:[#allocation28_spill] sm:$0xff] }
  0xf1   : > { %v922_v15 = vadd.f32 %v914_v43, %v799_v1  ;;  %v1196_v3 = vmul.f32 %v3537_v60, %v4691_v53  ;;  %v1328_v59 = vmul.f32 %v4692_v10, %v3963_v7  ;;  %v1329_v46 = vmul.f32 %v4692_v10, %v3967_v28  ;;  %4693 = vst [vmem:[#allocation16_spill] sm:$0xff] %v3981_v17 }
  0xf2   : > { %v2190_v55 = vrot.slane %v2019_v29, 7  ;;  %v2191_v27 = vrot.slane %v2020_v18, 7  ;;  %v923_v0 = vadd.f32 %v915_v19, %v800_v13  ;;  %v1197_v5 = vmul.f32 %v4691_v53, %v3963_v7  ;;  %v4695_v19 = vld [vmem:[#allocation26_spill] sm:$0xff]  ;;  %v4696_v13 = vld [vmem:[#allocation29_spill] sm:$0xff] }
  0xf3   : > { %v984_v45 = vadd.f32 %v974_v47, %v922_v15  ;;  %v1066_v20 = vsel %vm492_vm0, %v1064_v33, %v1065_v62  ;;  %v1346_v43 = vrot.slane %v1328_v59, 2  ;;  %v1347_v24 = vrot.slane %v1329_v46, 2  ;;  %v3996_v46 = vld [vmem:[#allocation2 + $0x100] sm:$0x1] }
  0xf4   : > { %v2192_v60 = vsel %vm2033_vm1, %v2190_v55, %v2191_v27  ;;  %v985_v34 = vadd.f32 %v974_v47, %v923_v0  ;;  %v1256_v54 = vrot.slane %v1248_v14, 1  ;;  %v1530_v1 = vmul.f32 %v4694_v36, %v3591_v40  ;;  %4697 = vst [vmem:[#allocation18_spill] sm:$0xff] %v3996_v46  ;;  %v3998_v0 = vld [vmem:[#allocation2 + $0xf0] sm:$0xff] }
  0xf5   : > { %2723 = vmatmul.mubr.f32.vlgmr.msra.gmra.mrb[0].mxu0 %v2192_v60  ;;  %v1082_v29 = vadd.f32 %v1064_v33, %v984_v45  ;;  %v1478_v18 = vmul.f32 %v3666_v38, %v4695_v19  ;;  %v1610_v11 = vmul.f32 %v4696_v13, %v3591_v40  ;;  %v1611_v62 = vmul.f32 %v4696_v13, %v3981_v17  ;;  %v4698_v45 = vld [vmem:[#allocation32_spill] sm:$0xff] }
  0xf6   : > { %v1083_v15 = vadd.f32 %v1066_v20, %v985_v34  ;;  %v1348_v59 = vsel %vm492_vm0, %v1346_v43, %v1347_v24  ;;  %v1479_v14 = vmul.f32 %v4695_v19, %v3591_v40  ;;  %v1538_v47 = vrot.slane %v1530_v1, 1  ;;  %v4699_v20 = vld [vmem:[#allocation30_spill] sm:$0xff]  ;;  %v4700_v1 = vld [vmem:[#allocation33_spill] sm:$0xff] }
  0xf7   : > { %v1204_v55 = vadd.f32 %v1196_v3, %v1082_v29  ;;  %v1628_v33 = vrot.slane %v1610_v11, 2  ;;  %v1629_v27 = vrot.slane %v1611_v62, 2  ;;  %v4002_v60 = vmul.f32 %v4698_v45, %v3924_v16  ;;  %v4012_v3 = vld [vmem:[#allocation2 + $0x58] sm:$0x1] }
  0xf8   : > { %v1205_v63 = vadd.f32 %v1197_v5, %v1083_v15  ;;  %v1761_v34 = vmul.f32 %v4699_v20, %v3998_v0  ;;  %v1762_v24 = vmul.f32 %v4699_v20, %v3924_v16  ;;  %v4010_v23 = vmul.f32 %v4700_v1, %v3924_v16  ;;  %4701 = vst [vmem:[#allocation17_spill] sm:$0xff] %v4012_v3 }
  0xf9   : > { %v1266_v11 = vadd.f32 %v1256_v54, %v1204_v55  ;;  %v1630_v29 = vsel %vm492_vm0, %v1628_v33, %v1629_v27  ;;  %v1894_v62 = vmul.f32 %v4700_v1, %v3996_v46  ;;  %v350_v5 = vmul.f32 %v3613_v49, %v3328_v41 }
  0xfa   : > { %v1267_v15 = vadd.f32 %v1256_v54, %v1205_v63  ;;  %v1821_v17 = vrot.slane %v4002_v60, 1  ;;  %v351_v44 = vmul.f32 %v3328_v41, %v3593_v32  ;;  %v401_v2 = vmul.f32 %v3331_v42, %v3593_v32  ;;  %v4029_v63 = vld [vmem:[#allocation2 + $0x70] sm:$0x1] }
  0xfb   : > { %v1364_v28 = vadd.f32 %v1346_v43, %v1266_v11  ;;  %v1911_v55 = vrot.slane %v4010_v23, 2  ;;  %v482_v27 = vmul.f32 %v3339_v48, %v3593_v32  ;;  %v483_v46 = vmul.f32 %v3339_v48, %v4012_v3  ;;  %4702 = vst [vmem:[#allocation24_spill] sm:$0xff] %v4029_v63 }
  0xfc   : > { %v1365_v25 = vadd.f32 %v1348_v59, %v1267_v15  ;;  %v409_v49 = vrot.slane %v401_v2, 1  ;;  %v633_v54 = vmul.f32 %v3954_v31, %v4686_v30  ;;  %v634_v41 = vmul.f32 %v4686_v30, %v3928_v21  ;;  %v4039_v2 = vld [vmem:[#allocation2 + $0x78] sm:$0xff] }
  0xfd   : > { %v1486_v42 = vadd.f32 %v1478_v18, %v1364_v28  ;;  %v502_v43 = vrot.slane %v482_v27, 2  ;;  %v503_v60 = vrot.slane %v483_v46, 2  ;;  %v684_v23 = vmul.f32 %v3354_v56, %v3928_v21  ;;  %v4044_v28 = vld [vmem:[#allocation2 + $0x80] sm:$0xff] }
  0xfe   : > { %v1487_v32 = vadd.f32 %v1479_v14, %v1365_v25  ;;  %v420_v11 = vadd.f32 %v409_v49, %v350_v5  ;;  %v421_v9 = vadd.f32 %v409_v49, %v351_v44  ;;  %v765_v48 = vmul.f32 %v3369_v4, %v3928_v21  ;;  %v4046_v14 = vld [vmem:[#allocation2 + $0x88] sm:$0x1] }
  0xff   : > { %v1548_v59 = vadd.f32 %v1538_v47, %v1486_v42  ;;  %v504_v15 = vsel %vm492_vm0, %v502_v43, %v503_v60  ;;  %v692_v3 = vrot.slane %v684_v23, 1  ;;  %v766_v30 = vmul.f32 %v3369_v4, %v4029_v63 }
 0x100   : > { %v1549_v18 = vadd.f32 %v1538_v47, %v1487_v32  ;;  %v519_v46 = vadd.f32 %v502_v43, %v420_v11  ;;  %v520_v56 = vadd.f32 %v504_v15, %v421_v9  ;;  %v784_v25 = vrot.slane %v765_v48, 2 }
 0x101   : > { %v1646_v44 = vadd.f32 %v1628_v33, %v1548_v59  ;;  %v1912_v5 = vrot.slane %v1894_v62, 2  ;;  %v785_v27 = vrot.slane %v766_v30, 2  ;;  %v916_v49 = vmul.f32 %v4688_v8, %v4039_v2 }
 0x102   : > { %v1647_v42 = vadd.f32 %v1630_v29, %v1549_v18  ;;  %v641_v60 = vadd.f32 %v633_v54, %v519_v46  ;;  %v642_v23 = vadd.f32 %v634_v41, %v520_v56  ;;  %v967_v4 = vmul.f32 %v3375_v6, %v4044_v28 }
 0x103   : > { %v1769_v63 = vadd.f32 %v1761_v34, %v1646_v44  ;;  %v786_v47 = vsel %vm492_vm0, %v784_v25, %v785_v27  ;;  %v1048_v9 = vmul.f32 %v4687_v39, %v4044_v28  ;;  %v1049_v33 = vmul.f32 %v4687_v39, %v4046_v14  ;;  %v4060_v34 = vld [vmem:[#allocation2 + $0xe8] sm:$0x1] }
 0x104   : > { %v1770_v62 = vadd.f32 %v1762_v24, %v1647_v42  ;;  %v703_v43 = vadd.f32 %v692_v3, %v641_v60  ;;  %v704_v32 = vadd.f32 %v692_v3, %v642_v23  ;;  %v917_v29 = vmul.f32 %v4688_v8, %v4044_v28 }
 0x105   : > { %v1831_v54 = vadd.f32 %v1821_v17, %v1769_v63  ;;  %v1913_v41 = vsel %vm492_vm0, %v1911_v55, %v1912_v5  ;;  %v1067_v11 = vrot.slane %v1048_v9, 2  ;;  %v1068_v6 = vrot.slane %v1049_v33, 2  ;;  %v4086_v33 = vld [vmem:[#allocation2 + $0x110] sm:$0xff] }
 0x106   : > { %v1832_v48 = vadd.f32 %v1821_v17, %v1770_v62  ;;  %v801_v59 = vadd.f32 %v784_v25, %v703_v43  ;;  %v802_v15 = vadd.f32 %v786_v47, %v704_v32  ;;  %v975_v30 = vrot.slane %v967_v4, 1  ;;  %v4070_v17 = vld [vmem:[#allocation2 + $0x100] sm:$0x1]  ;;  %v4081_v4 = vld [vmem:[#allocation2 + $0x108] sm:$0xff]  ;;  %v4088_v62 = vld [vmem:[#allocation2 + $0x118] sm:$0x1] }
 0x107   : > { %v1929_v18 = vadd.f32 %v1911_v55, %v1831_v54  ;;  %v1198_v39 = vmul.f32 %v3666_v38, %v4691_v53  ;;  %v1249_v24 = vmul.f32 %v4690_v52, %v3591_v40  ;;  %v1330_v8 = vmul.f32 %v4692_v10, %v3591_v40 }
 0x108   : > { %v1930_v3 = vadd.f32 %v1913_v41, %v1832_v48  ;;  %v924_v63 = vadd.f32 %v916_v49, %v801_v59  ;;  %v925_v46 = vadd.f32 %v917_v29, %v802_v15  ;;  %v1331_v56 = vmul.f32 %v4692_v10, %v4060_v34 }
 0x109   : > { %v2064_v25 = vrot.slane %v1929_v18, 7  ;;  %v1069_v55 = vsel %vm492_vm0, %v1067_v11, %v1068_v6  ;;  %v1199_v38 = vmul.f32 %v4691_v53, %v3591_v40  ;;  %v1349_v44 = vrot.slane %v1330_v8, 2 }
 0x10a   : > { %v2065_v5 = vrot.slane %v1930_v3, 7  ;;  %v986_v52 = vadd.f32 %v975_v30, %v924_v63  ;;  %v987_v27 = vadd.f32 %v975_v30, %v925_v46  ;;  %v1350_v42 = vrot.slane %v1331_v56, 2  ;;  %v4705_v46 = vld [vmem:[#allocation36_spill] sm:$0xff] }
 0x10b   : > { %v1257_v60 = vrot.slane %v1249_v24, 1  ;;  %v1531_v49 = vmul.f32 %v4694_v36, %v3924_v16  ;;  %v1612_v10 = vmul.f32 %v4696_v13, %v3924_v16  ;;  %v1613_v23 = vmul.f32 %v4696_v13, %v4070_v17  ;;  %v4703_v24 = vld [vmem:[#allocation34_spill] sm:$0xff] }
 0x10c   : > { %v2066_v47 = vsel %vm2033_vm1, %v2064_v25, %v2065_v5  ;;  %v1084_v40 = vadd.f32 %v1067_v11, %v986_v52  ;;  %v1085_v53 = vadd.f32 %v1069_v55, %v987_v27  ;;  %v1480_v9 = vmul.f32 %v3998_v0, %v4695_v19  ;;  %v4116_v27 = vld [vmem:[#allocation2 + $0x48] sm:$0xff] }
 0x10d   : > { %2687 = vmatprep.mubr.f32.mxu1 %v2066_v47  ;;  %v1351_v36 = vsel %vm492_vm0, %v1349_v44, %v1350_v42  ;;  %v1481_v43 = vmul.f32 %v4695_v19, %v3924_v16  ;;  %v1631_v13 = vrot.slane %v1612_v10, 2  ;;  %v1632_v32 = vrot.slane %v1613_v23, 2  ;;  %v4706_v42 = vld [vmem:[#allocation37_spill] sm:$0xff] }
 0x10e   : > { %v1206_v29 = vadd.f32 %v1198_v39, %v1084_v40  ;;  %v1207_v54 = vadd.f32 %v1199_v38, %v1085_v53  ;;  %v1539_v41 = vrot.slane %v1531_v49, 1  ;;  %v1763_v11 = vmul.f32 %v4699_v20, %v4081_v4  ;;  %v4104_v39 = vld [vmem:[#allocation2 + $0x30] sm:$0xff] }
 0x10f   : > { %v1764_v6 = vmul.f32 %v4699_v20, %v4086_v33  ;;  %v1814_v48 = vmul.f32 %v4698_v45, %v4086_v33  ;;  %v1895_v59 = vmul.f32 %v4700_v1, %v4086_v33  ;;  %v1896_v19 = vmul.f32 %v4700_v1, %v4088_v62  ;;  %v4704_v45 = vld [vmem:[#allocation35_spill] sm:$0xff]  ;;  %v4120_v49 = vld [vmem:[#allocation2 + $0x50] sm:$0xff] }
 0x110   : > { %v1268_v15 = vadd.f32 %v1257_v60, %v1206_v29  ;;  %v1269_v30 = vadd.f32 %v1257_v60, %v1207_v54  ;;  %v1633_v18 = vsel %vm492_vm0, %v1631_v13, %v1632_v32  ;;  %v384_v8 = vmul.f32 %v4104_v39, %v4703_v24 }
 0x111   : > { %v1914_v3 = vrot.slane %v1895_v59, 2  ;;  %v385_v20 = vmul.f32 %v4703_v24, %v3910_v35  ;;  %v452_v63 = vmul.f32 %v4704_v45, %v3910_v35  ;;  %v573_v56 = vmul.f32 %v4705_v46, %v3910_v35 }
 0x112   : > { %v1366_v1 = vadd.f32 %v1349_v44, %v1268_v15  ;;  %v1367_v25 = vadd.f32 %v1351_v36, %v1269_v30  ;;  %v1915_v55 = vrot.slane %v1896_v19, 2  ;;  %v574_v38 = vmul.f32 %v4705_v46, %v3916_v61 }
 0x113   : > { %v460_v5 = vrot.slane %v452_v63, 1  ;;  %v591_v52 = vrot.slane %v573_v56, 2  ;;  %v667_v60 = vmul.f32 %v4116_v27, %v4706_v42  ;;  %v668_v10 = vmul.f32 %v4120_v49, %v4706_v42 }
 0x114   : > { %v1488_v23 = vadd.f32 %v1480_v9, %v1366_v1  ;;  %v1489_v35 = vadd.f32 %v1481_v43, %v1367_v25  ;;  %v592_v44 = vrot.slane %v574_v38, 2  ;;  %v735_v47 = vmul.f32 %v4120_v49, %v3728_v58 }
 0x115   : > { %v470_v40 = vadd.f32 %v460_v5, %v384_v8  ;;  %v471_v61 = vadd.f32 %v460_v5, %v385_v20  ;;  %v855_v53 = vmul.f32 %v4120_v49, %v3731_v51  ;;  %v856_v36 = vmul.f32 %v3731_v51, %v3932_v26 }
 0x116   : > { %v1550_v32 = vadd.f32 %v1539_v41, %v1488_v23  ;;  %v1551_v29 = vadd.f32 %v1539_v41, %v1489_v35  ;;  %v593_v54 = vsel %vm492_vm0, %v591_v52, %v592_v44  ;;  %v743_v59 = vrot.slane %v735_v47, 1 }
 0x117   : > { %v609_v19 = vadd.f32 %v591_v52, %v470_v40  ;;  %v610_v9 = vadd.f32 %v593_v54, %v471_v61  ;;  %v873_v43 = vrot.slane %v855_v53, 2  ;;  %v874_v15 = vrot.slane %v856_v36, 2  ;;  %v4143_v61 = vld [vmem:[#allocation2 + $0xc0] sm:$0xff]  ;;  %v4708_v54 = vld [vmem:[#allocation19_spill] sm:$0xff] }
 0x118   : > { %v1648_v30 = vadd.f32 %v1631_v13, %v1550_v32  ;;  %v1649_v63 = vadd.f32 %v1633_v18, %v1551_v29  ;;  %v1822_v56 = vrot.slane %v1814_v48, 1  ;;  %v1916_v8 = vsel %vm492_vm0, %v1914_v3, %v1915_v55  ;;  %v4707_v53 = vld [vmem:[#allocation20_spill] sm:$0xff] }
 0x119   : > { %v675_v20 = vadd.f32 %v667_v60, %v609_v19  ;;  %v676_v1 = vadd.f32 %v668_v10, %v610_v9  ;;  %v875_v25 = vsel %vm492_vm0, %v873_v43, %v874_v15  ;;  %v1018_v26 = vmul.f32 %v3752_v12, %v3928_v21  ;;  %v4709_v19 = vld [vmem:[#allocation31_spill] sm:$0xff] }
 0x11a   : > { %v1771_v41 = vadd.f32 %v1763_v11, %v1648_v30  ;;  %v1772_v38 = vadd.f32 %v1764_v6, %v1649_v63  ;;  %v1138_v5 = vmul.f32 %v3762_v50, %v3928_v21  ;;  %v1139_v52 = vmul.f32 %v3762_v50, %v3947_v57 }
 0x11b   : > { %v753_v13 = vadd.f32 %v743_v59, %v675_v20  ;;  %v754_v18 = vadd.f32 %v743_v59, %v676_v1  ;;  %v950_v48 = vmul.f32 %v3741_v22, %v3954_v31  ;;  %v951_v55 = vmul.f32 %v3741_v22, %v3928_v21 }
 0x11c   : > { %v1833_v60 = vadd.f32 %v1822_v56, %v1771_v41  ;;  %v1834_v10 = vadd.f32 %v1822_v56, %v1772_v38  ;;  %v1156_v23 = vrot.slane %v1138_v5, 2  ;;  %v1157_v35 = vrot.slane %v1139_v52, 2  ;;  %v4711_v38 = vld [vmem:[#allocation38_spill] sm:$0xff]  ;;  %v4712_v52 = vld [vmem:[#allocation16_spill] sm:$0xff] }
 0x11d   : > { %v891_v11 = vadd.f32 %v873_v43, %v753_v13  ;;  %v892_v6 = vadd.f32 %v875_v25, %v754_v18  ;;  %v1026_v44 = vrot.slane %v1018_v26, 1  ;;  %v1232_v57 = vmul.f32 %v4143_v61, %v3765_v37  ;;  %v4157_v25 = vld [vmem:[#allocation2 + $0xe0] sm:$0xff]  ;;  %v4710_v26 = vld [vmem:[#allocation23_spill] sm:$0xff] }
 0x11e   : > { %v1931_v47 = vadd.f32 %v1914_v3, %v1833_v60  ;;  %v1932_v40 = vadd.f32 %v1916_v8, %v1834_v10  ;;  %v1420_v36 = vmul.f32 %v4707_v53, %v3963_v7  ;;  %v1300_v59 = vmul.f32 %v4708_v54, %v3963_v7  ;;  %v4165_v60 = vld [vmem:[#allocation2 + $0xd8] sm:$0xff] }
 0x11f   : > { %v958_v32 = vadd.f32 %v950_v48, %v891_v11  ;;  %v959_v29 = vadd.f32 %v951_v55, %v892_v6  ;;  %v1421_v9 = vmul.f32 %v4707_v53, %v4709_v19  ;;  %v1158_v3 = vsel %vm492_vm0, %v1156_v23, %v1157_v35 }
 0x120   : > { %v2067_v43 = vrot.slane %v1931_v47, 7  ;;  %v2068_v15 = vrot.slane %v1932_v40, 7  ;;  %v1438_v30 = vrot.slane %v1420_v36, 2  ;;  %v1233_v8 = vmul.f32 %v3765_v37, %v3963_v7  ;;  %v4713_v7 = vld [vmem:[#allocation21_spill] sm:$0xff]  ;;  %v4714_v36 = vld [vmem:[#allocation27_spill] sm:$0xff] }
 0x121   : > { %v1036_v63 = vadd.f32 %v1026_v44, %v958_v32  ;;  %v1037_v56 = vadd.f32 %v1026_v44, %v959_v29  ;;  %v1439_v20 = vrot.slane %v1421_v9, 2  ;;  %v1582_v41 = vmul.f32 %v4157_v25, %v4710_v26  ;;  %v4716_v9 = vld [vmem:[#allocation39_spill] sm:$0xff] }
 0x122   : > { %v2069_v1 = vsel %vm2033_vm1, %v2067_v43, %v2068_v15  ;;  %v1702_v5 = vmul.f32 %v4157_v25, %v4711_v38  ;;  %v1703_v13 = vmul.f32 %v4711_v38, %v4712_v52  ;;  %v1308_v55 = vrot.slane %v1300_v59, 1  ;;  %v4717_v15 = vld [vmem:[#allocation18_spill] sm:$0xff] }
 0x123   : > { %2688 = vmatmul.mubr.f32.gmra.mrb[2].mxu1 %v2069_v1  ;;  %v1174_v18 = vadd.f32 %v1156_v23, %v1036_v63  ;;  %v1175_v48 = vadd.f32 %v1158_v3, %v1037_v56  ;;  %v1514_v10 = vmul.f32 %v4165_v60, %v4713_v7  ;;  %v1440_v35 = vsel %vm492_vm0, %v1438_v30, %v1439_v20  ;;  %v4715_v23 = vld [vmem:[#allocation40_spill] sm:$0xff] }
 0x124   : > { %v1515_v11 = vmul.f32 %v4157_v25, %v4713_v7  ;;  %v1720_v6 = vrot.slane %v1702_v5, 2  ;;  %v1721_v44 = vrot.slane %v1703_v13, 2  ;;  %v1797_v32 = vmul.f32 %v4714_v36, %v3998_v0  ;;  %v4718_v5 = vld [vmem:[#allocation17_spill] sm:$0xff] }
 0x125   : > { %v1240_v47 = vadd.f32 %v1232_v57, %v1174_v18  ;;  %v1241_v40 = vadd.f32 %v1233_v8, %v1175_v48  ;;  %v1985_v29 = vmul.f32 %v4715_v23, %v3924_v16  ;;  %v1590_v59 = vrot.slane %v1582_v41, 1 }
 0x126   : > { %v1722_v19 = vsel %vm492_vm0, %v1720_v6, %v1721_v44  ;;  %v1865_v43 = vmul.f32 %v4716_v9, %v3924_v16  ;;  %v1986_v3 = vmul.f32 %v4715_v23, %v4717_v15  ;;  %v386_v57 = vmul.f32 %v4116_v27, %v4703_v24 }
 0x127   : > { %v1318_v63 = vadd.f32 %v1308_v55, %v1240_v47  ;;  %v1319_v56 = vadd.f32 %v1308_v55, %v1241_v40  ;;  %v387_v8 = vmul.f32 %v4120_v49, %v4703_v24  ;;  %v2003_v20 = vrot.slane %v1985_v29, 2 }
 0x128   : > { %v453_v1 = vmul.f32 %v4120_v49, %v4704_v45  ;;  %v575_v41 = vmul.f32 %v4120_v49, %v4705_v46  ;;  %v576_v52 = vmul.f32 %v4705_v46, %v4718_v5  ;;  %v2004_v48 = vrot.slane %v1986_v3, 2 }
 0x129   : > { %v1456_v13 = vadd.f32 %v1438_v30, %v1318_v63  ;;  %v1457_v18 = vadd.f32 %v1440_v35, %v1319_v56  ;;  %v669_v55 = vmul.f32 %v3954_v31, %v4706_v42  ;;  %v670_v24 = vmul.f32 %v4706_v42, %v3928_v21  ;;  %v4719_v63 = vld [vmem:[#allocation24_spill] sm:$0xff] }
 0x12a   : > { %v461_v44 = vrot.slane %v453_v1, 1  ;;  %v594_v47 = vrot.slane %v575_v41, 2  ;;  %v595_v40 = vrot.slane %v576_v52, 2  ;;  %v736_v15 = vmul.f32 %v3728_v58, %v3928_v21 }
 0x12b   : > { %v1522_v29 = vadd.f32 %v1514_v10, %v1456_v13  ;;  %v1523_v45 = vadd.f32 %v1515_v11, %v1457_v18  ;;  %v857_v46 = vmul.f32 %v3731_v51, %v3928_v21  ;;  %v858_v31 = vmul.f32 %v3731_v51, %v4719_v63 }
 0x12c   : > { %v472_v30 = vadd.f32 %v461_v44, %v386_v57  ;;  %v473_v35 = vadd.f32 %v461_v44, %v387_v8  ;;  %v596_v3 = vsel %vm492_vm0, %v594_v47, %v595_v40  ;;  %v1798_v42 = vmul.f32 %v4714_v36, %v3924_v16 }
 0x12d   : > { %v1600_v56 = vadd.f32 %v1590_v59, %v1522_v29  ;;  %v1601_v1 = vadd.f32 %v1590_v59, %v1523_v45  ;;  %v876_v10 = vrot.slane %v857_v46, 2  ;;  %v744_v5 = vrot.slane %v736_v15, 1 }
 0x12e   : > { %v611_v11 = vadd.f32 %v594_v47, %v472_v30  ;;  %v612_v41 = vadd.f32 %v596_v3, %v473_v35  ;;  %v877_v58 = vrot.slane %v858_v31, 2  ;;  %v1873_v21 = vrot.slane %v1865_v43, 1 }
 0x12f   : > { %v1738_v52 = vadd.f32 %v1720_v6, %v1600_v56  ;;  %v1739_v13 = vadd.f32 %v1722_v19, %v1601_v1  ;;  %v2005_v57 = vsel %vm492_vm0, %v2003_v20, %v2004_v48  ;;  %v1019_v51 = vmul.f32 %v3752_v12, %v4044_v28 }
 0x130   : > { %v677_v8 = vadd.f32 %v669_v55, %v611_v11  ;;  %v678_v18 = vadd.f32 %v670_v24, %v612_v41  ;;  %v1140_v59 = vmul.f32 %v3762_v50, %v4044_v28  ;;  %v878_v47 = vsel %vm492_vm0, %v876_v10, %v877_v58 }
 0x131   : > { %v1805_v44 = vadd.f32 %v1797_v32, %v1738_v52  ;;  %v1806_v40 = vadd.f32 %v1798_v42, %v1739_v13  ;;  %v1141_v29 = vmul.f32 %v3762_v50, %v4046_v14  ;;  %v952_v43 = vmul.f32 %v3741_v22, %v4039_v2 }
 0x132   : > { %v755_v6 = vadd.f32 %v744_v5, %v677_v8  ;;  %v756_v19 = vadd.f32 %v744_v5, %v678_v18  ;;  %v953_v48 = vmul.f32 %v3741_v22, %v4044_v28  ;;  %v1159_v24 = vrot.slane %v1140_v59, 2 }
 0x133   : > { %v1883_v55 = vadd.f32 %v1873_v21, %v1805_v44  ;;  %v1884_v12 = vadd.f32 %v1873_v21, %v1806_v40  ;;  %v1160_v45 = vrot.slane %v1141_v29, 2  ;;  %v1027_v46 = vrot.slane %v1019_v51, 1 }
 0x134   : > { %v893_v15 = vadd.f32 %v876_v10, %v755_v6  ;;  %v894_v32 = vadd.f32 %v878_v47, %v756_v19  ;;  %v1422_v50 = vmul.f32 %v4157_v25, %v4707_v53  ;;  %v1423_v14 = vmul.f32 %v4707_v53, %v4060_v34 }
 0x135   : > { %v2021_v30 = vadd.f32 %v2003_v20, %v1883_v55  ;;  %v2022_v35 = vadd.f32 %v2005_v57, %v1884_v12  ;;  %v1301_v22 = vmul.f32 %v4157_v25, %v4708_v54  ;;  %v1161_v31 = vsel %vm492_vm0, %v1159_v24, %v1160_v45 }
 0x136   : > { %v960_v3 = vadd.f32 %v952_v43, %v893_v15  ;;  %v961_v2 = vadd.f32 %v953_v48, %v894_v32  ;;  %v1234_v20 = vmul.f32 %v4165_v60, %v3765_v37  ;;  %v1235_v42 = vmul.f32 %v4157_v25, %v3765_v37 }
 0x137   : > { %v2193_v28 = vrot.slane %v2021_v30, 7  ;;  %v2194_v63 = vrot.slane %v2022_v35, 7  ;;  %v1441_v34 = vrot.slane %v1422_v50, 2  ;;  %v1442_v53 = vrot.slane %v1423_v14, 2 }
 0x138   : > { %v1038_v56 = vadd.f32 %v1027_v46, %v960_v3  ;;  %v1039_v1 = vadd.f32 %v1027_v46, %v961_v2  ;;  %v1309_v54 = vrot.slane %v1301_v22, 1  ;;  %v1704_v5 = vmul.f32 %v4711_v38, %v3924_v16  ;;  %v2894_v3 = vld [vmem:[#allocation2 + $0x20] sm:$0xff] }
 0x139   : > { %v2195_v10 = vsel %vm2033_vm1, %v2193_v28, %v2194_v63  ;;  %v1705_v58 = vmul.f32 %v4711_v38, %v4070_v17  ;;  %v1583_v21 = vmul.f32 %v4710_v26, %v3924_v16  ;;  %v1443_v37 = vsel %vm492_vm0, %v1441_v34, %v1442_v53  ;;  %v2895_v63 = vld [vmem:[#allocation2 + $0x28] sm:$0x1] }
 0x13a   : > { %2725 = vmatprep.mubr.f32.mxu0 %v2195_v10  ;;  %v1176_v11 = vadd.f32 %v1159_v24, %v1038_v56  ;;  %v1177_v41 = vadd.f32 %v1161_v31, %v1039_v1  ;;  %v1516_v18 = vmul.f32 %v3998_v0, %v4713_v7  ;;  %v1517_v51 = vmul.f32 %v4713_v7, %v3924_v16  ;;  %v2896_v56 = vld [vmem:[#allocation2 + $0x8] sm:$0xff] }
 0x13b   : > { %v1723_v59 = vrot.slane %v1704_v5, 2  ;;  %v1724_v44 = vrot.slane %v1705_v58, 2  ;;  %v1591_v17 = vrot.slane %v1583_v21, 1  ;;  %v1987_v38 = vmul.f32 %v4715_v23, %v4086_v33  ;;  %v2899_v58 = vld [vmem:[#allocation2] sm:$0xff] }
 0x13c   : > { %v1242_v52 = vadd.f32 %v1234_v20, %v1176_v11  ;;  %v1243_v13 = vadd.f32 %v1235_v42, %v1177_v41  ;;  %v1988_v26 = vmul.f32 %v4715_v23, %v4088_v62  ;;  %v1866_v19 = vmul.f32 %v4716_v9, %v4086_v33  ;;  %v2897_v42 = vld [vmem:[#allocation2 + $0x10] sm:$0x1] }
 0x13d   : > { %v1725_v0 = vsel %vm492_vm0, %v1723_v59, %v1724_v44  ;;  %v1799_v7 = vmul.f32 %v4714_v36, %v4081_v4  ;;  %v1800_v48 = vmul.f32 %v4714_v36, %v4086_v33  ;;  %v2006_v55 = vrot.slane %v1987_v38, 2 }
 0x13e   : > { %v1320_v57 = vadd.f32 %v1309_v54, %v1242_v52  ;;  %v1321_v8 = vadd.f32 %v1309_v54, %v1243_v13  ;;  %v2007_v12 = vrot.slane %v1988_v26, 2  ;;  %v1874_v62 = vrot.slane %v1866_v19, 1 }
 0x13f   : > { %v4252_v33 = vstv %s2527_s16  ;;  %v4254_v36 = vstv %s2530_s28  ;;  %v4257_v22 = vstv %s2524_s7  ;;  %s2569_s16 = sld [smem:[#allocation10 + $0x2e]]  ;;  %s2572_s28 = sld [smem:[#allocation10 + $0x31]] }
 0x140   : > { %v1458_v40 = vadd.f32 %v1441_v34, %v1320_v57  ;;  %v1459_v47 = vadd.f32 %v1443_v37, %v1321_v8  ;;  %v2008_v32 = vsel %vm492_vm0, %v2006_v55, %v2007_v12  ;;  %v425_v2 = vmul.f32 %v2894_v3, %v4252_v33  ;;  %v2898_v34 = vld [vmem:[#allocation2 + $0x18] sm:$0xff]  ;;  %s2575_s7 = sld [smem:[#allocation10 + $0x34]] }
 0x141   : > { %v525_v28 = vmul.f32 %v2894_v3, %v4254_v36  ;;  %v526_v31 = vmul.f32 %v2895_v63, %v4254_v36  ;;  %v424_v1 = vmul.f32 %v2896_v56, %v4252_v33  ;;  %v523_v20 = vmul.f32 %v2896_v56, %v4254_v36 }
 0x142   : > { %v1524_v29 = vadd.f32 %v1516_v18, %v1458_v40  ;;  %v1525_v6 = vadd.f32 %v1517_v51, %v1459_v47  ;;  %v524_v10 = vmul.f32 %v2897_v42, %v4254_v36  ;;  %v364_v53 = vmul.f32 %v2898_v34, %v4257_v22 }
 0x143   : > { %v433_v11 = vrot.slane %v425_v2, 1  ;;  %v365_v41 = vmul.f32 %v2894_v3, %v4257_v22  ;;  %v542_v54 = vrot.slane %v525_v28, 2  ;;  %v543_v5 = vrot.slane %v526_v31, 2 }
 0x144   : > { %v1602_v43 = vadd.f32 %v1591_v17, %v1524_v29  ;;  %v1603_v16 = vadd.f32 %v1591_v17, %v1525_v6  ;;  %v362_v52 = vmul.f32 %v2899_v58, %v4257_v22  ;;  %v363_v13 = vmul.f32 %v2896_v56, %v4257_v22  ;;  %v2900_v6 = vld [vmem:[#allocation2 + $0x38] sm:$0xff] }
 0x145   : > { %v432_v21 = vrot.slane %v424_v1, 1  ;;  %v539_v37 = vrot.slane %v523_v20, 2  ;;  %v540_v57 = vrot.slane %v524_v10, 2  ;;  %v442_v8 = vadd.f32 %v433_v11, %v364_v53 }
 0x146   : > { %v1740_v24 = vadd.f32 %v1723_v59, %v1602_v43  ;;  %v1741_v45 = vadd.f32 %v1725_v0, %v1603_v16  ;;  %v443_v18 = vadd.f32 %v433_v11, %v365_v41  ;;  %v4268_v51 = vstv %s2533_s29  ;;  %s2309_s29 = sld [smem:[#allocation3]] }
 0x147   : > { %v4270_v59 = vstv %s2536_s6  ;;  %v544_v44 = vsel %vm492_vm0, %v542_v54, %v543_v5  ;;  %v4273_v40 = vstv %s2539_s8  ;;  %v440_v47 = vadd.f32 %v432_v21, %v362_v52  ;;  %s4437_s6 = scalar_lea.vmem [#allocation11], %s2508_s25  ;;  %s2611_s25 = sshll.u32 %s3147_s3, 11 }
 0x148   : > { %v1807_v23 = vadd.f32 %v1799_v7, %v1740_v24  ;;  %v1808_v15 = vadd.f32 %v1800_v48, %v1741_v45  ;;  %v441_v17 = vadd.f32 %v432_v21, %v363_v13  ;;  %v541_v38 = vsel %vm492_vm0, %v539_v37, %v540_v57  ;;  %v2901_v7 = vld [vmem:[#allocation2 + $0x40] sm:$0x1]  ;;  %v2903_v13 = vld [vmem:[#allocation2 + $0x58] sm:$0x1]  ;;  %s2404_s8 = sshll.u32 %s4437_s6, 4  ;;  %s4515_s8 = int_to_ptr.vmem [resolvable:$true] %s2404_s8 }
 0x149   : > { %v561_v26 = vadd.f32 %v542_v54, %v442_v8  ;;  %v647_v29 = vmul.f32 %v4104_v39, %v4268_v51  ;;  %v648_v19 = vmul.f32 %v2900_v6, %v4268_v51  ;;  %v708_v0 = vmul.f32 %v2900_v6, %v4270_v59 }
 0x14a   : > { %v1885_v9 = vadd.f32 %v1874_v62, %v1807_v23  ;;  %v1886_v46 = vadd.f32 %v1874_v62, %v1808_v15  ;;  %v562_v43 = vadd.f32 %v544_v44, %v443_v18  ;;  %v807_v16 = vmul.f32 %v2900_v6, %v4273_v40  ;;  %v2902_v15 = vld [vmem:[#allocation2 + $0x28] sm:$0x1] }
 0x14b   : > { %v808_v48 = vmul.f32 %v2901_v7, %v4273_v40  ;;  %v559_v12 = vadd.f32 %v539_v37, %v440_v47  ;;  %v560_v24 = vadd.f32 %v541_v38, %v441_v17  ;;  %v646_v45 = vmul.f32 %v2894_v3, %v4268_v51  ;;  %v2904_v17 = vld [vmem:[#allocation2 + $0x40] sm:$0x1] }
 0x14c   : > { %v2023_v30 = vadd.f32 %v2006_v55, %v1885_v9  ;;  %v2024_v35 = vadd.f32 %v2008_v32, %v1886_v46  ;;  %v645_v55 = vmul.f32 %v2898_v34, %v4268_v51  ;;  %v707_v62 = vmul.f32 %v2894_v3, %v4270_v59 }
 0x14d   : > { %v805_v23 = vmul.f32 %v2894_v3, %v4273_v40  ;;  %v806_v32 = vmul.f32 %v2902_v15, %v4273_v40  ;;  %v655_v9 = vadd.f32 %v647_v29, %v561_v26  ;;  %v716_v46 = vrot.slane %v708_v0, 1 }
 0x14e   : > { %v2196_v50 = vrot.slane %v2023_v30, 7  ;;  %v2197_v14 = vrot.slane %v2024_v35, 7  ;;  %v656_v30 = vadd.f32 %v648_v19, %v562_v43  ;;  %v824_v35 = vrot.slane %v807_v16, 2 }
 0x14f   : > { %v715_v2 = vrot.slane %v707_v62, 1  ;;  %v821_v28 = vrot.slane %v805_v23, 2  ;;  %v822_v63 = vrot.slane %v806_v32, 2  ;;  %v725_v31 = vadd.f32 %v716_v46, %v655_v9 }
 0x150   : > { %v2198_v4 = vsel %vm2033_vm1, %v2196_v50, %v2197_v14  ;;  %v825_v50 = vrot.slane %v808_v48, 2  ;;  %v653_v14 = vadd.f32 %v645_v55, %v559_v12  ;;  %v726_v56 = vadd.f32 %v716_v46, %v656_v30 }
 0x151   : > { %2726 = vmatmul.mubr.f32.gmra.mrb[2].mxu0 %v2198_v4  ;;  %v654_v4 = vadd.f32 %v646_v45, %v560_v24  ;;  %v4287_v1 = vstv %s2542_s9  ;;  %v4289_v20 = vstv %s2545_s11  ;;  %v4292_v42 = vstv %s2548_s27  ;;  %s4513_s11 = scalar_lea.hbm %s4571_s4, %s2611_s25  ;;  %s3013_s27 = scalar_lea.vmem %s4515_s8, 2048 }
 0x152   : > { %v826_v3 = vsel %vm492_vm0, %v824_v35, %v825_v50  ;;  %v723_v10 = vadd.f32 %v715_v2, %v653_v14  ;;  %v823_v53 = vsel %vm492_vm0, %v821_v28, %v822_v63  ;;  %v843_v11 = vadd.f32 %v824_v35, %v725_v31  ;;  %v2905_v35 = vld [vmem:[#allocation2 + $0xa8] sm:$0xff]  ;;  %v2906_v14 = vld [vmem:[#allocation2 + $0xb0] sm:$0xff]  ;;  %p3014_p9 = scmp.ne.s32.totalorder %s4515_s8, %s3013_s27 }
 0x153   : > { %v724_v34 = vadd.f32 %v715_v2, %v654_v4  ;;  %v930_v41 = vmul.f32 %v4116_v27, %v4287_v1  ;;  %v931_v54 = vmul.f32 %v4120_v49, %v4287_v1  ;;  %v991_v5 = vmul.f32 %v4120_v49, %v4289_v20 }
 0x154   : > { %v844_v58 = vadd.f32 %v826_v3, %v726_v56  ;;  %v1090_v52 = vmul.f32 %v4120_v49, %v4292_v42  ;;  %v1091_v21 = vmul.f32 %v2903_v13, %v4292_v42  ;;  %v928_v37 = vmul.f32 %v4104_v39, %v4287_v1  ;;  %v2907_v56 = vld [vmem:[#allocation2 + $0xb8] sm:$0x1]  ;;  %v2910_v13 = vld [vmem:[#allocation2 + $0xa0] sm:$0x1]  ;;  %p3015_p10 = pnand %p3014_p9, %p3230_p7 }
 0x155   : > { %v841_v57 = vadd.f32 %v821_v28, %v723_v10  ;;  %v842_v8 = vadd.f32 %v823_v53, %v724_v34  ;;  %v929_v18 = vmul.f32 %v2900_v6, %v4287_v1  ;;  %v990_v44 = vmul.f32 %v2900_v6, %v4289_v20  ;;  %v2908_v10 = vld [vmem:[#allocation2 + $0x90] sm:$0xff] }
 0x156   : > { %v1088_v47 = vmul.f32 %v2900_v6, %v4292_v42  ;;  %v1089_v38 = vmul.f32 %v2904_v17, %v4292_v42  ;;  %v938_v26 = vadd.f32 %v930_v41, %v843_v11  ;;  %v999_v29 = vrot.slane %v991_v5, 1  ;;  %p3016_p1 = pneg %p3015_p10 }
 0x157   : > { %v939_v19 = vadd.f32 %v931_v54, %v844_v58  ;;  %v1107_v0 = vrot.slane %v1090_v52, 2  ;;  %v1108_v43 = vrot.slane %v1091_v21, 2  ;;  %v936_v16 = vadd.f32 %v928_v37, %v841_v57  ;;  %v2909_v54 = vld [vmem:[#allocation2 + $0x98] sm:$0xff] }
 0x158   : > { %v937_v7 = vadd.f32 %v929_v18, %v842_v8  ;;  %v998_v48 = vrot.slane %v990_v44, 1  ;;  %v1104_v55 = vrot.slane %v1088_v47, 2  ;;  %v1105_v12 = vrot.slane %v1089_v38, 2 }
 0x159   : > { %v1008_v24 = vadd.f32 %v999_v29, %v938_v26  ;;  %v1009_v45 = vadd.f32 %v999_v29, %v939_v19  ;;  %v4310_v62 = vstv %s2551_s24  ;;  %v4312_v23 = vstv %s2554_s22  ;;  %s3095_s24 = smov [#allocation11]  }
 0x15a   : > { %v1109_v6 = vsel %vm492_vm0, %v1107_v0, %v1108_v43  ;;  %v4315_v15 = vstv %s2557_s13  ;;  %v1006_v32 = vadd.f32 %v998_v48, %v936_v16  ;;  %v1007_v9 = vadd.f32 %v998_v48, %v937_v7  ;;  %s3017_s22 = sshll.u32 %s3095_s24, 4  ;;  %s3018_s22 = int_to_ptr.vmem [resolvable:$false] %s3017_s22 }
 0x15b   : > { %v1106_v46 = vsel %vm492_vm0, %v1104_v55, %v1105_v12  ;;  %v1126_v30 = vadd.f32 %v1107_v0, %v1008_v24  ;;  %v1212_v50 = vmul.f32 %v2905_v35, %v4310_v62  ;;  %v1213_v4 = vmul.f32 %v2906_v14, %v4310_v62  ;;  %s3019_s13 = scalar_lea.vmem %s3018_s22, 4096  ;;  %p3020_p4 = scmp.lt.s32.totalorder %s4515_s8, %s3018_s22 }
 0x15c   : > { %v1273_v2 = vmul.f32 %v2906_v14, %v4312_v23  ;;  %v1127_v63 = vadd.f32 %v1109_v6, %v1009_v45  ;;  %v1372_v31 = vmul.f32 %v2906_v14, %v4315_v15  ;;  %v1373_v3 = vmul.f32 %v2907_v56, %v4315_v15  ;;  %v2911_v6 = vld [vmem:[#allocation2 + $0xc8] sm:$0xff]  ;;  %p3021_p8 = scmp.lt.s32.totalorder %s3019_s13, %s3013_s27 }
 0x15d   : > { %v1210_v34 = vmul.f32 %v2908_v10, %v4310_v62  ;;  %v1124_v11 = vadd.f32 %v1104_v55, %v1006_v32  ;;  %v1125_v41 = vadd.f32 %v1106_v46, %v1007_v9  ;;  %v1211_v5 = vmul.f32 %v2909_v54, %v4310_v62 }
 0x15e   : > { %v1272_v58 = vmul.f32 %v2909_v54, %v4312_v23  ;;  %v1370_v52 = vmul.f32 %v2909_v54, %v4315_v15  ;;  %v1371_v21 = vmul.f32 %v2910_v13, %v4315_v15  ;;  %v1220_v37 = vadd.f32 %v1212_v50, %v1126_v30  ;;  %p3022_p12 = por %p3021_p8, %p3020_p4 }
 0x15f   : > { %v1221_v57 = vadd.f32 %v1213_v4, %v1127_v63  ;;  %v1281_v8 = vrot.slane %v1273_v2, 1  ;;  %v1389_v18 = vrot.slane %v1372_v31, 2  ;;  %v1390_v44 = vrot.slane %v1373_v3, 2  ;;  %v2912_v4 = vld [vmem:[#allocation2 + $0xd0] sm:$0x1] }
 0x160   : > { %v1218_v47 = vadd.f32 %v1210_v34, %v1124_v11  ;;  %v1219_v17 = vadd.f32 %v1211_v5, %v1125_v41  ;;  %v1280_v38 = vrot.slane %v1272_v58, 1  ;;  %v1386_v26 = vrot.slane %v1370_v52, 2  ;;  %v2913_v11 = vld [vmem:[#allocation2 + $0xb8] sm:$0x1]  ;;  %p3023_p13 = pnand %p3022_p12, %p3016_p1 }
 0x161   : > { %v1387_v29 = vrot.slane %v1371_v21, 2  ;;  %v4332_v19 = vstv %s2560_s14  ;;  %v1290_v0 = vadd.f32 %v1281_v8, %v1220_v37  ;;  %v1291_v43 = vadd.f32 %v1281_v8, %v1221_v57 }
 0x162   : > { %v4334_v16 = vstv %s2563_s10  ;;  %v4336_v7 = vstv %s2566_s12  ;;  %v1391_v48 = vsel %vm492_vm0, %v1389_v18, %v1390_v44  ;;  %v1288_v55 = vadd.f32 %v1280_v38, %v1218_v47 }
 0x163   : > { %v1289_v12 = vadd.f32 %v1280_v38, %v1219_v17  ;;  %v1388_v24 = vsel %vm492_vm0, %v1386_v26, %v1387_v29  ;;  %v1494_v45 = vmul.f32 %v4143_v61, %v4332_v19  ;;  %v1495_v32 = vmul.f32 %v2911_v6, %v4332_v19 }
 0x164   : > { %v1555_v9 = vmul.f32 %v2911_v6, %v4334_v16  ;;  %v1654_v46 = vmul.f32 %v2911_v6, %v4336_v7  ;;  %v1408_v30 = vadd.f32 %v1389_v18, %v1290_v0  ;;  %v1409_v50 = vadd.f32 %v1391_v48, %v1291_v43 }
 0x165   : > { %v1655_v2 = vmul.f32 %v2912_v4, %v4336_v7  ;;  %v1492_v63 = vmul.f32 %v2905_v35, %v4332_v19  ;;  %v1406_v31 = vadd.f32 %v1386_v26, %v1288_v55  ;;  %v1407_v56 = vadd.f32 %v1388_v24, %v1289_v12 }
 0x166   : > { %v1493_v3 = vmul.f32 %v2906_v14, %v4332_v19  ;;  %v1554_v10 = vmul.f32 %v2906_v14, %v4334_v16  ;;  %v1652_v34 = vmul.f32 %v2906_v14, %v4336_v7  ;;  %v1653_v41 = vmul.f32 %v2913_v11, %v4336_v7 }
 0x167   : > { %v1502_v54 = vadd.f32 %v1494_v45, %v1408_v30  ;;  %v1503_v5 = vadd.f32 %v1495_v32, %v1409_v50  ;;  %v1563_v58 = vrot.slane %v1555_v9, 1  ;;  %v1671_v52 = vrot.slane %v1654_v46, 2  ;;  %v2914_v32 = vld [vmem:[#allocation2 + $0xe8] sm:$0x1] }
 0x168   : > { %v1672_v13 = vrot.slane %v1655_v2, 2  ;;  %v1500_v21 = vadd.f32 %v1492_v63, %v1406_v31  ;;  %v1501_v37 = vadd.f32 %v1493_v3, %v1407_v56  ;;  %v1562_v57 = vrot.slane %v1554_v10, 1  ;;  %v2915_v31 = vld [vmem:[#allocation2 + $0xd0] sm:$0x1] }
 0x169   : > { %v1668_v35 = vrot.slane %v1652_v34, 2  ;;  %v1669_v8 = vrot.slane %v1653_v41, 2  ;;  %v4351_v18 = vstv %s2569_s16  ;;  %v1572_v44 = vadd.f32 %v1563_v58, %v1502_v54 }
 0x16a   : > { %v1573_v47 = vadd.f32 %v1563_v58, %v1503_v5  ;;  %v4353_v17 = vstv %s2572_s28  ;;  %v4355_v14 = vstv %s2575_s7  ;;  %v1673_v38 = vsel %vm492_vm0, %v1671_v52, %v1672_v13 }
 0x16b   : > { %v1570_v26 = vadd.f32 %v1562_v57, %v1500_v21  ;;  %v1571_v29 = vadd.f32 %v1562_v57, %v1501_v37  ;;  %v1670_v0 = vsel %vm492_vm0, %v1668_v35, %v1669_v8  ;;  %v1777_v43 = vmul.f32 %v4165_v60, %v4351_v18 }
 0x16c   : > { %v1778_v48 = vmul.f32 %v4157_v25, %v4351_v18  ;;  %v1838_v55 = vmul.f32 %v4157_v25, %v4353_v17  ;;  %v1937_v12 = vmul.f32 %v4157_v25, %v4355_v14  ;;  %v1690_v24 = vadd.f32 %v1671_v52, %v1572_v44 }
 0x16d   : > { %v1691_v45 = vadd.f32 %v1673_v38, %v1573_v47  ;;  %v1938_v9 = vmul.f32 %v2914_v32, %v4355_v14  ;;  %v1775_v46 = vmul.f32 %v4143_v61, %v4351_v18  ;;  %v1688_v30 = vadd.f32 %v1668_v35, %v1570_v26 }
 0x16e   : > { %v1689_v50 = vadd.f32 %v1670_v0, %v1571_v29  ;;  %v1776_v4 = vmul.f32 %v2911_v6, %v4351_v18  ;;  %v1837_v2 = vmul.f32 %v2911_v6, %v4353_v17  ;;  %v1935_v63 = vmul.f32 %v2911_v6, %v4355_v14 }
 0x16f   : > { %v1936_v56 = vmul.f32 %v2915_v31, %v4355_v14  ;;  %v1785_v3 = vadd.f32 %v1777_v43, %v1690_v24  ;;  %v1786_v10 = vadd.f32 %v1778_v48, %v1691_v45  ;;  %v1846_v34 = vrot.slane %v1838_v55, 1 }
 0x170   : > { %v1954_v11 = vrot.slane %v1937_v12, 2  ;;  %v1955_v41 = vrot.slane %v1938_v9, 2  ;;  %v1783_v54 = vadd.f32 %v1775_v46, %v1688_v30  ;;  %v1784_v5 = vadd.f32 %v1776_v4, %v1689_v50 }
 0x171   : > { %v1845_v58 = vrot.slane %v1837_v2, 1  ;;  %v1951_v52 = vrot.slane %v1935_v63, 2  ;;  %v1952_v13 = vrot.slane %v1936_v56, 2  ;;  %v1855_v21 = vadd.f32 %v1846_v34, %v1785_v3  ;;  %v2916_v3 = vld [vmem:[#allocation2 + $0x58] sm:$0x1] }
 0x172   : > { %v1856_v37 = vadd.f32 %v1846_v34, %v1786_v10  ;;  %v1956_v57 = vsel %vm492_vm0, %v1954_v11, %v1955_v41  ;;  %v4380_v9 = vstv %s2309_s29  ;;  %v427_v63 = vmul.f32 %v4120_v49, %v4252_v33  ;;  %v2917_v10 = vld [vmem:[#allocation2 + $0x38] sm:$0xff]  ;;  %v2918_v41 = vld [vmem:[#allocation2 + $0x40] sm:$0x1] }
 0x173   : > { %v1853_v35 = vadd.f32 %v1845_v58, %v1783_v54  ;;  %v1854_v8 = vadd.f32 %v1845_v58, %v1784_v5  ;;  %v1953_v6 = vsel %vm492_vm0, %v1951_v52, %v1952_v13  ;;  %v1973_v44 = vadd.f32 %v1954_v11, %v1855_v21 }
 0x174   : > { %v1974_v47 = vadd.f32 %v1956_v57, %v1856_v37  ;;  %v529_v56 = vmul.f32 %v4120_v49, %v4254_v36  ;;  %v426_v34 = vmul.f32 %v2917_v10, %v4252_v33  ;;  %v527_v11 = vmul.f32 %v2917_v10, %v4254_v36 }
 0x175   : > { %v1971_v38 = vadd.f32 %v1951_v52, %v1853_v35  ;;  %v1972_v26 = vadd.f32 %v1953_v6, %v1854_v8  ;;  %v2037_v29 = vrot.slane %v1973_v44, 7  ;;  %v528_v54 = vmul.f32 %v2918_v41, %v4254_v36 }
 0x176   : > { %v2038_v0 = vrot.slane %v1974_v47, 7  ;;  %v368_v5 = vmul.f32 %v4116_v27, %v4257_v22  ;;  %v435_v58 = vrot.slane %v427_v63, 1  ;;  %v369_v52 = vmul.f32 %v4120_v49, %v4257_v22 }
 0x177   : > { %v2034_v43 = vrot.slane %v1971_v38, 7  ;;  %v2035_v48 = vrot.slane %v1972_v26, 7  ;;  %v548_v13 = vrot.slane %v529_v56, 2  ;;  %v366_v37 = vmul.f32 %v4104_v39, %v4257_v22  ;;  %v2919_v26 = vld [vmem:[#allocation2 + $0x60] sm:$0xff] }
 0x178   : > { %v2039_v55 = vsel %vm2033_vm1, %v2037_v29, %v2038_v0  ;;  %v367_v33 = vmul.f32 %v2917_v10, %v4257_v22  ;;  %v434_v57 = vrot.slane %v426_v34, 1  ;;  %v545_v35 = vrot.slane %v527_v11, 2 }
 0x179   : > { %v2036_v12 = vsel %vm2033_vm1, %v2034_v43, %v2035_v48  ;;  %v546_v8 = vrot.slane %v528_v54, 2  ;;  %v446_v6 = vadd.f32 %v435_v58, %v368_v5  ;;  %v651_v29 = vmul.f32 %v2919_v26, %v4268_v51  ;;  %v2920_v48 = vld [vmem:[#allocation2 + $0x68] sm:$0xff] }
 0x17a   : > { %v444_v47 = vadd.f32 %v434_v57, %v366_v37  ;;  %v445_v38 = vadd.f32 %v434_v57, %v367_v33  ;;  %v652_v39 = vmul.f32 %v2920_v48, %v4268_v51  ;;  %v710_v22 = vmul.f32 %v2920_v48, %v4270_v59  ;;  %v2340_v37 = vld [vmem:[%s3291_s15 + $0x8] sm:$0xff]  ;;  %v2923_v57 = vld [vmem:[#allocation2 + $0x78] sm:$0xff] }
 0x17b   : > { %v547_v0 = vsel %vm492_vm0, %v545_v35, %v546_v8  ;;  %v565_v43 = vadd.f32 %v548_v13, %v446_v6  ;;  %v2582_v33 = vld [vmem:[%s3291_s15 + $0x28] sm:$0xff]  ;;  %v2924_v8 = vld [vmem:[#allocation2 + $0x80] sm:$0xff] }
 0x17c   : > { %v564_v63 = vadd.f32 %v547_v0, %v445_v38  ;;  %v935_v6 = vmul.f32 %v2924_v8, %v4287_v1  ;;  %v2339_v38 = vld [vmem:[%s3291_s15] sm:$0xff]  ;;  %v993_v0 = vmul.f32 %v2924_v8, %v4289_v20 }
 0x17d   : > { %v659_v10 = vadd.f32 %v651_v29, %v565_v43  ;;  %v1094_v43 = vmul.f32 %v2924_v8, %v4292_v42  ;;  %v1275_v8 = vmul.f32 %v4157_v25, %v4312_v23 }
 0x196   : > { %v4321_v28 = vpop.f32.mrb[0].mxu1 }
 0x197   : > { %v4326_v53 = vpop.f32.mrb[1].mxu1  ;;  %v2176_v24 = vadd.f32 %v4321_v28, %v2039_v55  ;;  %v811_v55 = vmul.f32 %v2920_v48, %v4273_v40 }
 0x198   : > { %v2175_v45 = vadd.f32 %v4326_v53, %v2036_v12  ;;  %v530_v53 = vmul.f32 %v2916_v3, %v4254_v36  ;;  %v447_v36 = vadd.f32 %v435_v58, %v369_v52  ;;  %v2922_v3 = vld [vmem:[#allocation2 + $0x58] sm:$0x1] }
 0x199   : > { %v830_v34 = vrot.slane %v811_v55, 2  ;;  %v2581_v55 = vld [vmem:[%s3291_s15 + $0x20] sm:$0xff] }
 0x19a   : > { %v549_v21 = vrot.slane %v530_v53, 2  ;;  %v810_v53 = vmul.f32 %v2922_v3, %v4273_v40 }
 0x19c   : > { %v550_v44 = vsel %vm492_vm0, %v548_v13, %v549_v21 }
 0x1c8   : > { %v2724_v32 = vpop.f32.mrb[0].mxu0 }
 0x1c9   : > { %v2306_v46 = vadd.f32 %v2724_v32, %v2176_v24  ;;  %v2286_v30 = vpop.f32.mrb[1].mxu0  ;;  %v566_v24 = vadd.f32 %v550_v44, %v447_v36  ;;  %v2590_v44 = vld [vmem:[%s3291_s15 + $0x48] sm:$0xff] }
 0x1ca   : > { %v2305_v50 = vadd.f32 %v2286_v30, %v2175_v45  ;;  %v2921_v45 = vld [vmem:[#allocation2 + $0x70] sm:$0x1]  ;;  %v650_v30 = vmul.f32 %v4120_v49, %v4268_v51 }
 0x1cb   : > { %v2312_v4 = vadd.f32 %v4380_v9, %v2306_v46  ;;  %v812_v32 = vmul.f32 %v2921_v45, %v4273_v40  ;;  %v649_v46 = vmul.f32 %v4116_v27, %v4268_v51  ;;  %v718_v27 = vrot.slane %v710_v22, 1 }
 0x1cc   : > { %v2311_v2 = vadd.f32 %v4380_v9, %v2305_v50  ;;  %v660_v51 = vadd.f32 %v652_v39, %v566_v24  ;;  %v658_v54 = vadd.f32 %v650_v30, %v564_v63  ;;  %v2925_v39 = vld [vmem:[#allocation2 + $0x88] sm:$0x1]  ;;  %v2597_v24 = vld [vmem:[%s3291_s15 + $0x60] sm:$0xff]  ;;  %v992_v30 = vmul.f32 %v2920_v48, %v4289_v20 }
 0x1cd   : > { %v2578_v31 = vmul.f32 -1.442695, %v2312_v4  ;;  %v831_v11 = vrot.slane %v812_v32, 2  ;;  %v729_v58 = vadd.f32 %v718_v27, %v659_v10  ;;  %v1095_v22 = vmul.f32 %v2925_v39, %v4292_v42 }
 0x1ce   : > { %v2577_v28 = vmul.f32 -1.442695, %v2311_v2  ;;  %v563_v2 = vadd.f32 %v545_v35, %v444_v47  ;;  %v730_v52 = vadd.f32 %v718_v27, %v660_v51  ;;  %v934_v35 = vmul.f32 %v2923_v57, %v4287_v1  ;;  %v2598_v47 = vld [vmem:[%s3291_s15 + $0x68] sm:$0xff] }
 0x1cf   : > { %2872 = vpow2.f32 %v2578_v31  ;;  %v709_v31 = vmul.f32 %v4120_v49, %v4270_v59  ;;  %v847_v29 = vadd.f32 %v830_v34, %v729_v58  ;;  %v932_v32 = vmul.f32 %v2919_v26, %v4287_v1 }
 0x1d0   : > { %2874 = vpow2.f32 %v2577_v28  ;;  %v809_v28 = vmul.f32 %v4120_v49, %v4273_v40  ;;  %v657_v41 = vadd.f32 %v649_v46, %v563_v2  ;;  %v828_v49 = vrot.slane %v810_v53, 2 }
 0x1d1   : > { %v717_v59 = vrot.slane %v709_v31, 1  ;;  %v832_v40 = vsel %vm492_vm0, %v830_v34, %v831_v11  ;;  %v933_v46 = vmul.f32 %v2920_v48, %v4287_v1  ;;  %v1092_v63 = vmul.f32 %v2920_v48, %v4292_v42  ;;  %v2926_v31 = vld [vmem:[#allocation2 + $0x70] sm:$0x1] }
 0x1d2   : > { %v827_v5 = vrot.slane %v809_v28, 2  ;;  %v848_v45 = vadd.f32 %v832_v40, %v730_v52  ;;  %v942_v20 = vadd.f32 %v934_v35, %v847_v29  ;;  %v1001_v48 = vrot.slane %v993_v0, 1 }
 0x1d3   : > { %v727_v13 = vadd.f32 %v717_v59, %v657_v41  ;;  %v728_v21 = vadd.f32 %v717_v59, %v658_v54  ;;  %v1113_v11 = vrot.slane %v1094_v43, 2  ;;  %v1114_v41 = vrot.slane %v1095_v22, 2 }
 0x1d4   : > { %v829_v36 = vsel %vm492_vm0, %v827_v5, %v828_v49  ;;  %v1110_v49 = vrot.slane %v1092_v63, 2  ;;  %v1012_v52 = vadd.f32 %v1001_v48, %v942_v20  ;;  %v1216_v57 = vmul.f32 %v4165_v60, %v4310_v62  ;;  %v2928_v60 = vld [vmem:[#allocation2 + $0xc8] sm:$0xff] }
 0x1d5   : > { %v846_v2 = vadd.f32 %v829_v36, %v728_v21  ;;  %v1217_v35 = vmul.f32 %v4157_v25, %v4310_v62  ;;  %v1214_v29 = vmul.f32 %v4143_v61, %v4310_v62  ;;  %v1215_v39 = vmul.f32 %v2928_v60, %v4310_v62 }
 0x1d6   : > { %v1130_v36 = vadd.f32 %v1113_v11, %v1012_v52  ;;  %v1274_v22 = vmul.f32 %v2928_v60, %v4312_v23 }
 0x1d7   : > { %v941_v59 = vadd.f32 %v933_v46, %v846_v2 }
 0x1d8   : > { %v1282_v2 = vrot.slane %v1274_v22, 1  ;;  %v2937_v22 = vld [vmem:[#allocation2 + $0x110] sm:$0xff] }
 0x1d9   : > { %v2873_v12 = vpop.eup %2872 }
 0x1da   : > { %v2875_v50 = vpop.eup %2874  ;;  %v2328_v4 = vadd.f32 1.0, %v2873_v12  ;;  %v2589_v12 = vld [vmem:[%s3291_s15 + $0x40] sm:$0xff] }
 0x1db   : > { %v2327_v56 = vadd.f32 1.0, %v2875_v50 }
 0x1dc   : > { %2876 = vrcp.f32 %v2328_v4  ;;  %v845_v4 = vadd.f32 %v827_v5, %v727_v13  ;;  %v1000_v5 = vrot.slane %v992_v30, 1  ;;  %v1115_v13 = vsel %vm492_vm0, %v1113_v11, %v1114_v41  ;;  %v2933_v41 = vld [vmem:[#allocation2 + $0xd8] sm:$0xff] }
 0x1dd   : > { %2878 = vrcp.f32 %v2327_v56  ;;  %v1093_v56 = vmul.f32 %v2926_v31, %v4292_v42  ;;  %v943_v42 = vadd.f32 %v935_v6, %v848_v45  ;;  %v1376_v6 = vmul.f32 %v4157_v25, %v4315_v15 }
 0x1de   : > { %v940_v54 = vadd.f32 %v932_v32, %v845_v4  ;;  %v1283_v32 = vrot.slane %v1275_v8, 1 }
 0x1df   : > { %v1111_v58 = vrot.slane %v1093_v56, 2  ;;  %v1013_v40 = vadd.f32 %v1001_v48, %v943_v42  ;;  %v1395_v46 = vrot.slane %v1376_v6, 2  ;;  %v2932_v48 = vld [vmem:[#allocation2 + $0x100] sm:$0x1] }
 0x1e0   : > { %v1010_v21 = vadd.f32 %v1000_v5, %v940_v54  ;;  %v1659_v11 = vmul.f32 %v2932_v48, %v4336_v7  ;;  %v1496_v54 = vmul.f32 %v2933_v41, %v4332_v19 }
 0x1e2   : > { %v1128_v0 = vadd.f32 %v1110_v49, %v1010_v21  ;;  %v1678_v8 = vrot.slane %v1659_v11, 2 }
 0x1e4   : > { %v1222_v61 = vadd.f32 %v1214_v29, %v1128_v0 }
 0x1e6   : > { %v2877_v50 = vpop.eup %2876 }
 0x1e7   : > { %v2879_v28 = vpop.eup %2878  ;;  %v2344_v3 = vmul.f32 %v2877_v50, %v2340_v37  ;;  %v2356_v53 = vmul.f32 %v2877_v50, %v2582_v33  ;;  %v2369_v10 = vmul.f32 %v2877_v50, %v2590_v44  ;;  %v2382_v27 = vmul.f32 %v2877_v50, %v2598_v47  ;;  %v2927_v47 = vld [vmem:[#allocation2 + $0xe8] sm:$0x1] }
 0x1e8   : > { %v2343_v51 = vmul.f32 %v2879_v28, %v2339_v38  ;;  %v2355_v26 = vmul.f32 %v2879_v28, %v2581_v55  ;;  %v2368_v34 = vmul.f32 %v2879_v28, %v2589_v12  ;;  %v2381_v1 = vmul.f32 %v2879_v28, %v2597_v24  ;;  %v2929_v12 = vld [vmem:[#allocation2 + $0xd0] sm:$0x1] }
 0x1e9   : > { %2348 = vst [vmem:[%s4437_s6 + $0x8] sm:$0xff] %v2344_v3  ;;  %2586 = vst [vmem:[%s4437_s6 + $0x28] sm:$0xff] %v2356_v53  ;;  %v1011_v37 = vadd.f32 %v1000_v5, %v941_v59  ;;  %v1112_v33 = vsel %vm492_vm0, %v1110_v49, %v1111_v58  ;;  %v1131_v44 = vadd.f32 %v1115_v13, %v1013_v40  ;;  %v2934_v49 = vld [vmem:[#allocation2 + $0xe0] sm:$0xff]  ;;  %v2935_v13 = vld [vmem:[#allocation2 + $0xe8] sm:$0x1] }
 0x1ea   : > { %2594 = vst [vmem:[%s4437_s6 + $0x48] sm:$0xff] %v2369_v10  ;;  %2602 = vst [vmem:[%s4437_s6 + $0x68] sm:$0xff] %v2382_v27  ;;  %v1377_v38 = vmul.f32 %v2927_v47, %v4315_v15  ;;  %v1374_v55 = vmul.f32 %v2928_v60, %v4315_v15  ;;  %v1375_v25 = vmul.f32 %v2929_v12, %v4315_v15  ;;  %v2930_v10 = vld [vmem:[#allocation2 + $0xf0] sm:$0xff] }
 0x1eb   : > { %2347 = vst [vmem:[%s4437_s6] sm:$0xff] %v2343_v51  ;;  %2585 = vst [vmem:[%s4437_s6 + $0x20] sm:$0xff] %v2355_v26  ;;  %v1129_v43 = vadd.f32 %v1112_v33, %v1011_v37  ;;  %v1224_v24 = vadd.f32 %v1216_v57, %v1130_v36  ;;  %v1225_v45 = vadd.f32 %v1217_v35, %v1131_v44  ;;  %v2931_v51 = vld [vmem:[#allocation2 + $0xf8] sm:$0xff] }
 0x1ec   : > { %2593 = vst [vmem:[%s4437_s6 + $0x40] sm:$0xff] %v2368_v34  ;;  %2601 = vst [vmem:[%s4437_s6 + $0x60] sm:$0xff] %v2381_v1  ;;  %v1396_v50 = vrot.slane %v1377_v38, 2  ;;  %v1392_v62 = vrot.slane %v1374_v55, 2  ;;  %v1393_v31 = vrot.slane %v1375_v25, 2  ;;  %v1292_v3 = vadd.f32 %v1282_v2, %v1222_v61 }
 0x1ed   : > { %v1223_v4 = vadd.f32 %v1215_v39, %v1129_v43  ;;  %v1294_v23 = vadd.f32 %v1283_v32, %v1224_v24  ;;  %v1295_v56 = vadd.f32 %v1283_v32, %v1225_v45  ;;  %v1498_v27 = vmul.f32 %v2930_v10, %v4332_v19  ;;  %v2936_v39 = vld [vmem:[#allocation2 + $0x108] sm:$0xff]  ;;  %v2938_v32 = vld [vmem:[#allocation2 + $0x118] sm:$0x1] }
 0x1ee   : > { %v1397_v28 = vsel %vm492_vm0, %v1395_v46, %v1396_v50  ;;  %v1394_v53 = vsel %vm492_vm0, %v1392_v62, %v1393_v31  ;;  %v1499_v26 = vmul.f32 %v2931_v51, %v4332_v19  ;;  %v1557_v34 = vmul.f32 %v2931_v51, %v4334_v16 }
 0x1ef   : > { %v1293_v15 = vadd.f32 %v1282_v2, %v1223_v4  ;;  %v1658_v1 = vmul.f32 %v2931_v51, %v4336_v7  ;;  %v1412_v20 = vadd.f32 %v1395_v46, %v1294_v23  ;;  %v1413_v42 = vadd.f32 %v1397_v28, %v1295_v56  ;;  %v2939_v23 = vld [vmem:[#allocation2 + $0x100] sm:$0x1] }
 0x1f0   : > { %v1410_v59 = vadd.f32 %v1392_v62, %v1292_v3  ;;  %v1497_v58 = vmul.f32 %v2934_v49, %v4332_v19  ;;  %v1556_v52 = vmul.f32 %v2934_v49, %v4334_v16  ;;  %v1656_v40 = vmul.f32 %v2934_v49, %v4336_v7 }
 0x1f1   : > { %v1411_v5 = vadd.f32 %v1394_v53, %v1293_v15  ;;  %v1657_v21 = vmul.f32 %v2935_v13, %v4336_v7  ;;  %v1506_v37 = vadd.f32 %v1498_v27, %v1412_v20  ;;  %v1507_v33 = vadd.f32 %v1499_v26, %v1413_v42 }
 0x1f2   : > { %v1565_v57 = vrot.slane %v1557_v34, 1  ;;  %v1677_v35 = vrot.slane %v1658_v1, 2  ;;  %v1504_v6 = vadd.f32 %v1496_v54, %v1410_v59  ;;  %v1564_v44 = vrot.slane %v1556_v52, 1 }
 0x1f3   : > { %v1505_v36 = vadd.f32 %v1497_v58, %v1411_v5  ;;  %v1674_v47 = vrot.slane %v1656_v40, 2  ;;  %v1675_v38 = vrot.slane %v1657_v21, 2  ;;  %v1781_v7 = vmul.f32 %v2936_v39, %v4351_v18  ;;  %v2591_v39 = vld [vmem:[%s3291_s15 + $0x50] sm:$0xff] }
 0x1f4   : > { %v1576_v29 = vadd.f32 %v1565_v57, %v1506_v37  ;;  %v1577_v0 = vadd.f32 %v1565_v57, %v1507_v33  ;;  %v1679_v19 = vsel %vm492_vm0, %v1677_v35, %v1678_v8  ;;  %v1574_v16 = vadd.f32 %v1564_v44, %v1504_v6 }
 0x1f5   : > { %v1575_v43 = vadd.f32 %v1564_v44, %v1505_v36  ;;  %v1676_v60 = vsel %vm492_vm0, %v1674_v47, %v1675_v38  ;;  %v1782_v55 = vmul.f32 %v2937_v22, %v4351_v18  ;;  %v1840_v12 = vmul.f32 %v2937_v22, %v4353_v17 }
 0x1f6   : > { %v4464_v30 = vpop.f32.mrb[2].mxu1  ;;  %v1941_v25 = vmul.f32 %v2937_v22, %v4355_v14  ;;  %v1694_v24 = vadd.f32 %v1677_v35, %v1576_v29  ;;  %v1695_v45 = vadd.f32 %v1679_v19, %v1577_v0  ;;  %v1942_v46 = vmul.f32 %v2938_v32, %v4355_v14  ;;  %v2342_v0 = vld [vmem:[%s3291_s15 + $0x18] sm:$0xff] }
 0x1f7   : > { %v4466_v63 = vpop.f32.mrb[3].mxu1  ;;  %v1779_v50 = vmul.f32 %v2930_v10, %v4351_v18  ;;  %v1692_v61 = vadd.f32 %v1674_v47, %v1574_v16  ;;  %v1693_v4 = vadd.f32 %v1676_v60, %v1575_v43  ;;  %v1780_v2 = vmul.f32 %v2931_v51, %v4351_v18  ;;  %v2584_v19 = vld [vmem:[%s3291_s15 + $0x38] sm:$0xff]  ;;  %v2583_v60 = vld [vmem:[%s3291_s15 + $0x30] sm:$0xff] }
 0x1f8   : > { %v1839_v62 = vmul.f32 %v2931_v51, %v4353_v17  ;;  %v1939_v31 = vmul.f32 %v2931_v51, %v4355_v14  ;;  %v1940_v56 = vmul.f32 %v2939_v23, %v4355_v14  ;;  %v1789_v28 = vadd.f32 %v1781_v7, %v1694_v24  ;;  %v2592_v16 = vld [vmem:[%s3291_s15 + $0x58] sm:$0xff]  ;;  %v2599_v7 = vld [vmem:[%s3291_s15 + $0x70] sm:$0xff] }
 0x1f9   : > { %v1790_v3 = vadd.f32 %v1782_v55, %v1695_v45  ;;  %v1848_v15 = vrot.slane %v1840_v12, 1  ;;  %v1960_v53 = vrot.slane %v1941_v25, 2  ;;  %v1961_v27 = vrot.slane %v1942_v46, 2  ;;  %v2600_v43 = vld [vmem:[%s3291_s15 + $0x78] sm:$0xff] }
 0x1fa   : > { %v1787_v26 = vadd.f32 %v1779_v50, %v1692_v61  ;;  %v1788_v34 = vadd.f32 %v1780_v2, %v1693_v4  ;;  %v1847_v1 = vrot.slane %v1839_v62, 1  ;;  %v1957_v10 = vrot.slane %v1939_v31, 2 }
 0x1fb   : > { %v1958_v20 = vrot.slane %v1940_v56, 2  ;;  %v1859_v42 = vadd.f32 %v1848_v15, %v1789_v28  ;;  %v1860_v48 = vadd.f32 %v1848_v15, %v1790_v3  ;;  %v1962_v18 = vsel %vm492_vm0, %v1960_v53, %v1961_v27 }
 0x1fc   : > { %v1857_v17 = vadd.f32 %v1847_v1, %v1787_v26  ;;  %v1858_v11 = vadd.f32 %v1847_v1, %v1788_v34 }
 0x1fd   : > { %v1959_v51 = vsel %vm492_vm0, %v1957_v10, %v1958_v20  ;;  %v1977_v41 = vadd.f32 %v1960_v53, %v1859_v42  ;;  %v1978_v14 = vadd.f32 %v1962_v18, %v1860_v48 }
 0x1fe   : > { %v1975_v54 = vadd.f32 %v1957_v10, %v1857_v17  ;;  %v1976_v59 = vadd.f32 %v1959_v51, %v1858_v11 }
 0x1ff   : > { %v2043_v5 = vrot.slane %v1977_v41, 7  ;;  %v2044_v49 = vrot.slane %v1978_v14, 7 }
 0x200   : > { %v2040_v58 = vrot.slane %v1975_v54, 7  ;;  %v2041_v52 = vrot.slane %v1976_v59, 7 }
 0x201   : > { %v2045_v40 = vsel %vm2033_vm1, %v2043_v5, %v2044_v49 }
 0x202   : > { %v2042_v13 = vsel %vm2033_vm1, %v2040_v58, %v2041_v52  ;;  %v2178_v21 = vadd.f32 %v4464_v30, %v2045_v40 }
 0x203   : > { %v2177_v37 = vadd.f32 %v4466_v63, %v2042_v13 }
 0x224   : > { %v2727_v33 = vpop.f32.mrb[2].mxu0 }
 0x225   : > { %v2308_v57 = vadd.f32 %v2727_v33, %v2178_v21  ;;  %v2296_v35 = vpop.f32.mrb[3].mxu0 }
 0x226   : > { %v2307_v8 = vadd.f32 %v2296_v35, %v2177_v37 }
 0x227   : > { %v2314_v6 = vadd.f32 %v4380_v9, %v2308_v57 }
 0x228   : > { %v2313_v36 = vadd.f32 %v4380_v9, %v2307_v8  ;;  %v2341_v9 = vld [vmem:[%s3291_s15 + $0x10] sm:$0xff]  ;;  %s2391_s15 = scalar_lea.sflag [#allocation6], %s3285_s21 }
 0x229   : > { %v2580_v44 = vmul.f32 -1.442695, %v2314_v6 }
 0x22a   : > { %v2579_v47 = vmul.f32 -1.442695, %v2313_v36 }
 0x22b   : > { %2880 = vpow2.f32 %v2580_v44 }
 0x22c   : > { %2882 = vpow2.f32 %v2579_v47 }
 0x235   : > { %v2881_v30 = vpop.eup %2880 }
 0x236   : > { %v2883_v63 = vpop.eup %2882  ;;  %v2330_v38 = vadd.f32 1.0, %v2881_v30 }
 0x237   : > { %v2329_v29 = vadd.f32 1.0, %v2883_v63 }
 0x238   : > { %2884 = vrcp.f32 %v2330_v38 }
 0x239   : > { %2886 = vrcp.f32 %v2329_v29 }
 0x242   : > { %v2885_v22 = vpop.eup %2884 }
 0x243   : > { %v2887_v55 = vpop.eup %2886  ;;  %v2346_v12 = vmul.f32 %v2885_v22, %v2342_v0  ;;  %v2358_v25 = vmul.f32 %v2885_v22, %v2584_v19  ;;  %v2371_v24 = vmul.f32 %v2885_v22, %v2592_v16  ;;  %v2384_v45 = vmul.f32 %v2885_v22, %v2600_v43 }
 0x244   : > { %v2345_v32 = vmul.f32 %v2887_v55, %v2341_v9  ;;  %v2357_v46 = vmul.f32 %v2887_v55, %v2583_v60  ;;  %v2370_v50 = vmul.f32 %v2887_v55, %v2591_v39  ;;  %v2383_v61 = vmul.f32 %v2887_v55, %v2599_v7 }
 0x245   : > { %2350 = vst [vmem:[%s4437_s6 + $0x18] sm:$0xff] %v2346_v12  ;;  %2588 = vst [vmem:[%s4437_s6 + $0x38] sm:$0xff] %v2358_v25 }
 0x246   : > { %2596 = vst [vmem:[%s4437_s6 + $0x58] sm:$0xff] %v2371_v24  ;;  %2604 = vst [vmem:[%s4437_s6 + $0x78] sm:$0xff] %v2384_v45 }
 0x247   : > { %2349 = vst [vmem:[%s4437_s6 + $0x10] sm:$0xff] %v2345_v32  ;;  %2587 = vst [vmem:[%s4437_s6 + $0x30] sm:$0xff] %v2357_v46 }
 0x248   : > { %2595 = vst [vmem:[%s4437_s6 + $0x50] sm:$0xff] %v2370_v50  ;;  %2603 = vst [vmem:[%s4437_s6 + $0x70] sm:$0xff] %v2383_v61 }
 0x249   : > { %3026 = shalt.err (!%p3023_p13)
}
 0x24a   : > { %s3027_s14 = scalar_lea.hbm %s4513_s11, 2048  ;;  %s3031_s16 = scalar_lea.hbm %s4571_s4, 4096 }
 0x24b   : > { %p3028_p2 = scmp.ne.s32.totalorder %s4513_s11, %s3027_s14  ;;  %p3032_p0 = scmp.lt.u32.totalorder %s4513_s11, %s4571_s4 }
 0x24c   : > { %p3033_p3 = scmp.lt.u32.totalorder %s3031_s16, %s3027_s14  ;;  %p3035_p9 = scmp.lt.u32.totalorder %s3027_s14, %s4513_s11 }
 0x24d   : > { %p3029_p6 = pnand %p3028_p2, %p3230_p7 }
 0x24e   : > { %p3034_p5 = por %p3033_p3, %p3032_p0 }
 0x24f   : > { %p3030_p11 = pneg %p3029_p6 }
 0x250   : > { %p3036_p10 = por %p3035_p9, %p3034_p5 }
 0x252   : > { %p3037_p1 = pnand %p3036_p10, %p3030_p11 }
 0x254   : > { %3040 = shalt.err (!%p3037_p1)
}
 0x255   : > { %s3096_s29 = smov 128   ;;  %s3097_s6 = smov 8  }
 0x256   : > { %2810 = dma.vmem_to_hbm [thread:$0]  (%p3230_p7), %s4515_s8, 2048, %s4513_s11, %s2391_s15, %s3096_s29, %s3096_s29, %s3097_s6  }
 0x257 PF: > { %s2419_s25 = sand.u32 1, %s3075_s17   ;;  %p4720_p4 = scmp.ne.s32.totalorder %s4637_s23, 0 }
 0x258   : > { %p4721_p8 = scmp.ge.s32.totalorder %s3087_s20, 2  ;;  %s2420_s3 = scalar_lea.sflag [#allocation6], %s2419_s25 }
 0x25a   : > { %p2824_p12 = pnand %p4721_p8, %p4720_p4 }
 0x25c   : > { %3070 = dma.done.wait (!%p2824_p12), %s2420_s3, 2048  }
 0x25d   : > { %3072 = vsyncadd (!%p2824_p12), %s2420_s3, 4294965248  ;;  %p20_p13 = scmp.ge.s32.totalorder %s3220_s26, 4   ;;  %s4722_s17 = smov %s3079_s18 }
 0x25e   : > { %s4723_s18 = smov %s3083_s19  ;;  %s4724_s19 = smov %s3236_s5 }
 0x25f   : > { %s4725_s20 = smov %s3220_s26  ;;  %22 = sbr.rel (!%p20_p13) target bundleno = 9 (0x9), region = 104 }
 0x266   :  { %2425 = vsyncpa [#allocation5], 1 }
 0x267   :  { %2427 = vsyncpa [#allocation5 + $0x1], 1 }
 0x268   :  { %2428 = vsyncpa [#allocation9], 1 }
 0x269   :  { %2429 = vsyncpa [#allocation6], 1 }
 0x26a   :  { %2431 = vsyncpa [#allocation6 + $0x1], 1 }
 0x26b   :  { %2432 = vsyncpa [#allocation7], 1 }
 0x26c   :  { %2434 = vsyncpa [#allocation7 + $0x1], 1 }

</bundles_post_ra>
